<compile_context>
chip_gen: v7x
topology: tpu7x:2x2x1
jax: 0.10.0
libtpu: 0.0.40
codegen_flags: <defaults>
</compile_context>

<pallas_src>
import math

import numpy as np

import jax
import jax.numpy as jnp
from jax import lax
from jax.experimental import pallas as pl
from jax.experimental.pallas import tpu as pltpu

ROUTINGS = 3
DIM_CAPS = 8
OUT_DIM_CAPS = 16

T_IN = 180            # input window length; NCHW input is (B, C, 180, 1)
CONV_A_K = 3          # conv_basic_dy taps (3x1 conv, pad 1)
CONV_B_K = 9          # PrimaryCapsule taps (9x1 conv, pad 0)
T_PAD = T_IN + 2      # conv_basic_dy zero padding applied host-side

# (conv_basic_dy stride, PrimaryCapsule stride, channels)
LAYER_CFG = [(1, 5, 8), (2, 7, 16), (3, 9, 32)]


def _layer_dims(s_a, s_b, c_out):
    t1 = (T_PAD - CONV_A_K) // s_a + 1        # conv_basic_dy output length
    t2 = (t1 - CONV_B_K) // s_b + 1           # PrimaryCapsule conv output length
    return t1, t2, t2 * (c_out // DIM_CAPS)   # ..., capsules produced by this layer


IN_CAPS = sum(_layer_dims(*cfg)[2] for cfg in LAYER_CFG)   # 35 + 24 + 24 = 83
IN_CAPS_PAD = 128                                          # lane-dense routing axis


# ---------------------------------------------------------------------------
# The fused kernel: one grid step == one batch element (batch axis "parallel").
# ---------------------------------------------------------------------------
def facile_kernel(xt0, xt1, xt2,            # (1, 3*C_in, t1)   bf16 im2col'd input (transposed)
                  wa0, wa1, wa2,            # (c_out, 3*C_in)   bf16 conv_basic_dy weight
                  wb0, wb1, wb2,            # (c_out, 9*c_out)  bf16 PrimaryCapsule weight
                  bs0, bs1, bs2,            # (c_out, 4) f32 cols = [bias_a, bn_scale, bn_shift, bias_b]
                  se0, se1, se2,            # (t1, 9*t2) bf16 0/1 tap-selection (in-kernel gather)
                  wdc_ref,                  # (classes, 16, 8, 128) bf16 DenseCapsule weight (permuted+padded)
                  out_ref):                 # (1, 1, classes) capsule lengths (logits)
    xt = (xt0, xt1, xt2)
    wa = (wa0, wa1, wa2)
    wb = (wb0, wb1, wb2)
    bs = (bs0, bs1, bs2)
    se = (se0, se1, se2)
    classes = wdc_ref.shape[0]

    blocks = []                                              # (8, t2) squashed capsule blocks
    for l, (s_a, s_b, c_out) in enumerate(LAYER_CFG):
        t1, t2, _ = _layer_dims(s_a, s_b, c_out)
        g = c_out // DIM_CAPS

        # ---- conv_basic_dy (3x1, stride s_a) as ONE K=3*C_in matmul ----
        # TODO(synk): conv_basic_dy's dynamic-attention ("dy") branch is not
        #             public; only the static conv path is implemented.
        h = jnp.dot(wa[l][...], xt[l][0],
                    preferred_element_type=jnp.float32)       # (c_out, t1) f32
        h = jnp.maximum(h + bs[l][:, 0:1], 0.0)               # conv bias + ReLU
        h = h * bs[l][:, 1:2] + bs[l][:, 2:3]                 # BatchNorm2d (eval), any gamma sign

        # ---- PrimaryCapsule conv (9x1, stride s_b): 0/1 gather matmul, then
        #      one fused K = 9*c_out weight matmul. ----
        gt = jnp.dot(h.astype(jnp.bfloat16), se[l][...],
                     preferred_element_type=jnp.float32)      # (c_out, 9*t2)
        hc = jnp.concatenate(
            [gt[:, k * t2:(k + 1) * t2] for k in range(CONV_B_K)],
            axis=0).astype(jnp.bfloat16)                      # (9*c_out, t2)
        y = jnp.dot(wb[l][...], hc,
                    preferred_element_type=jnp.float32)
        y = y + bs[l][:, 3:4]                                 # (c_out, t2)

        # ---- 8-D capsules (8 channels per position) + squash ----
        for gg in range(g):
            blk = y[gg * DIM_CAPS:(gg + 1) * DIM_CAPS, :]     # (8, t2)
            sq = jnp.sum(blk * blk, axis=0, keepdims=True)    # (1, t2)
            blocks.append(blk * (sq * lax.rsqrt(sq + 1e-16) / (1.0 + sq)))
        # Dropout layers are identity in eval mode.

    # ---- ConcatLayer: lane-dense capsule slab u[d, i]; the ConcatLayer capsule
    #      order is folded into the host-side permutation of the DC weight. ----
    blocks.append(jnp.zeros((DIM_CAPS, IN_CAPS_PAD - IN_CAPS), jnp.float32))
    u = jnp.concatenate(blocks, axis=1)                       # (8, 128), pad lanes exactly 0

    # ---- DenseCapsule: x_hat per class (no full-weight materialisation) ----
    xh = []
    for j in range(classes):
        wj = wdc_ref[j].astype(jnp.float32)                   # (16, 8, 128)
        xh.append(jnp.sum(wj * u[None, :, :], axis=1))        # (16, 128)
    x_hat = jnp.stack(xh, axis=0)                             # (classes, 16, 128)

    # ---- dynamic routing (3 iterations), lane-dense over in-capsules ----
    bb = jnp.zeros((classes, IN_CAPS_PAD), jnp.float32)       # routing logits
    v = None
    for r in range(ROUTINGS):
        bmax = jnp.max(bb, axis=0, keepdims=True)             # softmax over classes
        e = jnp.exp(bb - bmax)
        c = e / jnp.sum(e, axis=0, keepdims=True)             # (classes, 128)
        s = jnp.sum(c[:, None, :] * x_hat, axis=-1)           # (classes, 16)
        sq = jnp.sum(s * s, axis=-1, keepdims=True)
        v = s * (sq * lax.rsqrt(sq + 1e-16) / (1.0 + sq))     # squash -> (classes, 16)
        if r < ROUTINGS - 1:
            bb = bb + jnp.sum(v[:, :, None] * x_hat, axis=1)  # (classes, 128)

    # ---- NormLayer(dim=-1): capsule lengths are the logits (classes on lanes) ----
    lengths = jnp.sqrt(jnp.sum(v * v, axis=-1, keepdims=True))    # (classes, 1)
    out_ref[0] = jnp.transpose(lengths)                            # (1, classes)


# ---------------------------------------------------------------------------
# Host-side glue: parameter packing + the single pallas_call.
# ---------------------------------------------------------------------------
@jax.jit
def facile_forward(x_nchw, params):
    bsz = x_nchw.shape[0]
    c_in = x_nchw.shape[1]
    classes = params["w_dc"].shape[0]

    # NCHW (B, C, T, 1) -> (B, T, C); apply conv_basic_dy's zero padding (pad=1).
    x = jnp.squeeze(x_nchw, -1).transpose(0, 2, 1).astype(jnp.float32)
    x_pad = jnp.pad(x, ((0, 0), (1, 1), (0, 0)))

    xt_list, wa_list, wb_list, bs_list, se_list = [], [], [], [], []
    for (s_a, s_b, c_out), p in zip(LAYER_CFG, params["layers"]):
        t1, t2, _ = _layer_dims(s_a, s_b, c_out)

        # Host-side im2col of the tiny input, transposed: (B, 3*C_in, t1).
        tpos = np.arange(t1) * s_a
        xk = x_pad[:, tpos[:, None] + np.arange(CONV_A_K)[None, :], :]  # (B, t1, 3, C_in)
        xt = jnp.transpose(xk, (0, 2, 3, 1)).reshape(bsz, CONV_A_K * c_in, t1)
        xt_list.append(xt.astype(jnp.bfloat16))

        # Conv weights flattened for channel-major matmuls.
        wa_list.append(jnp.transpose(p["w_a"], (2, 0, 1))
                       .reshape(c_out, CONV_A_K * c_in).astype(jnp.bfloat16))
        wb_list.append(jnp.transpose(p["w_b"], (2, 0, 1))
                       .reshape(c_out, CONV_B_K * c_out).astype(jnp.bfloat16))

        # BatchNorm2d (eval) as scale/shift applied after the ReLU (exact).
        scale = p["bn_gamma"] * lax.rsqrt(p["bn_var"] + 1e-5)
        shift = p["bn_beta"] - p["bn_mean"] * scale
        bs_list.append(jnp.stack([p["b_a"], scale, shift, p["b_b"]],
                                 axis=1).astype(jnp.float32))            # (c_out, 4)

        # 0/1 tap-selection constant: column (k*t2 + t) picks row (t*s_b + k).
        sel = np.zeros((t1, CONV_B_K * t2), np.float32)
        tt = np.arange(t2)
        for k in range(CONV_B_K):
            sel[tt * s_b + k, k * t2 + tt] = 1.0
        se_list.append(jnp.asarray(sel, dtype=jnp.bfloat16))

    # DenseCapsule weight: permute the in-capsule axis to the kernel's lane order
    # (layer, group, position) and pad 83 -> 128 with exact zeros; bf16 for VMEM.
    perm = []
    cap_off = 0
    for (s_a, s_b, c_out) in LAYER_CFG:
        _, t2, n_caps = _layer_dims(s_a, s_b, c_out)
        g = c_out // DIM_CAPS
        for gg in range(g):
            for t in range(t2):
                perm.append(cap_off + t * g + gg)   # ConcatLayer capsule index
        cap_off += n_caps
    wp = jnp.transpose(params["w_dc"][:, np.asarray(perm), :, :], (0, 2, 3, 1))
    wp = jnp.pad(wp, ((0, 0), (0, 0), (0, 0), (0, IN_CAPS_PAD - IN_CAPS)))
    wp = wp.astype(jnp.bfloat16)                                          # (classes,16,8,128)

    operands = xt_list + wa_list + wb_list + bs_list + se_list + [wp]

    in_specs = []
    for a in xt_list:                                   # batch-blocked inputs
        in_specs.append(pl.BlockSpec((1,) + a.shape[1:], lambda i: (i, 0, 0)))
    for a in operands[len(xt_list):]:                   # resident constants
        in_specs.append(pl.BlockSpec(a.shape, lambda i, _n=a.ndim: (0,) * _n))

    out = pl.pallas_call(
        facile_kernel,
        grid=(bsz,),
        in_specs=in_specs,
        out_specs=pl.BlockSpec((1, 1, classes), lambda i: (i, 0, 0)),
        out_shape=jax.ShapeDtypeStruct((bsz, 1, classes), jnp.float32),
        compiler_params=pltpu.CompilerParams(dimension_semantics=("parallel",)),
    )(*operands)
    return out[:, 0, :]


# ---------------------------------------------------------------------------
# Parameter initialisation (fresh module, eval mode).
# ---------------------------------------------------------------------------
def init_params(key, c_in, classes):
    keys = jax.random.split(key, 4 * len(LAYER_CFG) + 1)
    layers = []
    i = 0
    for (_, _, c_out) in LAYER_CFG:
        w_a = jax.random.normal(keys[i], (CONV_A_K, c_in, c_out), jnp.float32) \
            / math.sqrt(CONV_A_K * c_in)
        b_a = 0.01 * jax.random.normal(keys[i + 1], (c_out,), jnp.float32)
        w_b = jax.random.normal(keys[i + 2], (CONV_B_K, c_out, c_out), jnp.float32) \
            / math.sqrt(CONV_B_K * c_out)
        b_b = 0.01 * jax.random.normal(keys[i + 3], (c_out,), jnp.float32)
        i += 4
        layers.append(dict(
            w_a=w_a, b_a=b_a, w_b=w_b, b_b=b_b,
            # BatchNorm2d eval-mode parameters / running stats of a fresh module.
            bn_gamma=jnp.ones((c_out,), jnp.float32),
            bn_beta=jnp.zeros((c_out,), jnp.float32),
            bn_mean=jnp.zeros((c_out,), jnp.float32),
            bn_var=jnp.ones((c_out,), jnp.float32)))
    # DenseCapsule weight: 0.01 * randn(classes, 83, 16, 8)
    w_dc = 0.01 * jax.random.normal(
        keys[-1], (classes, IN_CAPS, OUT_DIM_CAPS, DIM_CAPS), jnp.float32)
    return dict(layers=layers, w_dc=w_dc)


if __name__ == "__main__":
    key = jax.random.PRNGKey(0)
    k_param, k_input = jax.random.split(key)

    B, C_IN, CLASSES = 2, 3, 4            # T=180 yields exactly 83 primary capsules
    params = init_params(k_param, C_IN, CLASSES)
    x = jax.random.normal(k_input, (B, C_IN, T_IN, 1), jnp.float32)   # NCHW input

    logits = facile_forward(x, params)
    logits = jax.block_until_ready(logits)

    assert logits.shape == (B, CLASSES), logits.shape
    assert bool(jnp.all(jnp.isfinite(logits)))
    print("KERNEL_OK")
</pallas_src>

<mosaic_0001>
module attributes {stable_mosaic.version = 11 : i64} {
  func.func @facile_kernel(%arg0: i32, %arg1: memref<1x9x180xbf16, #tpu.memory_space<vmem>>, %arg2: memref<1x9x90xbf16, #tpu.memory_space<vmem>>, %arg3: memref<1x9x60xbf16, #tpu.memory_space<vmem>>, %arg4: memref<8x9xbf16, #tpu.memory_space<vmem>>, %arg5: memref<16x9xbf16, #tpu.memory_space<vmem>>, %arg6: memref<32x9xbf16, #tpu.memory_space<vmem>>, %arg7: memref<8x72xbf16, #tpu.memory_space<vmem>>, %arg8: memref<16x144xbf16, #tpu.memory_space<vmem>>, %arg9: memref<32x288xbf16, #tpu.memory_space<vmem>>, %arg10: memref<8x4xf32, #tpu.memory_space<vmem>>, %arg11: memref<16x4xf32, #tpu.memory_space<vmem>>, %arg12: memref<32x4xf32, #tpu.memory_space<vmem>>, %arg13: memref<180x315xbf16, #tpu.memory_space<vmem>>, %arg14: memref<90x108xbf16, #tpu.memory_space<vmem>>, %arg15: memref<60x54xbf16, #tpu.memory_space<vmem>>, %arg16: memref<4x16x8x128xbf16, #tpu.memory_space<vmem>>, %arg17: memref<1x1x4xf32, #tpu.memory_space<vmem>>) attributes {dimension_semantics = [#tpu.dimension_semantics<parallel>], iteration_bounds = array<i64: 2>, scalar_prefetch = 0 : i64, scratch_operands = 0 : i64, tpu.core_type = #tpu.core_type<tc>, window_params = [{transform_indices = @transform_0, window_bounds = array<i64: 1, 9, 180>}, {transform_indices = @transform_1, window_bounds = array<i64: 1, 9, 90>}, {transform_indices = @transform_2, window_bounds = array<i64: 1, 9, 60>}, {pipeline_mode = #tpu.pipeline_mode<synchronous>, transform_indices = @transform_3, window_bounds = array<i64: 8, 9>}, {pipeline_mode = #tpu.pipeline_mode<synchronous>, transform_indices = @transform_4, window_bounds = array<i64: 16, 9>}, {pipeline_mode = #tpu.pipeline_mode<synchronous>, transform_indices = @transform_5, window_bounds = array<i64: 32, 9>}, {pipeline_mode = #tpu.pipeline_mode<synchronous>, transform_indices = @transform_6, window_bounds = array<i64: 8, 72>}, {pipeline_mode = #tpu.pipeline_mode<synchronous>, transform_indices = @transform_7, window_bounds = array<i64: 16, 144>}, {pipeline_mode = #tpu.pipeline_mode<synchronous>, transform_indices = @transform_8, window_bounds = array<i64: 32, 288>}, {pipeline_mode = #tpu.pipeline_mode<synchronous>, transform_indices = @transform_9, window_bounds = array<i64: 8, 4>}, {pipeline_mode = #tpu.pipeline_mode<synchronous>, transform_indices = @transform_10, window_bounds = array<i64: 16, 4>}, {pipeline_mode = #tpu.pipeline_mode<synchronous>, transform_indices = @transform_11, window_bounds = array<i64: 32, 4>}, {pipeline_mode = #tpu.pipeline_mode<synchronous>, transform_indices = @transform_12, window_bounds = array<i64: 180, 315>}, {pipeline_mode = #tpu.pipeline_mode<synchronous>, transform_indices = @transform_13, window_bounds = array<i64: 90, 108>}, {pipeline_mode = #tpu.pipeline_mode<synchronous>, transform_indices = @transform_14, window_bounds = array<i64: 60, 54>}, {pipeline_mode = #tpu.pipeline_mode<synchronous>, transform_indices = @transform_15, window_bounds = array<i64: 4, 16, 8, 128>}, {transform_indices = @transform_16, window_bounds = array<i64: 1, 1, 4>}]} {
    %c0 = arith.constant 0 : index
    %c0_0 = arith.constant 0 : index
    %0 = vector.load %arg4[%c0, %c0_0] : memref<8x9xbf16, #tpu.memory_space<vmem>>, vector<8x9xbf16>
    %c0_1 = arith.constant 0 : index
    %c0_2 = arith.constant 0 : index
    %c0_3 = arith.constant 0 : index
    %1 = vector.load %arg1[%c0_1, %c0_2, %c0_3] : memref<1x9x180xbf16, #tpu.memory_space<vmem>>, vector<1x9x180xbf16>
    %2 = vector.shape_cast %1 : vector<1x9x180xbf16> to vector<9x180xbf16>
    %cst = arith.constant dense<0.000000e+00> : vector<8x180xf32>
    %3 = tpu.matmul %0, %2, %cst {dimension_numbers = #tpu.dot_dimension_numbers<[1], [0], [0], [1], [0, 0, 1, 1], [], []>} : vector<8x9xbf16>, vector<9x180xbf16>, vector<8x180xf32> -> vector<8x180xf32>
    %c0_4 = arith.constant 0 : index
    %c0_5 = arith.constant 0 : index
    %4 = vector.load %arg10[%c0_4, %c0_5] : memref<8x4xf32, #tpu.memory_space<vmem>>, vector<8x1xf32>
    %5 = vector.broadcast %4 : vector<8x1xf32> to vector<8x180xf32>
    %6 = arith.addf %3, %5 : vector<8x180xf32>
    %cst_6 = arith.constant 0.000000e+00 : f32
    %7 = vector.broadcast %cst_6 : f32 to vector<8x180xf32>
    %8 = arith.maximumf %6, %7 : vector<8x180xf32>
    %c0_7 = arith.constant 0 : index
    %c1 = arith.constant 1 : index
    %9 = vector.load %arg10[%c0_7, %c1] : memref<8x4xf32, #tpu.memory_space<vmem>>, vector<8x1xf32>
    %10 = vector.broadcast %9 : vector<8x1xf32> to vector<8x180xf32>
    %11 = arith.mulf %8, %10 : vector<8x180xf32>
    %c0_8 = arith.constant 0 : index
    %c2 = arith.constant 2 : index
    %12 = vector.load %arg10[%c0_8, %c2] : memref<8x4xf32, #tpu.memory_space<vmem>>, vector<8x1xf32>
    %13 = vector.broadcast %12 : vector<8x1xf32> to vector<8x180xf32>
    %14 = arith.addf %11, %13 : vector<8x180xf32>
    %15 = arith.truncf %14 : vector<8x180xf32> to vector<8x180xbf16>
    %c0_9 = arith.constant 0 : index
    %c0_10 = arith.constant 0 : index
    %16 = vector.load %arg13[%c0_9, %c0_10] : memref<180x315xbf16, #tpu.memory_space<vmem>>, vector<180x315xbf16>
    %cst_11 = arith.constant dense<0.000000e+00> : vector<8x315xf32>
    %17 = tpu.matmul %15, %16, %cst_11 {dimension_numbers = #tpu.dot_dimension_numbers<[1], [0], [0], [1], [0, 0, 1, 1], [], []>} : vector<8x180xbf16>, vector<180x315xbf16>, vector<8x315xf32> -> vector<8x315xf32>
    %18 = vector.extract_strided_slice %17 {offsets = [0, 0], sizes = [8, 35], strides = [1, 1]} : vector<8x315xf32> to vector<8x35xf32>
    %19 = vector.extract_strided_slice %17 {offsets = [0, 35], sizes = [8, 35], strides = [1, 1]} : vector<8x315xf32> to vector<8x35xf32>
    %20 = vector.extract_strided_slice %17 {offsets = [0, 70], sizes = [8, 35], strides = [1, 1]} : vector<8x315xf32> to vector<8x35xf32>
    %21 = vector.extract_strided_slice %17 {offsets = [0, 105], sizes = [8, 35], strides = [1, 1]} : vector<8x315xf32> to vector<8x35xf32>
    %22 = vector.extract_strided_slice %17 {offsets = [0, 140], sizes = [8, 35], strides = [1, 1]} : vector<8x315xf32> to vector<8x35xf32>
    %23 = vector.extract_strided_slice %17 {offsets = [0, 175], sizes = [8, 35], strides = [1, 1]} : vector<8x315xf32> to vector<8x35xf32>
    %24 = vector.extract_strided_slice %17 {offsets = [0, 210], sizes = [8, 35], strides = [1, 1]} : vector<8x315xf32> to vector<8x35xf32>
    %25 = vector.extract_strided_slice %17 {offsets = [0, 245], sizes = [8, 35], strides = [1, 1]} : vector<8x315xf32> to vector<8x35xf32>
    %26 = vector.extract_strided_slice %17 {offsets = [0, 280], sizes = [8, 35], strides = [1, 1]} : vector<8x315xf32> to vector<8x35xf32>
    %27 = tpu.concatenate %18, %19, %20, %21, %22, %23, %24, %25, %26 in 0 : vector<8x35xf32>, vector<8x35xf32>, vector<8x35xf32>, vector<8x35xf32>, vector<8x35xf32>, vector<8x35xf32>, vector<8x35xf32>, vector<8x35xf32>, vector<8x35xf32> -> vector<72x35xf32>
    %28 = arith.truncf %27 : vector<72x35xf32> to vector<72x35xbf16>
    %c0_12 = arith.constant 0 : index
    %c0_13 = arith.constant 0 : index
    %29 = vector.load %arg7[%c0_12, %c0_13] : memref<8x72xbf16, #tpu.memory_space<vmem>>, vector<8x72xbf16>
    %cst_14 = arith.constant dense<0.000000e+00> : vector<8x35xf32>
    %30 = tpu.matmul %29, %28, %cst_14 {dimension_numbers = #tpu.dot_dimension_numbers<[1], [0], [0], [1], [0, 0, 1, 1], [], []>} : vector<8x72xbf16>, vector<72x35xbf16>, vector<8x35xf32> -> vector<8x35xf32>
    %c0_15 = arith.constant 0 : index
    %c3 = arith.constant 3 : index
    %31 = vector.load %arg10[%c0_15, %c3] : memref<8x4xf32, #tpu.memory_space<vmem>>, vector<8x1xf32>
    %32 = vector.broadcast %31 : vector<8x1xf32> to vector<8x35xf32>
    %33 = arith.addf %30, %32 : vector<8x35xf32>
    %34 = arith.mulf %33, %33 : vector<8x35xf32>
    %cst_16 = arith.constant dense<0.000000e+00> : vector<35xf32>
    %35 = vector.multi_reduction <add>, %34, %cst_16 [0] : vector<8x35xf32> to vector<35xf32>
    %36 = vector.shape_cast %35 : vector<35xf32> to vector<1x35xf32>
    %cst_17 = arith.constant 1.000000e-16 : f32
    %37 = vector.broadcast %cst_17 : f32 to vector<1x35xf32>
    %38 = arith.addf %36, %37 : vector<1x35xf32>
    %39 = math.rsqrt %38 : vector<1x35xf32>
    %40 = arith.mulf %36, %39 : vector<1x35xf32>
    %cst_18 = arith.constant 1.000000e+00 : f32
    %41 = vector.broadcast %cst_18 : f32 to vector<1x35xf32>
    %42 = arith.addf %41, %36 : vector<1x35xf32>
    %43 = arith.divf %40, %42 : vector<1x35xf32>
    %44 = vector.broadcast %43 : vector<1x35xf32> to vector<8x35xf32>
    %45 = arith.mulf %33, %44 : vector<8x35xf32>
    %c0_19 = arith.constant 0 : index
    %c0_20 = arith.constant 0 : index
    %46 = vector.load %arg5[%c0_19, %c0_20] : memref<16x9xbf16, #tpu.memory_space<vmem>>, vector<16x9xbf16>
    %c0_21 = arith.constant 0 : index
    %c0_22 = arith.constant 0 : index
    %c0_23 = arith.constant 0 : index
    %47 = vector.load %arg2[%c0_21, %c0_22, %c0_23] : memref<1x9x90xbf16, #tpu.memory_space<vmem>>, vector<1x9x90xbf16>
    %48 = vector.shape_cast %47 : vector<1x9x90xbf16> to vector<9x90xbf16>
    %cst_24 = arith.constant dense<0.000000e+00> : vector<16x90xf32>
    %49 = tpu.matmul %46, %48, %cst_24 {dimension_numbers = #tpu.dot_dimension_numbers<[1], [0], [0], [1], [0, 0, 1, 1], [], []>} : vector<16x9xbf16>, vector<9x90xbf16>, vector<16x90xf32> -> vector<16x90xf32>
    %c0_25 = arith.constant 0 : index
    %c0_26 = arith.constant 0 : index
    %50 = vector.load %arg11[%c0_25, %c0_26] : memref<16x4xf32, #tpu.memory_space<vmem>>, vector<16x1xf32>
    %51 = vector.broadcast %50 : vector<16x1xf32> to vector<16x90xf32>
    %52 = arith.addf %49, %51 : vector<16x90xf32>
    %cst_27 = arith.constant 0.000000e+00 : f32
    %53 = vector.broadcast %cst_27 : f32 to vector<16x90xf32>
    %54 = arith.maximumf %52, %53 : vector<16x90xf32>
    %c0_28 = arith.constant 0 : index
    %c1_29 = arith.constant 1 : index
    %55 = vector.load %arg11[%c0_28, %c1_29] : memref<16x4xf32, #tpu.memory_space<vmem>>, vector<16x1xf32>
    %56 = vector.broadcast %55 : vector<16x1xf32> to vector<16x90xf32>
    %57 = arith.mulf %54, %56 : vector<16x90xf32>
    %c0_30 = arith.constant 0 : index
    %c2_31 = arith.constant 2 : index
    %58 = vector.load %arg11[%c0_30, %c2_31] : memref<16x4xf32, #tpu.memory_space<vmem>>, vector<16x1xf32>
    %59 = vector.broadcast %58 : vector<16x1xf32> to vector<16x90xf32>
    %60 = arith.addf %57, %59 : vector<16x90xf32>
    %61 = arith.truncf %60 : vector<16x90xf32> to vector<16x90xbf16>
    %c0_32 = arith.constant 0 : index
    %c0_33 = arith.constant 0 : index
    %62 = vector.load %arg14[%c0_32, %c0_33] : memref<90x108xbf16, #tpu.memory_space<vmem>>, vector<90x108xbf16>
    %cst_34 = arith.constant dense<0.000000e+00> : vector<16x108xf32>
    %63 = tpu.matmul %61, %62, %cst_34 {dimension_numbers = #tpu.dot_dimension_numbers<[1], [0], [0], [1], [0, 0, 1, 1], [], []>} : vector<16x90xbf16>, vector<90x108xbf16>, vector<16x108xf32> -> vector<16x108xf32>
    %64 = vector.extract_strided_slice %63 {offsets = [0, 0], sizes = [16, 12], strides = [1, 1]} : vector<16x108xf32> to vector<16x12xf32>
    %65 = vector.extract_strided_slice %63 {offsets = [0, 12], sizes = [16, 12], strides = [1, 1]} : vector<16x108xf32> to vector<16x12xf32>
    %66 = vector.extract_strided_slice %63 {offsets = [0, 24], sizes = [16, 12], strides = [1, 1]} : vector<16x108xf32> to vector<16x12xf32>
    %67 = vector.extract_strided_slice %63 {offsets = [0, 36], sizes = [16, 12], strides = [1, 1]} : vector<16x108xf32> to vector<16x12xf32>
    %68 = vector.extract_strided_slice %63 {offsets = [0, 48], sizes = [16, 12], strides = [1, 1]} : vector<16x108xf32> to vector<16x12xf32>
    %69 = vector.extract_strided_slice %63 {offsets = [0, 60], sizes = [16, 12], strides = [1, 1]} : vector<16x108xf32> to vector<16x12xf32>
    %70 = vector.extract_strided_slice %63 {offsets = [0, 72], sizes = [16, 12], strides = [1, 1]} : vector<16x108xf32> to vector<16x12xf32>
    %71 = vector.extract_strided_slice %63 {offsets = [0, 84], sizes = [16, 12], strides = [1, 1]} : vector<16x108xf32> to vector<16x12xf32>
    %72 = vector.extract_strided_slice %63 {offsets = [0, 96], sizes = [16, 12], strides = [1, 1]} : vector<16x108xf32> to vector<16x12xf32>
    %73 = tpu.concatenate %64, %65, %66, %67, %68, %69, %70, %71, %72 in 0 : vector<16x12xf32>, vector<16x12xf32>, vector<16x12xf32>, vector<16x12xf32>, vector<16x12xf32>, vector<16x12xf32>, vector<16x12xf32>, vector<16x12xf32>, vector<16x12xf32> -> vector<144x12xf32>
    %74 = arith.truncf %73 : vector<144x12xf32> to vector<144x12xbf16>
    %c0_35 = arith.constant 0 : index
    %c0_36 = arith.constant 0 : index
    %75 = vector.load %arg8[%c0_35, %c0_36] : memref<16x144xbf16, #tpu.memory_space<vmem>>, vector<16x144xbf16>
    %cst_37 = arith.constant dense<0.000000e+00> : vector<16x12xf32>
    %76 = tpu.matmul %75, %74, %cst_37 {dimension_numbers = #tpu.dot_dimension_numbers<[1], [0], [0], [1], [0, 0, 1, 1], [], []>} : vector<16x144xbf16>, vector<144x12xbf16>, vector<16x12xf32> -> vector<16x12xf32>
    %c0_38 = arith.constant 0 : index
    %c3_39 = arith.constant 3 : index
    %77 = vector.load %arg11[%c0_38, %c3_39] : memref<16x4xf32, #tpu.memory_space<vmem>>, vector<16x1xf32>
    %78 = vector.broadcast %77 : vector<16x1xf32> to vector<16x12xf32>
    %79 = arith.addf %76, %78 : vector<16x12xf32>
    %80 = vector.extract_strided_slice %79 {offsets = [0, 0], sizes = [8, 12], strides = [1, 1]} : vector<16x12xf32> to vector<8x12xf32>
    %81 = arith.mulf %80, %80 : vector<8x12xf32>
    %cst_40 = arith.constant dense<0.000000e+00> : vector<12xf32>
    %82 = vector.multi_reduction <add>, %81, %cst_40 [0] : vector<8x12xf32> to vector<12xf32>
    %83 = vector.shape_cast %82 : vector<12xf32> to vector<1x12xf32>
    %cst_41 = arith.constant 1.000000e-16 : f32
    %84 = vector.broadcast %cst_41 : f32 to vector<1x12xf32>
    %85 = arith.addf %83, %84 : vector<1x12xf32>
    %86 = math.rsqrt %85 : vector<1x12xf32>
    %87 = arith.mulf %83, %86 : vector<1x12xf32>
    %cst_42 = arith.constant 1.000000e+00 : f32
    %88 = vector.broadcast %cst_42 : f32 to vector<1x12xf32>
    %89 = arith.addf %88, %83 : vector<1x12xf32>
    %90 = arith.divf %87, %89 : vector<1x12xf32>
    %91 = vector.broadcast %90 : vector<1x12xf32> to vector<8x12xf32>
    %92 = arith.mulf %80, %91 : vector<8x12xf32>
    %93 = vector.extract_strided_slice %79 {offsets = [8, 0], sizes = [8, 12], strides = [1, 1]} : vector<16x12xf32> to vector<8x12xf32>
    %94 = arith.mulf %93, %93 : vector<8x12xf32>
    %cst_43 = arith.constant dense<0.000000e+00> : vector<12xf32>
    %95 = vector.multi_reduction <add>, %94, %cst_43 [0] : vector<8x12xf32> to vector<12xf32>
    %96 = vector.shape_cast %95 : vector<12xf32> to vector<1x12xf32>
    %cst_44 = arith.constant 1.000000e-16 : f32
    %97 = vector.broadcast %cst_44 : f32 to vector<1x12xf32>
    %98 = arith.addf %96, %97 : vector<1x12xf32>
    %99 = math.rsqrt %98 : vector<1x12xf32>
    %100 = arith.mulf %96, %99 : vector<1x12xf32>
    %cst_45 = arith.constant 1.000000e+00 : f32
    %101 = vector.broadcast %cst_45 : f32 to vector<1x12xf32>
    %102 = arith.addf %101, %96 : vector<1x12xf32>
    %103 = arith.divf %100, %102 : vector<1x12xf32>
    %104 = vector.broadcast %103 : vector<1x12xf32> to vector<8x12xf32>
    %105 = arith.mulf %93, %104 : vector<8x12xf32>
    %c0_46 = arith.constant 0 : index
    %c0_47 = arith.constant 0 : index
    %106 = vector.load %arg6[%c0_46, %c0_47] : memref<32x9xbf16, #tpu.memory_space<vmem>>, vector<32x9xbf16>
    %c0_48 = arith.constant 0 : index
    %c0_49 = arith.constant 0 : index
    %c0_50 = arith.constant 0 : index
    %107 = vector.load %arg3[%c0_48, %c0_49, %c0_50] : memref<1x9x60xbf16, #tpu.memory_space<vmem>>, vector<1x9x60xbf16>
    %108 = vector.shape_cast %107 : vector<1x9x60xbf16> to vector<9x60xbf16>
    %cst_51 = arith.constant dense<0.000000e+00> : vector<32x60xf32>
    %109 = tpu.matmul %106, %108, %cst_51 {dimension_numbers = #tpu.dot_dimension_numbers<[1], [0], [0], [1], [0, 0, 1, 1], [], []>} : vector<32x9xbf16>, vector<9x60xbf16>, vector<32x60xf32> -> vector<32x60xf32>
    %c0_52 = arith.constant 0 : index
    %c0_53 = arith.constant 0 : index
    %110 = vector.load %arg12[%c0_52, %c0_53] : memref<32x4xf32, #tpu.memory_space<vmem>>, vector<32x1xf32>
    %111 = vector.broadcast %110 : vector<32x1xf32> to vector<32x60xf32>
    %112 = arith.addf %109, %111 : vector<32x60xf32>
    %cst_54 = arith.constant 0.000000e+00 : f32
    %113 = vector.broadcast %cst_54 : f32 to vector<32x60xf32>
    %114 = arith.maximumf %112, %113 : vector<32x60xf32>
    %c0_55 = arith.constant 0 : index
    %c1_56 = arith.constant 1 : index
    %115 = vector.load %arg12[%c0_55, %c1_56] : memref<32x4xf32, #tpu.memory_space<vmem>>, vector<32x1xf32>
    %116 = vector.broadcast %115 : vector<32x1xf32> to vector<32x60xf32>
    %117 = arith.mulf %114, %116 : vector<32x60xf32>
    %c0_57 = arith.constant 0 : index
    %c2_58 = arith.constant 2 : index
    %118 = vector.load %arg12[%c0_57, %c2_58] : memref<32x4xf32, #tpu.memory_space<vmem>>, vector<32x1xf32>
    %119 = vector.broadcast %118 : vector<32x1xf32> to vector<32x60xf32>
    %120 = arith.addf %117, %119 : vector<32x60xf32>
    %121 = arith.truncf %120 : vector<32x60xf32> to vector<32x60xbf16>
    %c0_59 = arith.constant 0 : index
    %c0_60 = arith.constant 0 : index
    %122 = vector.load %arg15[%c0_59, %c0_60] : memref<60x54xbf16, #tpu.memory_space<vmem>>, vector<60x54xbf16>
    %cst_61 = arith.constant dense<0.000000e+00> : vector<32x54xf32>
    %123 = tpu.matmul %121, %122, %cst_61 {dimension_numbers = #tpu.dot_dimension_numbers<[1], [0], [0], [1], [0, 0, 1, 1], [], []>} : vector<32x60xbf16>, vector<60x54xbf16>, vector<32x54xf32> -> vector<32x54xf32>
    %124 = vector.extract_strided_slice %123 {offsets = [0, 0], sizes = [32, 6], strides = [1, 1]} : vector<32x54xf32> to vector<32x6xf32>
    %125 = vector.extract_strided_slice %123 {offsets = [0, 6], sizes = [32, 6], strides = [1, 1]} : vector<32x54xf32> to vector<32x6xf32>
    %126 = vector.extract_strided_slice %123 {offsets = [0, 12], sizes = [32, 6], strides = [1, 1]} : vector<32x54xf32> to vector<32x6xf32>
    %127 = vector.extract_strided_slice %123 {offsets = [0, 18], sizes = [32, 6], strides = [1, 1]} : vector<32x54xf32> to vector<32x6xf32>
    %128 = vector.extract_strided_slice %123 {offsets = [0, 24], sizes = [32, 6], strides = [1, 1]} : vector<32x54xf32> to vector<32x6xf32>
    %129 = vector.extract_strided_slice %123 {offsets = [0, 30], sizes = [32, 6], strides = [1, 1]} : vector<32x54xf32> to vector<32x6xf32>
    %130 = vector.extract_strided_slice %123 {offsets = [0, 36], sizes = [32, 6], strides = [1, 1]} : vector<32x54xf32> to vector<32x6xf32>
    %131 = vector.extract_strided_slice %123 {offsets = [0, 42], sizes = [32, 6], strides = [1, 1]} : vector<32x54xf32> to vector<32x6xf32>
    %132 = vector.extract_strided_slice %123 {offsets = [0, 48], sizes = [32, 6], strides = [1, 1]} : vector<32x54xf32> to vector<32x6xf32>
    %133 = tpu.concatenate %124, %125, %126, %127, %128, %129, %130, %131, %132 in 0 : vector<32x6xf32>, vector<32x6xf32>, vector<32x6xf32>, vector<32x6xf32>, vector<32x6xf32>, vector<32x6xf32>, vector<32x6xf32>, vector<32x6xf32>, vector<32x6xf32> -> vector<288x6xf32>
    %134 = arith.truncf %133 : vector<288x6xf32> to vector<288x6xbf16>
    %c0_62 = arith.constant 0 : index
    %c0_63 = arith.constant 0 : index
    %135 = vector.load %arg9[%c0_62, %c0_63] : memref<32x288xbf16, #tpu.memory_space<vmem>>, vector<32x288xbf16>
    %cst_64 = arith.constant dense<0.000000e+00> : vector<32x6xf32>
    %136 = tpu.matmul %135, %134, %cst_64 {dimension_numbers = #tpu.dot_dimension_numbers<[1], [0], [0], [1], [0, 0, 1, 1], [], []>} : vector<32x288xbf16>, vector<288x6xbf16>, vector<32x6xf32> -> vector<32x6xf32>
    %c0_65 = arith.constant 0 : index
    %c3_66 = arith.constant 3 : index
    %137 = vector.load %arg12[%c0_65, %c3_66] : memref<32x4xf32, #tpu.memory_space<vmem>>, vector<32x1xf32>
    %138 = vector.broadcast %137 : vector<32x1xf32> to vector<32x6xf32>
    %139 = arith.addf %136, %138 : vector<32x6xf32>
    %140 = vector.extract_strided_slice %139 {offsets = [0, 0], sizes = [8, 6], strides = [1, 1]} : vector<32x6xf32> to vector<8x6xf32>
    %141 = arith.mulf %140, %140 : vector<8x6xf32>
    %cst_67 = arith.constant dense<0.000000e+00> : vector<6xf32>
    %142 = vector.multi_reduction <add>, %141, %cst_67 [0] : vector<8x6xf32> to vector<6xf32>
    %143 = vector.shape_cast %142 : vector<6xf32> to vector<1x6xf32>
    %cst_68 = arith.constant 1.000000e-16 : f32
    %144 = vector.broadcast %cst_68 : f32 to vector<1x6xf32>
    %145 = arith.addf %143, %144 : vector<1x6xf32>
    %146 = math.rsqrt %145 : vector<1x6xf32>
    %147 = arith.mulf %143, %146 : vector<1x6xf32>
    %cst_69 = arith.constant 1.000000e+00 : f32
    %148 = vector.broadcast %cst_69 : f32 to vector<1x6xf32>
    %149 = arith.addf %148, %143 : vector<1x6xf32>
    %150 = arith.divf %147, %149 : vector<1x6xf32>
    %151 = vector.broadcast %150 : vector<1x6xf32> to vector<8x6xf32>
    %152 = arith.mulf %140, %151 : vector<8x6xf32>
    %153 = vector.extract_strided_slice %139 {offsets = [8, 0], sizes = [8, 6], strides = [1, 1]} : vector<32x6xf32> to vector<8x6xf32>
    %154 = arith.mulf %153, %153 : vector<8x6xf32>
    %cst_70 = arith.constant dense<0.000000e+00> : vector<6xf32>
    %155 = vector.multi_reduction <add>, %154, %cst_70 [0] : vector<8x6xf32> to vector<6xf32>
    %156 = vector.shape_cast %155 : vector<6xf32> to vector<1x6xf32>
    %cst_71 = arith.constant 1.000000e-16 : f32
    %157 = vector.broadcast %cst_71 : f32 to vector<1x6xf32>
    %158 = arith.addf %156, %157 : vector<1x6xf32>
    %159 = math.rsqrt %158 : vector<1x6xf32>
    %160 = arith.mulf %156, %159 : vector<1x6xf32>
    %cst_72 = arith.constant 1.000000e+00 : f32
    %161 = vector.broadcast %cst_72 : f32 to vector<1x6xf32>
    %162 = arith.addf %161, %156 : vector<1x6xf32>
    %163 = arith.divf %160, %162 : vector<1x6xf32>
    %164 = vector.broadcast %163 : vector<1x6xf32> to vector<8x6xf32>
    %165 = arith.mulf %153, %164 : vector<8x6xf32>
    %166 = vector.extract_strided_slice %139 {offsets = [16, 0], sizes = [8, 6], strides = [1, 1]} : vector<32x6xf32> to vector<8x6xf32>
    %167 = arith.mulf %166, %166 : vector<8x6xf32>
    %cst_73 = arith.constant dense<0.000000e+00> : vector<6xf32>
    %168 = vector.multi_reduction <add>, %167, %cst_73 [0] : vector<8x6xf32> to vector<6xf32>
    %169 = vector.shape_cast %168 : vector<6xf32> to vector<1x6xf32>
    %cst_74 = arith.constant 1.000000e-16 : f32
    %170 = vector.broadcast %cst_74 : f32 to vector<1x6xf32>
    %171 = arith.addf %169, %170 : vector<1x6xf32>
    %172 = math.rsqrt %171 : vector<1x6xf32>
    %173 = arith.mulf %169, %172 : vector<1x6xf32>
    %cst_75 = arith.constant 1.000000e+00 : f32
    %174 = vector.broadcast %cst_75 : f32 to vector<1x6xf32>
    %175 = arith.addf %174, %169 : vector<1x6xf32>
    %176 = arith.divf %173, %175 : vector<1x6xf32>
    %177 = vector.broadcast %176 : vector<1x6xf32> to vector<8x6xf32>
    %178 = arith.mulf %166, %177 : vector<8x6xf32>
    %179 = vector.extract_strided_slice %139 {offsets = [24, 0], sizes = [8, 6], strides = [1, 1]} : vector<32x6xf32> to vector<8x6xf32>
    %180 = arith.mulf %179, %179 : vector<8x6xf32>
    %cst_76 = arith.constant dense<0.000000e+00> : vector<6xf32>
    %181 = vector.multi_reduction <add>, %180, %cst_76 [0] : vector<8x6xf32> to vector<6xf32>
    %182 = vector.shape_cast %181 : vector<6xf32> to vector<1x6xf32>
    %cst_77 = arith.constant 1.000000e-16 : f32
    %183 = vector.broadcast %cst_77 : f32 to vector<1x6xf32>
    %184 = arith.addf %182, %183 : vector<1x6xf32>
    %185 = math.rsqrt %184 : vector<1x6xf32>
    %186 = arith.mulf %182, %185 : vector<1x6xf32>
    %cst_78 = arith.constant 1.000000e+00 : f32
    %187 = vector.broadcast %cst_78 : f32 to vector<1x6xf32>
    %188 = arith.addf %187, %182 : vector<1x6xf32>
    %189 = arith.divf %186, %188 : vector<1x6xf32>
    %190 = vector.broadcast %189 : vector<1x6xf32> to vector<8x6xf32>
    %191 = arith.mulf %179, %190 : vector<8x6xf32>
    %cst_79 = arith.constant 0.000000e+00 : f32
    %192 = vector.broadcast %cst_79 : f32 to vector<8x45xf32>
    %193 = tpu.concatenate %45, %92, %105, %152, %165, %178, %191, %192 in 1 : vector<8x35xf32>, vector<8x12xf32>, vector<8x12xf32>, vector<8x6xf32>, vector<8x6xf32>, vector<8x6xf32>, vector<8x6xf32>, vector<8x45xf32> -> vector<8x128xf32>
    %c0_80 = arith.constant 0 : index
    %c0_81 = arith.constant 0 : index
    %c0_82 = arith.constant 0 : index
    %c0_83 = arith.constant 0 : index
    %194 = vector.load %arg16[%c0_80, %c0_81, %c0_82, %c0_83] : memref<4x16x8x128xbf16, #tpu.memory_space<vmem>>, vector<1x16x8x128xbf16>
    %195 = vector.shape_cast %194 : vector<1x16x8x128xbf16> to vector<16x8x128xbf16>
    %196 = arith.extf %195 : vector<16x8x128xbf16> to vector<16x8x128xf32>
    %197 = vector.shape_cast %193 : vector<8x128xf32> to vector<1x8x128xf32>
    %198 = vector.broadcast %197 : vector<1x8x128xf32> to vector<16x8x128xf32>
    %199 = arith.mulf %196, %198 : vector<16x8x128xf32>
    %cst_84 = arith.constant dense<0.000000e+00> : vector<16x128xf32>
    %200 = vector.multi_reduction <add>, %199, %cst_84 [1] : vector<16x8x128xf32> to vector<16x128xf32>
    %c1_85 = arith.constant 1 : index
    %c0_86 = arith.constant 0 : index
    %c0_87 = arith.constant 0 : index
    %c0_88 = arith.constant 0 : index
    %201 = vector.load %arg16[%c1_85, %c0_86, %c0_87, %c0_88] : memref<4x16x8x128xbf16, #tpu.memory_space<vmem>>, vector<1x16x8x128xbf16>
    %202 = vector.shape_cast %201 : vector<1x16x8x128xbf16> to vector<16x8x128xbf16>
    %203 = arith.extf %202 : vector<16x8x128xbf16> to vector<16x8x128xf32>
    %204 = vector.shape_cast %193 : vector<8x128xf32> to vector<1x8x128xf32>
    %205 = vector.broadcast %204 : vector<1x8x128xf32> to vector<16x8x128xf32>
    %206 = arith.mulf %203, %205 : vector<16x8x128xf32>
    %cst_89 = arith.constant dense<0.000000e+00> : vector<16x128xf32>
    %207 = vector.multi_reduction <add>, %206, %cst_89 [1] : vector<16x8x128xf32> to vector<16x128xf32>
    %c2_90 = arith.constant 2 : index
    %c0_91 = arith.constant 0 : index
    %c0_92 = arith.constant 0 : index
    %c0_93 = arith.constant 0 : index
    %208 = vector.load %arg16[%c2_90, %c0_91, %c0_92, %c0_93] : memref<4x16x8x128xbf16, #tpu.memory_space<vmem>>, vector<1x16x8x128xbf16>
    %209 = vector.shape_cast %208 : vector<1x16x8x128xbf16> to vector<16x8x128xbf16>
    %210 = arith.extf %209 : vector<16x8x128xbf16> to vector<16x8x128xf32>
    %211 = vector.shape_cast %193 : vector<8x128xf32> to vector<1x8x128xf32>
    %212 = vector.broadcast %211 : vector<1x8x128xf32> to vector<16x8x128xf32>
    %213 = arith.mulf %210, %212 : vector<16x8x128xf32>
    %cst_94 = arith.constant dense<0.000000e+00> : vector<16x128xf32>
    %214 = vector.multi_reduction <add>, %213, %cst_94 [1] : vector<16x8x128xf32> to vector<16x128xf32>
    %c3_95 = arith.constant 3 : index
    %c0_96 = arith.constant 0 : index
    %c0_97 = arith.constant 0 : index
    %c0_98 = arith.constant 0 : index
    %215 = vector.load %arg16[%c3_95, %c0_96, %c0_97, %c0_98] : memref<4x16x8x128xbf16, #tpu.memory_space<vmem>>, vector<1x16x8x128xbf16>
    %216 = vector.shape_cast %215 : vector<1x16x8x128xbf16> to vector<16x8x128xbf16>
    %217 = arith.extf %216 : vector<16x8x128xbf16> to vector<16x8x128xf32>
    %218 = vector.shape_cast %193 : vector<8x128xf32> to vector<1x8x128xf32>
    %219 = vector.broadcast %218 : vector<1x8x128xf32> to vector<16x8x128xf32>
    %220 = arith.mulf %217, %219 : vector<16x8x128xf32>
    %cst_99 = arith.constant dense<0.000000e+00> : vector<16x128xf32>
    %221 = vector.multi_reduction <add>, %220, %cst_99 [1] : vector<16x8x128xf32> to vector<16x128xf32>
    %222 = vector.shape_cast %200 : vector<16x128xf32> to vector<1x16x128xf32>
    %223 = vector.shape_cast %207 : vector<16x128xf32> to vector<1x16x128xf32>
    %224 = vector.shape_cast %214 : vector<16x128xf32> to vector<1x16x128xf32>
    %225 = vector.shape_cast %221 : vector<16x128xf32> to vector<1x16x128xf32>
    %226 = tpu.concatenate %222, %223, %224, %225 in 0 : vector<1x16x128xf32>, vector<1x16x128xf32>, vector<1x16x128xf32>, vector<1x16x128xf32> -> vector<4x16x128xf32>
    %cst_100 = arith.constant 0.000000e+00 : f32
    %227 = vector.broadcast %cst_100 : f32 to vector<4x128xf32>
    %cst_101 = arith.constant dense<0xFF800000> : vector<128xf32>
    %228 = vector.multi_reduction <maximumf>, %227, %cst_101 [0] : vector<4x128xf32> to vector<128xf32>
    %229 = vector.shape_cast %228 : vector<128xf32> to vector<1x128xf32>
    %230 = vector.broadcast %229 : vector<1x128xf32> to vector<4x128xf32>
    %231 = arith.subf %227, %230 : vector<4x128xf32>
    %232 = math.exp %231 : vector<4x128xf32>
    %cst_102 = arith.constant dense<0.000000e+00> : vector<128xf32>
    %233 = vector.multi_reduction <add>, %232, %cst_102 [0] : vector<4x128xf32> to vector<128xf32>
    %234 = vector.shape_cast %233 : vector<128xf32> to vector<1x128xf32>
    %235 = vector.broadcast %234 : vector<1x128xf32> to vector<4x128xf32>
    %236 = arith.divf %232, %235 : vector<4x128xf32>
    %237 = vector.shape_cast %236 : vector<4x128xf32> to vector<4x1x128xf32>
    %238 = vector.broadcast %237 : vector<4x1x128xf32> to vector<4x16x128xf32>
    %239 = arith.mulf %238, %226 : vector<4x16x128xf32>
    %cst_103 = arith.constant dense<0.000000e+00> : vector<4x16xf32>
    %240 = vector.multi_reduction <add>, %239, %cst_103 [2] : vector<4x16x128xf32> to vector<4x16xf32>
    %241 = arith.mulf %240, %240 : vector<4x16xf32>
    %cst_104 = arith.constant dense<0.000000e+00> : vector<4xf32>
    %242 = vector.multi_reduction <add>, %241, %cst_104 [1] : vector<4x16xf32> to vector<4xf32>
    %243 = vector.shape_cast %242 : vector<4xf32> to vector<4x1xf32>
    %cst_105 = arith.constant 1.000000e-16 : f32
    %244 = vector.broadcast %cst_105 : f32 to vector<4x1xf32>
    %245 = arith.addf %243, %244 : vector<4x1xf32>
    %246 = math.rsqrt %245 : vector<4x1xf32>
    %247 = arith.mulf %243, %246 : vector<4x1xf32>
    %cst_106 = arith.constant 1.000000e+00 : f32
    %248 = vector.broadcast %cst_106 : f32 to vector<4x1xf32>
    %249 = arith.addf %248, %243 : vector<4x1xf32>
    %250 = arith.divf %247, %249 : vector<4x1xf32>
    %251 = vector.broadcast %250 : vector<4x1xf32> to vector<4x16xf32>
    %252 = arith.mulf %240, %251 : vector<4x16xf32>
    %253 = vector.shape_cast %252 : vector<4x16xf32> to vector<4x16x1xf32>
    %254 = vector.broadcast %253 : vector<4x16x1xf32> to vector<4x16x128xf32>
    %255 = arith.mulf %254, %226 : vector<4x16x128xf32>
    %cst_107 = arith.constant dense<0.000000e+00> : vector<4x128xf32>
    %256 = vector.multi_reduction <add>, %255, %cst_107 [1] : vector<4x16x128xf32> to vector<4x128xf32>
    %257 = arith.addf %227, %256 : vector<4x128xf32>
    %cst_108 = arith.constant dense<0xFF800000> : vector<128xf32>
    %258 = vector.multi_reduction <maximumf>, %257, %cst_108 [0] : vector<4x128xf32> to vector<128xf32>
    %259 = vector.shape_cast %258 : vector<128xf32> to vector<1x128xf32>
    %260 = vector.broadcast %259 : vector<1x128xf32> to vector<4x128xf32>
    %261 = arith.subf %257, %260 : vector<4x128xf32>
    %262 = math.exp %261 : vector<4x128xf32>
    %cst_109 = arith.constant dense<0.000000e+00> : vector<128xf32>
    %263 = vector.multi_reduction <add>, %262, %cst_109 [0] : vector<4x128xf32> to vector<128xf32>
    %264 = vector.shape_cast %263 : vector<128xf32> to vector<1x128xf32>
    %265 = vector.broadcast %264 : vector<1x128xf32> to vector<4x128xf32>
    %266 = arith.divf %262, %265 : vector<4x128xf32>
    %267 = vector.shape_cast %266 : vector<4x128xf32> to vector<4x1x128xf32>
    %268 = vector.broadcast %267 : vector<4x1x128xf32> to vector<4x16x128xf32>
    %269 = arith.mulf %268, %226 : vector<4x16x128xf32>
    %cst_110 = arith.constant dense<0.000000e+00> : vector<4x16xf32>
    %270 = vector.multi_reduction <add>, %269, %cst_110 [2] : vector<4x16x128xf32> to vector<4x16xf32>
    %271 = arith.mulf %270, %270 : vector<4x16xf32>
    %cst_111 = arith.constant dense<0.000000e+00> : vector<4xf32>
    %272 = vector.multi_reduction <add>, %271, %cst_111 [1] : vector<4x16xf32> to vector<4xf32>
    %273 = vector.shape_cast %272 : vector<4xf32> to vector<4x1xf32>
    %cst_112 = arith.constant 1.000000e-16 : f32
    %274 = vector.broadcast %cst_112 : f32 to vector<4x1xf32>
    %275 = arith.addf %273, %274 : vector<4x1xf32>
    %276 = math.rsqrt %275 : vector<4x1xf32>
    %277 = arith.mulf %273, %276 : vector<4x1xf32>
    %cst_113 = arith.constant 1.000000e+00 : f32
    %278 = vector.broadcast %cst_113 : f32 to vector<4x1xf32>
    %279 = arith.addf %278, %273 : vector<4x1xf32>
    %280 = arith.divf %277, %279 : vector<4x1xf32>
    %281 = vector.broadcast %280 : vector<4x1xf32> to vector<4x16xf32>
    %282 = arith.mulf %270, %281 : vector<4x16xf32>
    %283 = vector.shape_cast %282 : vector<4x16xf32> to vector<4x16x1xf32>
    %284 = vector.broadcast %283 : vector<4x16x1xf32> to vector<4x16x128xf32>
    %285 = arith.mulf %284, %226 : vector<4x16x128xf32>
    %cst_114 = arith.constant dense<0.000000e+00> : vector<4x128xf32>
    %286 = vector.multi_reduction <add>, %285, %cst_114 [1] : vector<4x16x128xf32> to vector<4x128xf32>
    %287 = arith.addf %257, %286 : vector<4x128xf32>
    %cst_115 = arith.constant dense<0xFF800000> : vector<128xf32>
    %288 = vector.multi_reduction <maximumf>, %287, %cst_115 [0] : vector<4x128xf32> to vector<128xf32>
    %289 = vector.shape_cast %288 : vector<128xf32> to vector<1x128xf32>
    %290 = vector.broadcast %289 : vector<1x128xf32> to vector<4x128xf32>
    %291 = arith.subf %287, %290 : vector<4x128xf32>
    %292 = math.exp %291 : vector<4x128xf32>
    %cst_116 = arith.constant dense<0.000000e+00> : vector<128xf32>
    %293 = vector.multi_reduction <add>, %292, %cst_116 [0] : vector<4x128xf32> to vector<128xf32>
    %294 = vector.shape_cast %293 : vector<128xf32> to vector<1x128xf32>
    %295 = vector.broadcast %294 : vector<1x128xf32> to vector<4x128xf32>
    %296 = arith.divf %292, %295 : vector<4x128xf32>
    %297 = vector.shape_cast %296 : vector<4x128xf32> to vector<4x1x128xf32>
    %298 = vector.broadcast %297 : vector<4x1x128xf32> to vector<4x16x128xf32>
    %299 = arith.mulf %298, %226 : vector<4x16x128xf32>
    %cst_117 = arith.constant dense<0.000000e+00> : vector<4x16xf32>
    %300 = vector.multi_reduction <add>, %299, %cst_117 [2] : vector<4x16x128xf32> to vector<4x16xf32>
    %301 = arith.mulf %300, %300 : vector<4x16xf32>
    %cst_118 = arith.constant dense<0.000000e+00> : vector<4xf32>
    %302 = vector.multi_reduction <add>, %301, %cst_118 [1] : vector<4x16xf32> to vector<4xf32>
    %303 = vector.shape_cast %302 : vector<4xf32> to vector<4x1xf32>
    %cst_119 = arith.constant 1.000000e-16 : f32
    %304 = vector.broadcast %cst_119 : f32 to vector<4x1xf32>
    %305 = arith.addf %303, %304 : vector<4x1xf32>
    %306 = math.rsqrt %305 : vector<4x1xf32>
    %307 = arith.mulf %303, %306 : vector<4x1xf32>
    %cst_120 = arith.constant 1.000000e+00 : f32
    %308 = vector.broadcast %cst_120 : f32 to vector<4x1xf32>
    %309 = arith.addf %308, %303 : vector<4x1xf32>
    %310 = arith.divf %307, %309 : vector<4x1xf32>
    %311 = vector.broadcast %310 : vector<4x1xf32> to vector<4x16xf32>
    %312 = arith.mulf %300, %311 : vector<4x16xf32>
    %313 = arith.mulf %312, %312 : vector<4x16xf32>
    %cst_121 = arith.constant dense<0.000000e+00> : vector<4xf32>
    %314 = vector.multi_reduction <add>, %313, %cst_121 [1] : vector<4x16xf32> to vector<4xf32>
    %315 = vector.shape_cast %314 : vector<4xf32> to vector<4x1xf32>
    %316 = math.sqrt %315 : vector<4x1xf32>
    %317 = tpu.transpose %316, [1, 0] : vector<4x1xf32> -> vector<1x4xf32>
    %c0_122 = arith.constant 0 : index
    %c0_123 = arith.constant 0 : index
    %c0_124 = arith.constant 0 : index
    %318 = vector.load %arg17[%c0_122, %c0_123, %c0_124] : memref<1x1x4xf32, #tpu.memory_space<vmem>>, vector<1x1x4xf32>
    %319 = vector.shape_cast %318 : vector<1x1x4xf32> to vector<1x4xf32>
    %320 = vector.shape_cast %317 : vector<1x4xf32> to vector<1x1x4xf32>
    tpu.vector_store %arg17[%c0_122, %c0_123, %c0_124], %320 {strides = array<i32>} : memref<1x1x4xf32, #tpu.memory_space<vmem>>, vector<1x1x4xf32>,
    return
  }
  func.func @transform_0(%arg0: i32) -> (i32, i32, i32) {
    %c0_i32 = arith.constant 0 : i32
    %c0_i32_0 = arith.constant 0 : i32
    %c0_i32_1 = arith.constant 0 : i32
    return %arg0, %c0_i32, %c0_i32_0 : i32, i32, i32
  }
  func.func @transform_1(%arg0: i32) -> (i32, i32, i32) {
    %c0_i32 = arith.constant 0 : i32
    %c0_i32_0 = arith.constant 0 : i32
    %c0_i32_1 = arith.constant 0 : i32
    return %arg0, %c0_i32, %c0_i32_0 : i32, i32, i32
  }
  func.func @transform_2(%arg0: i32) -> (i32, i32, i32) {
    %c0_i32 = arith.constant 0 : i32
    %c0_i32_0 = arith.constant 0 : i32
    %c0_i32_1 = arith.constant 0 : i32
    return %arg0, %c0_i32, %c0_i32_0 : i32, i32, i32
  }
  func.func @transform_3(%arg0: i32) -> (i32, i32) {
    %c0_i32 = arith.constant 0 : i32
    %c0_i32_0 = arith.constant 0 : i32
    %c0_i32_1 = arith.constant 0 : i32
    return %c0_i32, %c0_i32_0 : i32, i32
  }
  func.func @transform_4(%arg0: i32) -> (i32, i32) {
    %c0_i32 = arith.constant 0 : i32
    %c0_i32_0 = arith.constant 0 : i32
    %c0_i32_1 = arith.constant 0 : i32
    return %c0_i32, %c0_i32_0 : i32, i32
  }
  func.func @transform_5(%arg0: i32) -> (i32, i32) {
    %c0_i32 = arith.constant 0 : i32
    %c0_i32_0 = arith.constant 0 : i32
    %c0_i32_1 = arith.constant 0 : i32
    return %c0_i32, %c0_i32_0 : i32, i32
  }
  func.func @transform_6(%arg0: i32) -> (i32, i32) {
    %c0_i32 = arith.constant 0 : i32
    %c0_i32_0 = arith.constant 0 : i32
    %c0_i32_1 = arith.constant 0 : i32
    return %c0_i32, %c0_i32_0 : i32, i32
  }
  func.func @transform_7(%arg0: i32) -> (i32, i32) {
    %c0_i32 = arith.constant 0 : i32
    %c0_i32_0 = arith.constant 0 : i32
    %c0_i32_1 = arith.constant 0 : i32
    return %c0_i32, %c0_i32_0 : i32, i32
  }
  func.func @transform_8(%arg0: i32) -> (i32, i32) {
    %c0_i32 = arith.constant 0 : i32
    %c0_i32_0 = arith.constant 0 : i32
    %c0_i32_1 = arith.constant 0 : i32
    return %c0_i32, %c0_i32_0 : i32, i32
  }
  func.func @transform_9(%arg0: i32) -> (i32, i32) {
    %c0_i32 = arith.constant 0 : i32
    %c0_i32_0 = arith.constant 0 : i32
    %c0_i32_1 = arith.constant 0 : i32
    return %c0_i32, %c0_i32_0 : i32, i32
  }
  func.func @transform_10(%arg0: i32) -> (i32, i32) {
    %c0_i32 = arith.constant 0 : i32
    %c0_i32_0 = arith.constant 0 : i32
    %c0_i32_1 = arith.constant 0 : i32
    return %c0_i32, %c0_i32_0 : i32, i32
  }
  func.func @transform_11(%arg0: i32) -> (i32, i32) {
    %c0_i32 = arith.constant 0 : i32
    %c0_i32_0 = arith.constant 0 : i32
    %c0_i32_1 = arith.constant 0 : i32
    return %c0_i32, %c0_i32_0 : i32, i32
  }
  func.func @transform_12(%arg0: i32) -> (i32, i32) {
    %c0_i32 = arith.constant 0 : i32
    %c0_i32_0 = arith.constant 0 : i32
    %c0_i32_1 = arith.constant 0 : i32
    return %c0_i32, %c0_i32_0 : i32, i32
  }
  func.func @transform_13(%arg0: i32) -> (i32, i32) {
    %c0_i32 = arith.constant 0 : i32
    %c0_i32_0 = arith.constant 0 : i32
    %c0_i32_1 = arith.constant 0 : i32
    return %c0_i32, %c0_i32_0 : i32, i32
  }
  func.func @transform_14(%arg0: i32) -> (i32, i32) {
    %c0_i32 = arith.constant 0 : i32
    %c0_i32_0 = arith.constant 0 : i32
    %c0_i32_1 = arith.constant 0 : i32
    return %c0_i32, %c0_i32_0 : i32, i32
  }
  func.func @transform_15(%arg0: i32) -> (i32, i32, i32, i32) {
    %c0_i32 = arith.constant 0 : i32
    %c0_i32_0 = arith.constant 0 : i32
    %c0_i32_1 = arith.constant 0 : i32
    %c0_i32_2 = arith.constant 0 : i32
    %c0_i32_3 = arith.constant 0 : i32
    return %c0_i32, %c0_i32_0, %c0_i32_1, %c0_i32_2 : i32, i32, i32, i32
  }
  func.func @transform_16(%arg0: i32) -> (i32, i32, i32) {
    %c0_i32 = arith.constant 0 : i32
    %c0_i32_0 = arith.constant 0 : i32
    %c0_i32_1 = arith.constant 0 : i32
    return %arg0, %c0_i32, %c0_i32_0 : i32, i32, i32
  }
}

</mosaic_0001>

<bundles_post_ra>
// kernel: facile_forward.1
= control target key start
LH: loop header
LB: loop body
LE: loop exit
PB: predicated region body
PF: predicated region fallthrough
CT: control target
= control target key end

     0   :  { %s6377_s0 = inlined_call_operand.vmem [shape: bf16[2,9,180], index: 0, kind: input, shape index: {}]   ;;  %s6378_s1 = inlined_call_operand.vmem [shape: bf16[2,9,90], index: 1, kind: input, shape index: {}]   ;;  %s6379_s2 = inlined_call_operand.vmem [shape: bf16[2,9,60], index: 2, kind: input, shape index: {}]   ;;  %s6380_s3 = inlined_call_operand.vmem [shape: bf16[8,9], index: 3, kind: input, shape index: {}]   ;;  %s6381_s4 = inlined_call_operand.vmem [shape: bf16[16,9], index: 4, kind: input, shape index: {}]   ;;  %s6382_s5 = inlined_call_operand.vmem [shape: bf16[32,9], index: 5, kind: input, shape index: {}]   ;;  %s6383_s6 = inlined_call_operand.vmem [shape: bf16[8,72], index: 6, kind: input, shape index: {}]   ;;  %s6384_s7 = inlined_call_operand.vmem [shape: bf16[16,144], index: 7, kind: input, shape index: {}]   ;;  %s6385_s8 = inlined_call_operand.vmem [shape: bf16[32,288], index: 8, kind: input, shape index: {}]   ;;  %s6386_s9 = inlined_call_operand.vmem [shape: f32[8,4], index: 9, kind: input, shape index: {}]   ;;  %s6387_s10 = inlined_call_operand.vmem [shape: f32[16,4], index: 10, kind: input, shape index: {}]   ;;  %s6388_s11 = inlined_call_operand.vmem [shape: f32[32,4], index: 11, kind: input, shape index: {}]   ;;  %s6389_s12 = inlined_call_operand.vmem [shape: bf16[180,315], index: 12, kind: input, shape index: {}]   ;;  %s6390_s13 = inlined_call_operand.vmem [shape: bf16[90,108], index: 13, kind: input, shape index: {}]   ;;  %s6391_s14 = inlined_call_operand.vmem [shape: bf16[60,54], index: 14, kind: input, shape index: {}]   ;;  %s6392_s15 = inlined_call_operand.vmem [shape: bf16[4,16,8,128], index: 15, kind: input, shape index: {}]   ;;  %s6393_s16 = inlined_call_operand.hbm [shape: f32[2,1,4], index: 16, kind: output, shape index: {}]  }
   0x1   :  { %6432 = sst [smem:[#allocation40_spill]] %s6377_s0 }
   0x2   :  { %21 = vsyncpa [#allocation3], 0 }
   0x3   :  { %23 = vsyncpa [#allocation3 + $0x1], 0  ;;  %s4868_s21 = smov 0   ;;  %s4870_s22 = smov 0  }
   0x4   :  { %s4872_s23 = smov 0   ;;  %s4874_s24 = smov 0  }
   0x5 LB: > { %6433 = sst [smem:[#allocation5_spill]] %s4737_s21  ;;  %s4889_s25 = sadd.s32 4294967295, %s4749_s24   ;;  %s4749_s24 = sphi %s4874_s24, %s6560_s24   ;;  %s4745_s23 = sphi %s4872_s23, %s6562_s23   ;;  %s4741_s22 = sphi %s4870_s22, %s6564_s22   ;;  %s4737_s21 = sphi %s4868_s21, %s6563_s21  }
   0x6   : > { %6434 = sst [smem:[#allocation6_spill]] %s4745_s23  ;;  %s3911_s26 = sadd.s32 4294967294, %s4749_s24  }
   0x7   : > { %6435 = sst [smem:[#allocation7_spill]] %s4749_s24  ;;  %s4893_s27 = sadd.s32 1, %s4749_s24  }
   0x8   : > { %6436 = sst [smem:[#allocation8_spill]] %s4893_s27  ;;  %s387_s28 = sadd.s32 1, %s4745_s23 }
   0x9   : > { %s384_s29 = ssub.s32 %s4749_s24, %s4893_s27  ;;  %p397_p0 = scmp.ne.s32.totalorder %s4745_s23, %s4741_s22 }
   0xa   : > { %p385_p1 = scmp.eq.s32.totalorder %s384_s29, 0  ;;  %p398_p2 = scmp.eq.s32.totalorder %s4889_s25, 1 }
   0xb   : > { %p403_p3 = scmp.ne.s32.totalorder %s4741_s22, %s4737_s21  ;;  %p404_p4 = scmp.eq.s32.totalorder %s3911_s26, 1 }
   0xc   : > { %s4904_s30 = scalar_select %p385_p1, %s4745_s23, %s387_s28  }
   0xd   : > { %p4906_p5 = por %p398_p2, %p397_p0  ;;  %p4910_p6 = por %p404_p4, %p403_p3 }
   0xe   : > { %6437 = sst [smem:[#allocation9_spill]] %s4904_s30  ;;  %p3914_p7 = scmp.ge.s32.totalorder %s4749_s24, 1 }
   0xf   : > { %s6439_s17 = scalar_select %p4910_p6, 1, 0 }
  0x10   : > { %p485_p8 = scmp.lt.s32.totalorder %s4749_s24, 3 }
  0x11   : > { %6440 = sst [smem:[#allocation10_spill]] %s6439_s17 }
  0x12   : > { %p486_p9 = pnand %p3914_p7, %p485_p8 }
  0x14   : > { %489 = sbr.rel (%p486_p9) target bundleno = 3858 (0xf12), region = 84 }
  0x1b   : > { %p544_p10 = scmp.lt.s32.totalorder %s4889_s25, 1  ;;  %vm581_vm0 = vcmask 1043456   ;;  %v563_v0 = vld [vmem:[%s6386_s9] sm:$0xff]  ;;  %vm582_vm1 = vcmask 1044480   ;;  %v4751_v1 = vmov 65535   ;;  %v4752_v3 = vmov 0  }
  0x1c   : > { %v583_v2 = vsel %vm581_vm0, 4294967295, %v4751_v1  ;;  %623 = vmatprep.mubr.bf16.mxu1 %v4752_v3  ;;  %4398 = vset.pattern.permute.xlu0 %v4752_v3  ;;  %v4753_v4 = vmov 2   ;;  %s6441_s19 = sld [smem:[#allocation40_spill]]  ;;  %v4552_v6 = vld [vmem:[%s6389_s12 + $0x8] ss:$12 sps:$4 sm:$0xff]   ;;  %v4754_v8 = vmov 1  }
  0x1d   : > { %s4921_s20 = scalar_select %p544_p10, %s4889_s25, 1  ;;  %566 = vperm.xlu0 %4398, %v563_v0   ;;  %4400 = vset.pattern.permute.xlu1 %v4753_v4  ;;  %v4934_v5 = vsel %vm582_vm1, %v583_v2, 0  ;;  %v4551_v11 = vld [vmem:[%s6389_s12 + $0x4] ss:$12 sps:$4 sm:$0xff]   ;;  %v560_v13 = vld [vmem:[%s6380_s3] sm:$0xf] }
  0x1e   : > { %641 = vperm.xlu1 %4400, %v563_v0   ;;  %933 = vmatprep.subr.bf16.mxu0 %v4752_v3  ;;  %v4556_v14 = vld [vmem:[%s6389_s12 + $0x20] ss:$12 sps:$4 sm:$0xff]   ;;  %vm577_vm2 = vcmask 72704   ;;  %v4560_v16 = vld [vmem:[%s6389_s12 + $0x38] ss:$12 sps:$4 sm:$0xff]   ;;  %vm882_vm3 = vcmask 1041408  }
  0x1f   : > { %s4047_s26 = sshll.u32 %s4921_s20, 4  ;;  %s6400_s28 = sshll.u32 %s4921_s20, 3  ;;  %934 = vmatpush1.bf16.msra.mxu0 %v4552_v6  ;;  %v4549_v15 = vld [vmem:[%s6389_s12] ss:$12 sps:$4 sm:$0xff]   ;;  %v4555_v17 = vld [vmem:[%s6389_s12 + $0x1c] ss:$12 sps:$4 sm:$0xff]  }
  0x20   : > { %s4944_s24 = scalar_lea.vmem %s6378_s1, %s6400_s28  ;;  %935 = vmatprep.subr.bf16.mxu0 %v4752_v3  ;;  %v4553_v18 = vld [vmem:[%s6389_s12 + $0x18] ss:$12 sps:$4 sm:$0xff]   ;;  %v4564_v19 = vld [vmem:[%s6389_s12 + $0x50] ss:$12 sps:$4 sm:$0xff]   ;;  %v4559_v20 = vld [vmem:[%s6389_s12 + $0x34] ss:$12 sps:$4 sm:$0xff]  }
  0x21   : > { %4399 = vset.pattern.permute.xlu0 %v4754_v8  ;;  %v4557_v21 = vld [vmem:[%s6389_s12 + $0x30] ss:$12 sps:$4 sm:$0xff]   ;;  %v4568_v22 = vld [vmem:[%s6389_s12 + $0x68] ss:$12 sps:$4 sm:$0xff]   ;;  %v4563_v23 = vld [vmem:[%s6389_s12 + $0x4c] ss:$12 sps:$4 sm:$0xff]  }
  0x22   : > { %s548_s30 = scalar_lea.vmem %s6441_s19, %s4047_s26  ;;  %635 = vperm.xlu0 %4399, %v563_v0   ;;  %4412 = vset.pattern.permute.xlu1 %v4752_v3  ;;  %v4561_v24 = vld [vmem:[%s6389_s12 + $0x48] ss:$12 sps:$4 sm:$0xff]   ;;  %v4572_v25 = vld [vmem:[%s6389_s12 + $0x80] ss:$12 sps:$4 sm:$0xff]   ;;  %v4567_v26 = vld [vmem:[%s6389_s12 + $0x64] ss:$12 sps:$4 sm:$0xff]  }
  0x23   : > { %v4546_v7 = vld [vmem:[%s548_s30 + $0x4] ss:$8 sps:$4 sm:$0x1f]   ;;  %v4548_v10 = vld [vmem:[%s548_s30] ss:$8 sps:$4 sm:$0x1f]   ;;  %936 = vmatpush1.bf16.msra.mxu0 %v4556_v14 }
  0x24   : > { %v589_v9 = vand.u32 %v4546_v7, %v4934_v5  ;;  %v586_v12 = vand.u32 %v4548_v10, %v4934_v5  ;;  %937 = vmatprep.subr.bf16.mxu0 %v4752_v3  ;;  %v4565_v27 = vld [vmem:[%s6389_s12 + $0x60] ss:$12 sps:$4 sm:$0xff]   ;;  %v4576_v28 = vld [vmem:[%s6389_s12 + $0x98] ss:$12 sps:$4 sm:$0xff]   ;;  %v4571_v29 = vld [vmem:[%s6389_s12 + $0x7c] ss:$12 sps:$4 sm:$0xff]  }
  0x25   : > { %v4569_v30 = vld [vmem:[%s6389_s12 + $0x78] ss:$12 sps:$4 sm:$0xff]   ;;  %v4580_v31 = vld [vmem:[%s6389_s12 + $0xb0] ss:$12 sps:$4 sm:$0xff]   ;;  %v4575_v32 = vld [vmem:[%s6389_s12 + $0x94] ss:$12 sps:$4 sm:$0xff]  }
  0x26   : > { %591 = vmatprep.subr.bf16.mxu1 %v589_v9  ;;  %4411 = vset.pattern.permute.xlu0 %v4752_v3  ;;  %v4573_v33 = vld [vmem:[%s6389_s12 + $0x90] ss:$12 sps:$4 sm:$0xff]   ;;  %v4584_v34 = vld [vmem:[%s6389_s12 + $0xc8] ss:$12 sps:$4 sm:$0xff]   ;;  %v4579_v35 = vld [vmem:[%s6389_s12 + $0xac] ss:$12 sps:$4 sm:$0xff]  }
  0x27   : > { %592 = vmatpush1.bf16.msra.mxu1 %v586_v12  ;;  %938 = vmatpush1.bf16.msra.mxu0 %v4560_v16  ;;  %v4577_v36 = vld [vmem:[%s6389_s12 + $0xa8] ss:$12 sps:$4 sm:$0xff]   ;;  %v4583_v37 = vld [vmem:[%s6389_s12 + $0xc4] ss:$12 sps:$4 sm:$0xff]   ;;  %v4581_v38 = vld [vmem:[%s6389_s12 + $0xc0] ss:$12 sps:$4 sm:$0xff]  }
  0x28   : > { %892 = vmatprep.subr.bf16.mxu1 %v4551_v11  ;;  %939 = vmatprep.subr.bf16.mxu0 %v4752_v3  ;;  %v4587_v39 = vld [vmem:[%s6389_s12 + $0xdc] ss:$12 sps:$4 sm:$0xff]   ;;  %v4585_v40 = vld [vmem:[%s6389_s12 + $0xd8] ss:$12 sps:$4 sm:$0xff]   ;;  %v4588_v41 = vld [vmem:[%s6389_s12 + $0xe0] ss:$12 sps:$4 sm:$0xff]  }
  0x29   : > { %v4591_v42 = vld [vmem:[%s6389_s12 + $0xf4] ss:$12 sps:$4 sm:$0xff]   ;;  %v4589_v43 = vld [vmem:[%s6389_s12 + $0xf0] ss:$12 sps:$4 sm:$0xff]   ;;  %v4592_v44 = vld [vmem:[%s6389_s12 + $0xf8] ss:$12 sps:$4 sm:$0xff]  }
  0x2a   : > { %3923 = vmatmul.mubr.msk.bf16.vlgmr.msra.gmra.mrb[0].mxu1 %vm577_vm2, %v560_v13  ;;  %v692_v45 = vld [vmem:[%s6389_s12 + $0x108] sm:$0x33]  ;;  %v4595_v48 = vld [vmem:[%s6389_s12 + $0x110] ss:$0 sps:$4 sm:$0x33]   ;;  %v4755_v51 = vmov 0.0  }
  0x2b   : > { %893 = vmatpush1.bf16.msra.mxu1 %v4549_v15  ;;  %940 = vmatpush1.bf16.msra.mxu0 %v4564_v19  ;;  %v3958_v46 = vcombine.high %v692_v45, %v692_v45  ;;  %v3957_v47 = vcombine.low %v692_v45, %v692_v45  ;;  %v890_v50 = vsel %vm882_vm3, %v4595_v48, 0  ;;  %vm878_vm4 = vcmask 424960   ;;  %s4756_s26 = smov 58   ;;  %s4757_s23 = smov 93   ;;  %v5077_v19 = vld [vmem:[%s6387_s10 + $0x8] sm:$0xff]  ;;  %v4598_v45 = vld [vmem:[%s6390_s13] sm:$0xff]  }
  0x2c   : > { %894 = vmatprep.subr.bf16.mxu1 %v4555_v17  ;;  %941 = vmatprep.subr.bf16.mxu0 %v4752_v3  ;;  %s4758_s21 = smov 81   ;;  %s4759_s27 = smov 23   ;;  %vm4762_vm5 = vmmov 0   ;;  %vm985_vm6 = vcmask 187392   ;;  %vm1002_vm7 = vcmask 89088   ;;  %vm1018_vm8 = vcmask 588800  }
  0x2d   : > { %v884_v49 = vsel %vm882_vm3, %v3957_v47, 0  ;;  %s4760_s17 = smov 46   ;;  %s4761_s29 = smov 116   ;;  %v4600_v47 = vld [vmem:[%s6390_s13 + $0x10] sm:$0xff]   ;;  %v4601_v48 = vld [vmem:[%s6390_s13 + $0x18] sm:$0xff]   ;;  %vm1224_vm9 = vcmask 736256  }
  0x2e   : > { %s4763_s30 = smov 11   ;;  %s4764_s28 = smov 104   ;;  %vm1613_vm10 = vcmask 1045504   ;;  %vm1606_vm11 = vcmask 490496   ;;  %vm1350_vm12 = vcmask 130048   ;;  %vm1838_vm13 = vcmask 261120  }
  0x2f   : > { %895 = vmatpush1.bf16.msra.mxu1 %v4553_v18  ;;  %942 = vmatpush1.bf16.msra.mxu0 %v4568_v22  ;;  %s4768_s18 = smov 68   ;;  %s4770_s19 = smov 44   ;;  %vm1396_vm14 = vcmask 97280   ;;  %vm1944_vm15 = vcmask 48128  }
  0x30   : > { %896 = vmatprep.subr.bf16.mxu1 %v4559_v20  ;;  %943 = vmatprep.subr.bf16.mxu0 %v4752_v3  ;;  %v5082_v20 = vld [vmem:[%s6387_s10] sm:$0xff] }
  0x33   : > { %897 = vmatpush1.bf16.msra.mxu1 %v4557_v21  ;;  %944 = vmatpush1.bf16.msra.mxu0 %v4572_v25 }
  0x34   : > { %898 = vmatprep.subr.bf16.mxu1 %v4563_v23  ;;  %945 = vmatprep.subr.bf16.mxu0 %v4752_v3 }
  0x37   : > { %899 = vmatpush1.bf16.msra.mxu1 %v4561_v24  ;;  %946 = vmatpush1.bf16.msra.mxu0 %v4576_v28 }
  0x38   : > { %900 = vmatprep.subr.bf16.mxu1 %v4567_v26  ;;  %947 = vmatprep.subr.bf16.mxu0 %v4752_v3 }
  0x3b   : > { %901 = vmatpush1.bf16.msra.mxu1 %v4565_v27  ;;  %948 = vmatpush1.bf16.msra.mxu0 %v4580_v31 }
  0x3c   : > { %902 = vmatprep.subr.bf16.mxu1 %v4571_v29  ;;  %949 = vmatprep.subr.bf16.mxu0 %v4752_v3 }
  0x3f   : > { %903 = vmatpush1.bf16.msra.mxu1 %v4569_v30  ;;  %950 = vmatpush1.bf16.msra.mxu0 %v4584_v34 }
  0x40   : > { %904 = vmatprep.subr.bf16.mxu1 %v4575_v32  ;;  %951 = vmatprep.subr.bf16.mxu0 %v4752_v3 }
  0x43   : > { %905 = vmatpush1.bf16.msra.mxu1 %v4573_v33  ;;  %952 = vmatpush1.bf16.msra.mxu0 %v4588_v41 }
  0x44   : > { %906 = vmatprep.subr.bf16.mxu1 %v4579_v35  ;;  %953 = vmatprep.subr.bf16.mxu0 %v4752_v3 }
  0x47   : > { %907 = vmatpush1.bf16.msra.mxu1 %v4577_v36  ;;  %954 = vmatpush1.bf16.msra.mxu0 %v4592_v44  ;;  %v4597_v44 = vld [vmem:[%s6381_s4] sm:$0xff]  }
  0x48   : > { %908 = vmatprep.subr.bf16.mxu1 %v4583_v37  ;;  %955 = vmatprep.subr.bf16.mxu0 %v4752_v3 }
  0x4b   : > { %909 = vmatpush1.bf16.msra.mxu1 %v4581_v38  ;;  %956 = vmatpush1.bf16.msra.mxu0 %v890_v50  ;;  %v4603_v50 = vld [vmem:[%s6390_s13 + $0x28] sm:$0x1f]  }
  0x4c   : > { %910 = vmatprep.subr.bf16.mxu1 %v4587_v39  ;;  %4265 = vmatprep.subr.bf16.mxu0 %v4755_v51 }
  0x4f   : > { %911 = vmatpush1.bf16.msra.mxu1 %v4585_v40  ;;  %v4596_v40 = vld [vmem:[%s4944_s24] sm:$0x1f]   ;;  %s4765_s24 = smov 80  }
  0x50   : > { %912 = vmatprep.subr.bf16.mxu1 %v4591_v42  ;;  %v1013_v42 = vld [vmem:[%s6383_s6] sm:$0xf] }
  0x53   : > { %913 = vmatpush1.bf16.msra.mxu1 %v4589_v43  ;;  %v1111_v43 = vand.u32 %v4596_v40, %v4934_v5 }
  0x54   : > { %3960 = vmatprep.subr.msk.bf16.mxu1 %vm882_vm3, %v3958_v46  ;;  %v4599_v46 = vld [vmem:[%s6390_s13 + $0x8] sm:$0xff]   ;;  %vm2031_vm3 = vcmask 482304  }
  0x57   : > { %915 = vmatpush1.bf16.msra.mxu1 %v884_v49  ;;  %v4602_v49 = vld [vmem:[%s6390_s13 + $0x20] sm:$0xff]  }
  0x58   : > { %1354 = vmatprep.subr.bf16.mxu1 %v4752_v3 }
  0x9c   : > { %v567_v52 = vpop.permute.xlu0 %566 }
  0x9d   : > { %v642_v62 = vpop.permute.xlu1 %641 }
  0xa1   : > { %v636_v58 = vpop.permute.xlu0 %635 }
  0xfd   : > { %v625_v53 = vpop.f32.mrb[0].mxu1 }
  0xfe   : > { %v626_v54 = vadd.f32 %v625_v53, %v567_v52  ;;  %v627_v55 = vpop.f32.mrb[1].mxu1 }
  0xff   : > { %v628_v56 = vadd.f32 %v627_v55, %v567_v52  ;;  %v629_v57 = vpop.f32.mrb[2].mxu1  ;;  %v1229_v52 = vsel %vm582_vm1, %v4603_v50, 0  ;;  %v5148_v55 = vld [vmem:[%s6388_s11 + $0x8] sm:$0xff]  ;;  %vm1066_vm1 = vcmask 285696  }
 0x100   : > { %v632_v59 = vmax.f32 %v626_v54, 0.0  ;;  %v630_v60 = vpop.f32.mrb[3].mxu1  ;;  %v5160_v57 = vld [vmem:[%s6388_s11 + $0x10] sm:$0xff] }
 0x101   : > { %v633_v61 = vmax.f32 %v628_v56, 0.0  ;;  %v5153_v56 = vld [vmem:[%s6388_s11] sm:$0xff] }
 0x102   : > { %v638_v63 = vmul.f32 %v636_v58, %v632_v59 }
 0x103   : > { %v639_v0 = vmul.f32 %v636_v58, %v633_v61 }
 0x104   : > { %v644_v1 = vadd.f32 %v642_v62, %v638_v63 }
 0x105   : > { %v645_v2 = vadd.f32 %v642_v62, %v639_v0 }
 0x106   : > { %v646_v7 = vpack.c.bf16 %v644_v1, %v644_v1 }
 0x107   : > { %v647_v6 = vpack.c.bf16 %v645_v2, %v645_v2 }
 0x109   : > { %3961 = vmatprep.mubr.msk.bf16.mxu1 %vm878_vm4, %v647_v6  ;;  %3962 = vmatprep.mubr.msk.bf16.mxu0 %vm878_vm4, %v647_v6  ;;  %vm2033_vm4 = vcmask 531456  }
 0x10a   : > { %925 = vmatmul.mubr.bf16.vlgmr.msra.gmra.mrb[4].mxu1 %v646_v7  ;;  %966 = vmatmul.mubr.bf16.vlgmr.msra.gmra.mrb[0].mxu0 %v646_v7 }
 0x10b   : > { %4275 = vmatprep.mubr.msk.bf16.mxu0 %vm4762_vm5, %v4755_v51 }
 0x1dd   : > { %v926_v9 = vpop.f32.mrb[4].mxu1  ;;  %v967_v10 = vpop.f32.mrb[0].mxu0 }
 0x1de   : > { %v969_v11 = vpop.f32.mrb[1].mxu0  ;;  %977 = vrot.lane.b32.xlu0 %v926_v9, %s4756_s26  ;;  %974 = vrot.lane.b32.xlu1 %v926_v9, %s4757_s23  ;;  %v928_v12 = vpop.f32.mrb[5].mxu1  ;;  %s6442_s26 = sshll.u32 %s4921_s20, 3  ;;  %s4769_s20 = smov 32  }
 0x1df   : > { %v930_v13 = vpop.f32.mrb[6].mxu1  ;;  %v970_v14 = vpop.f32.mrb[2].mxu0  ;;  %v4401_v15 = vpack.i.bf16 %v928_v12, %v926_v9  ;;  %v4406_v16 = vpack.i.bf16 %v967_v10, %v928_v12  ;;  %s4776_s23 = smov 35  }
 0x1e0   : > { %v931_v17 = vpop.f32.mrb[7].mxu1  ;;  %v971_v18 = vpop.f32.mrb[3].mxu0 }
 0x1e1   : > { %v4605_v18 = vld [vmem:[%s6382_s5] sm:$0xff]  }
 0x1e2   : > { %991 = vrot.lane.b32.xlu0 %v928_v12, %s4758_s21  ;;  %4402 = vrot.lane.b32.xlu1 %v4401_v15, %s4759_s27  ;;  %s558_s27 = scalar_lea.vmem %s6379_s2, %s6442_s26  ;;  %s4777_s21 = smov 47  }
 0x1e3   : > { %v4604_v53 = vld [vmem:[%s558_s27] sm:$0x1f]   ;;  %s4781_s27 = smov 77   ;;  %s4044_s26 = sshll.u32 %s4889_s25, 4 }
 0x1e4   : > { %v1478_v54 = vand.u32 %v4604_v53, %v4934_v5  ;;  %v5165_v5 = vld [vmem:[%s6388_s11 + $0x18] sm:$0xff]  ;;  %s4782_s25 = smov [#allocation2]  }
 0x1e6   : > { %994 = vrot.lane.b32.xlu0 %v928_v12, %s4760_s17  ;;  %988 = vrot.lane.b32.xlu1 %v928_v12, %s4761_s29  ;;  %s4766_s17 = smov 92  }
 0x1ea   : > { %4407 = vrot.lane.b32.xlu1 %v4406_v16, %s4763_s30  ;;  %1089 = vperm.xlu0 %4411, %v5082_v20   ;;  %s4767_s30 = smov 56  }
 0x1ee   : > { %1005 = vrot.lane.b32.xlu1 %v967_v10, %s4764_s28  ;;  %4414 = vset.pattern.permute.xlu0 %v4754_v8 }
 0x1ef   : > { %1161 = vperm.xlu0 %4414, %v5077_v19  }
 0x1f2   : > { %1094 = vperm.xlu1 %4412, %v5077_v19  }
 0x1f3   : > { %4416 = vset.pattern.permute.xlu0 %v4752_v3 }
 0x1f4   : > { %1438 = vperm.xlu0 %4416, %v5153_v56  }
 0x1f6   : > { %4413 = vset.pattern.permute.xlu1 %v4754_v8 }
 0x1f7   : > { %1157 = vperm.xlu1 %4413, %v5082_v20  }
 0x1f8   : > { %1453 = vperm.xlu0 %4416, %v5165_v5  }
 0x1fb   : > { %4415 = vset.pattern.permute.xlu1 %v4753_v4 }
 0x1fc   : > { %1167 = vperm.xlu1 %4415, %v5082_v20   ;;  %4419 = vset.pattern.permute.xlu0 %v4754_v8 }
 0x1fd   : > { %1538 = vperm.xlu0 %4419, %v5148_v55  }
 0x200   : > { %1171 = vperm.xlu1 %4415, %v5077_v19  }
 0x201   : > { %4420 = vset.pattern.permute.xlu0 %v4753_v4 }
 0x202   : > { %1554 = vperm.xlu0 %4420, %v5153_v56  }
 0x204   : > { %4417 = vset.pattern.permute.xlu1 %v4752_v3 }
 0x205   : > { %1443 = vperm.xlu1 %4417, %v5148_v55  }
 0x206   : > { %1566 = vperm.xlu0 %4420, %v5165_v5  }
 0x209   : > { %1448 = vperm.xlu1 %4417, %v5160_v57  }
 0x20d   : > { %4418 = vset.pattern.permute.xlu1 %v4754_v8 }
 0x20e   : > { %1534 = vperm.xlu1 %4418, %v5153_v56  }
 0x212   : > { %1542 = vperm.xlu1 %4418, %v5160_v57  }
 0x216   : > { %1546 = vperm.xlu1 %4418, %v5165_v5  }
 0x21a   : > { %4421 = vset.pattern.permute.xlu1 %v4753_v4 }
 0x21b   : > { %1558 = vperm.xlu1 %4421, %v5148_v55  }
 0x21f   : > { %1562 = vperm.xlu1 %4421, %v5160_v57  }
 0x250   : > { %v975_v21 = vpop.permute.xlu1 %974  ;;  %v978_v23 = vpop.permute.xlu0 %977 }
 0x251   : > { %v1008_v22 = vpack.c.bf16 %v975_v21, %v926_v9 }
 0x253   : > { %4266 = vmatpush3.bf16.msra.mxu0 %v1008_v22  ;;  %v4606_v22 = vld [vmem:[%s6382_s5 + $0x8] sm:$0xff]  }
 0x254   : > { %v4403_v24 = vpop.permute.xlu1 %4402  ;;  %4267 = vmatprep.subr.bf16.mxu0 %v4755_v51  ;;  %v992_v30 = vpop.permute.xlu0 %991 }
 0x255   : > { %v4405_v25 = vunpack.i.h.bf16 %v4403_v24  ;;  %v4404_v26 = vunpack.i.l.bf16 %v4403_v24  ;;  %v4608_v24 = vld [vmem:[%s6391_s14 + $0x8] sm:$0xff]  }
 0x257   : > { %v986_v27 = vsel %vm985_vm6, %v4404_v26, %v4405_v25  ;;  %v4609_v25 = vld [vmem:[%s6391_s14 + $0x10] sm:$0xff]   ;;  %v4610_v26 = vld [vmem:[%s6391_s14 + $0x18] sm:$0x3f]   ;;  %vm2037_vm6 = vcmask 629760  }
 0x258   : > { %v989_v28 = vpop.permute.xlu1 %988  ;;  %v1009_v29 = vpack.c.bf16 %v986_v27, %v978_v23  ;;  %v995_v35 = vpop.permute.xlu0 %994  ;;  %v4607_v23 = vld [vmem:[%s6391_s14] sm:$0xff]   ;;  %v1615_v27 = vsel %vm1613_vm10, %v4610_v26, 0 }
 0x259   : > { %v1010_v31 = vpack.c.bf16 %v992_v30, %v989_v28 }
 0x25a   : > { %4268 = vmatpush3.bf16.msra.mxu0 %v1009_v29 }
 0x25b   : > { %4269 = vmatprep.subr.bf16.mxu0 %v4755_v51 }
 0x25c   : > { %v4408_v32 = vpop.permute.xlu1 %4407 }
 0x25d   : > { %v4410_v33 = vunpack.i.h.bf16 %v4408_v32  ;;  %v4409_v34 = vunpack.i.l.bf16 %v4408_v32 }
 0x25e   : > { %4270 = vmatpush3.bf16.msra.mxu0 %v1010_v31 }
 0x25f   : > { %v1003_v36 = vsel %vm1002_vm7, %v4409_v34, %v4410_v33  ;;  %4271 = vmatprep.subr.bf16.mxu0 %v4755_v51  ;;  %vm2039_vm7 = vcmask 678912  }
 0x260   : > { %v1006_v37 = vpop.permute.xlu1 %1005  ;;  %v1011_v38 = vpack.c.bf16 %v1003_v36, %v995_v35 }
 0x261   : > { %v1012_v39 = vpack.c.bf16 %v1006_v37, %v1006_v37 }
 0x262   : > { %4272 = vmatpush3.bf16.msra.mxu0 %v1011_v38 }
 0x263   : > { %4273 = vmatprep.subr.bf16.mxu0 %v4755_v51  ;;  %v1023_v41 = vsel %vm581_vm0, %v1012_v39, 0 }
 0x266   : > { %4274 = vmatpush3.bf16.msra.mxu0 %v1023_v41 }
 0x267   : > { %4279 = vmatprep.subr.bf16.mxu0 %v4755_v51 }
 0x269   : > { %4276 = vmatmul.mubr.msk.bf16.vlgmr.msra.gmra.mrb[4].mxu0 %vm1018_vm8, %v1013_v42  ;;  %v1090_v63 = vpop.permute.xlu0 %1089  ;;  %vm2758_vm8 = vcmask 1041409  }
 0x26a   : > { %4280 = vmatpush3.bf16.msra.mxu0 %v1111_v43  ;;  %4281 = vmatprep.mubr.msk.bf16.mxu0 %vm4762_vm5, %v4755_v51 }
 0x26b   : > { %4285 = vmatprep.subr.bf16.mxu0 %v4755_v51 }
 0x26e   : > { %v1162_v11 = vpop.permute.xlu0 %1161 }
 0x271   : > { %4282 = vmatmul.mubr.msk.bf16.vlgmr.msra.gmra.mrb[8].mxu0 %vm577_vm2, %v4597_v44  ;;  %v1095_v8 = vpop.permute.xlu1 %1094 }
 0x272   : > { %4286 = vmatpush3.bf16.msra.mxu0 %v4598_v45  ;;  %4297 = vmatprep.mubr.msk.bf16.mxu0 %vm4762_vm5, %v4755_v51  ;;  %vm2035_vm5 = vcmask 580608  }
 0x273   : > { %4287 = vmatprep.subr.bf16.mxu0 %v4755_v51  ;;  %v1439_v31 = vpop.permute.xlu0 %1438 }
 0x276   : > { %4288 = vmatpush3.bf16.msra.mxu0 %v4599_v46  ;;  %v1158_v62 = vpop.permute.xlu1 %1157 }
 0x277   : > { %4289 = vmatprep.subr.bf16.mxu0 %v4755_v51  ;;  %v1454_v34 = vpop.permute.xlu0 %1453 }
 0x27a   : > { %4290 = vmatpush3.bf16.msra.mxu0 %v4600_v47 }
 0x27b   : > { %4291 = vmatprep.subr.bf16.mxu0 %v4755_v51  ;;  %v1168_v6 = vpop.permute.xlu1 %1167 }
 0x27c   : > { %v1539_v41 = vpop.permute.xlu0 %1538 }
 0x27e   : > { %4292 = vmatpush3.bf16.msra.mxu0 %v4601_v48 }
 0x27f   : > { %4293 = vmatprep.subr.bf16.mxu0 %v4755_v51  ;;  %v1172_v15 = vpop.permute.xlu1 %1171 }
 0x281   : > { %v1555_v48 = vpop.permute.xlu0 %1554 }
 0x282   : > { %4294 = vmatpush3.bf16.msra.mxu0 %v4602_v49 }
 0x283   : > { %4295 = vmatprep.subr.bf16.mxu0 %v4755_v51 }
 0x284   : > { %v1444_v28 = vpop.permute.xlu1 %1443 }
 0x286   : > { %4296 = vmatpush3.bf16.msra.mxu0 %v1229_v52 }
 0x287   : > { %4301 = vmatprep.subr.bf16.mxu0 %v1478_v54 }
 0x288   : > { %v1449_v29 = vpop.permute.xlu1 %1448 }
 0x28d   : > { %v1535_v30 = vpop.permute.xlu1 %1534 }
 0x291   : > { %v1543_v32 = vpop.permute.xlu1 %1542 }
 0x295   : > { %v1547_v40 = vpop.permute.xlu1 %1546 }
 0x29a   : > { %v1559_v43 = vpop.permute.xlu1 %1558 }
 0x33c   : > { %v5181_v58 = vpop.f32.mrb[4].mxu0 }
 0x33d   : > { %v4277_v59 = vpop.f32.mrb[5].mxu0 }
 0x33e   : > { %v1062_v60 = vpop.f32.mrb[6].mxu0 }
 0x33f   : > { %v4278_v61 = vpop.f32.mrb[7].mxu0 }
 0x344   : > { %v1147_v0 = vpop.f32.mrb[8].mxu0 }
 0x345   : > { %v1148_v1 = vadd.f32 %v1147_v0, %v1090_v63  ;;  %v4283_v2 = vpop.f32.mrb[9].mxu0 }
 0x346   : > { %v1150_v7 = vpop.f32.mrb[10].mxu0 }
 0x347   : > { %v1154_v9 = vmax.f32 %v1148_v1, 0.0  ;;  %v1151_v10 = vadd.f32 %v1150_v7, %v1095_v8  ;;  %v4284_v4 = vpop.f32.mrb[11].mxu0  ;;  %v1567_v1 = vpop.permute.xlu0 %1566 }
 0x349   : > { %v1164_v12 = vmul.f32 %v1158_v62, %v1154_v9  ;;  %v1155_v13 = vmax.f32 %v1151_v10, 0.0  ;;  %v1563_v62 = vpop.permute.xlu1 %1562 }
 0x34b   : > { %v1165_v14 = vmul.f32 %v1162_v11, %v1155_v13  ;;  %v1174_v16 = vadd.f32 %v1168_v6, %v1164_v12  ;;  %v4611_v11 = vld [vmem:[%s6384_s7 + $0x4] ss:$8 sps:$4 sm:$0xff]  }
 0x34c   : > { %3976 = vmatprep.mubr.msk.bf16.mxu1 %vm1350_vm12, %v4611_v11  ;;  %vm2770_vm12 = vcmask 1045509  }
 0x34d   : > { %v1175_v17 = vadd.f32 %v1172_v15, %v1165_v14 }
 0x34f   : > { %v1176_v21 = vpack.c.bf16 %v1175_v17, %v1174_v16 }
 0x351   : > { %4298 = vmatmul.mubr.msk.bf16.vlgmr.msra.gmra.mrb[12].mxu0 %vm1224_vm9, %v1176_v21  ;;  %vm2761_vm9 = vcmask 1042434  }
 0x352   : > { %4302 = vmatpush3.bf16.msra.mxu0 %v1478_v54  ;;  %4303 = vmatprep.mubr.msk.bf16.mxu0 %vm577_vm2, %v4605_v18 }
 0x353   : > { %4307 = vmatprep.subr.bf16.mxu0 %v4607_v23 }
 0x359   : > { %4304 = vmatmul.mubr.msk.bf16.vlgmr.msra.gmra.mrb[16].mxu0 %vm577_vm2, %v4606_v22  ;;  %vm2029_vm2 = vcmask 384000  }
 0x35a   : > { %4308 = vmatpush3.bf16.msra.mxu0 %v4607_v23 }
 0x35b   : > { %4309 = vmatprep.subr.bf16.mxu0 %v4608_v24 }
 0x35e   : > { %4310 = vmatpush3.bf16.msra.mxu0 %v4608_v24 }
 0x35f   : > { %4311 = vmatprep.subr.bf16.mxu0 %v4609_v25 }
 0x362   : > { %4312 = vmatpush3.bf16.msra.mxu0 %v4609_v25 }
 0x363   : > { %4327 = vmatprep.subr.msk.bf16.mxu0 %vm1613_vm10, %v4610_v26  ;;  %vm2764_vm10 = vcmask 1043459  }
 0x366   : > { %4314 = vmatpush3.bf16.msra.mxu0 %v1615_v27 }
 0x424   : > { %v1265_v33 = vpop.f32.mrb[12].mxu0 }
 0x425   : > { %v4299_v35 = vpop.f32.mrb[13].mxu0 }
 0x426   : > { %v1268_v36 = vpop.f32.mrb[14].mxu0 }
 0x427   : > { %v4300_v37 = vpop.f32.mrb[15].mxu0  ;;  %v4427_v38 = vpack.i.bf16 %v1268_v36, %v1265_v33  ;;  %v1322_v39 = vpack.c.bf16 %v1268_v36, %v1265_v33 }
 0x429   : > { %4428 = vrot.lane.b32.xlu0 %v4427_v38, %s4764_s28  ;;  %4423 = vrot.lane.b32.xlu1 %v4427_v38, %s4761_s29 }
 0x42a   : > { %1355 = vmatpush1.bf16.msra.mxu1 %v1322_v39 }
 0x42b   : > { %1356 = vmatprep.subr.bf16.mxu1 %v4752_v3 }
 0x42c   : > { %v4305_v42 = vpop.f32.mrb[16].mxu0 }
 0x42d   : > { %v1523_v44 = vadd.f32 %v4305_v42, %v1449_v29  ;;  %4438 = vrot.lane.b32.xlu0 %v4427_v38, %s4765_s24  ;;  %4433 = vrot.lane.b32.xlu1 %v4427_v38, %s4766_s17  ;;  %v1514_v45 = vpop.f32.mrb[17].mxu0 }
 0x42e   : > { %v1515_v46 = vadd.f32 %v1514_v45, %v1439_v31  ;;  %v4306_v47 = vpop.f32.mrb[18].mxu0 }
 0x42f   : > { %v1531_v49 = vmax.f32 %v1523_v44, 0.0  ;;  %v1526_v50 = vadd.f32 %v4306_v47, %v1454_v34  ;;  %v1517_v52 = vpop.f32.mrb[19].mxu0  ;;  %v4613_v47 = vld [vmem:[%s6384_s7] ss:$8 sps:$4 sm:$0xff]  }
 0x430   : > { %v1529_v53 = vmax.f32 %v1515_v46, 0.0  ;;  %v1518_v54 = vadd.f32 %v1517_v52, %v1444_v28 }
 0x431   : > { %v1551_v8 = vmul.f32 %v1543_v32, %v1531_v49  ;;  %v1532_v59 = vmax.f32 %v1526_v50, 0.0  ;;  %4448 = vrot.lane.b32.xlu0 %v4427_v38, %s4767_s30  ;;  %4443 = vrot.lane.b32.xlu1 %v4427_v38, %s4768_s18  ;;  %s4772_s30 = smov 122   ;;  %s4773_s18 = smov 98  }
 0x432   : > { %v1549_v60 = vmul.f32 %v1535_v30, %v1529_v53  ;;  %v1530_v61 = vmax.f32 %v1518_v54, 0.0 }
 0x433   : > { %v1552_v63 = vmul.f32 %v1547_v40, %v1532_v59  ;;  %v1571_v2 = vadd.f32 %v1563_v62, %v1551_v8  ;;  %v4686_v62 = vld [vmem:[%s6386_s9] sm:$0xff] }
 0x434   : > { %v1550_v0 = vmul.f32 %v1539_v41, %v1530_v61  ;;  %v1569_v7 = vadd.f32 %v1555_v48, %v1549_v60  ;;  %v4616_v60 = vld [vmem:[%s6385_s8 + $0x4] ss:$12 sps:$4 sm:$0xff]   ;;  %v4617_v61 = vld [vmem:[%s6385_s8 + $0x8] ss:$12 sps:$4 sm:$0xff]  }
 0x435   : > { %v1572_v6 = vadd.f32 %v1567_v1, %v1552_v63  ;;  %4458 = vrot.lane.b32.xlu0 %v4427_v38, %s4769_s20  ;;  %4453 = vrot.lane.b32.xlu1 %v4427_v38, %s4770_s19  ;;  %v4771_v38 = vmov 3   ;;  %s4774_s20 = smov 110   ;;  %s542_s19 = sand.u32 1, %s4741_s22  }
 0x436   : > { %v1570_v9 = vadd.f32 %v1559_v43, %v1550_v0  ;;  %4543 = vset.pattern.permute.xlu0 %v4771_v38  ;;  %4542 = vset.pattern.permute.xlu1 %v4771_v38 }
 0x437   : > { %v1574_v10 = vpack.c.bf16 %v1572_v6, %v1571_v2 }
 0x438   : > { %v1573_v4 = vpack.c.bf16 %v1570_v9, %v1569_v7 }
 0x43a   : > { %4315 = vmatprep.mubr.msk.bf16.mxu0 %vm1606_vm11, %v1573_v4 }
 0x43b   : > { %4316 = vmatmul.mubr.msk.bf16.vlgmr.msra.gmra.mrb[20].mxu0 %vm1606_vm11, %v1574_v10  ;;  %vm2767_vm11 = vcmask 1044484  }
 0x43c   : > { %4323 = vmatprep.mubr.msk.bf16.mxu0 %vm1838_vm13, %v4617_v61 }
 0x49b   : > { %v4429_v12 = vpop.permute.xlu0 %4428  ;;  %v4424_v13 = vpop.permute.xlu1 %4423 }
 0x49c   : > { %v4426_v14 = vunpack.i.h.bf16 %v4424_v13  ;;  %v4425_v15 = vunpack.i.l.bf16 %v4424_v13  ;;  %v4431_v16 = vunpack.i.h.bf16 %v4429_v12  ;;  %v4430_v17 = vunpack.i.l.bf16 %v4429_v12 }
 0x49e   : > { %v1323_v18 = vpack.c.bf16 %v4426_v14, %v4425_v15  ;;  %v1324_v22 = vpack.c.bf16 %v4431_v16, %v4430_v17 }
 0x49f   : > { %v4434_v21 = vpop.permute.xlu1 %4433  ;;  %v4439_v25 = vpop.permute.xlu0 %4438 }
 0x4a0   : > { %1357 = vmatpush1.bf16.msra.mxu1 %v1323_v18  ;;  %v4436_v23 = vunpack.i.h.bf16 %v4434_v21  ;;  %v4435_v24 = vunpack.i.l.bf16 %v4434_v21  ;;  %v4441_v26 = vunpack.i.h.bf16 %v4439_v25  ;;  %v4440_v27 = vunpack.i.l.bf16 %v4439_v25 }
 0x4a1   : > { %1358 = vmatprep.subr.bf16.mxu1 %v4752_v3 }
 0x4a2   : > { %v1325_v28 = vpack.c.bf16 %v4436_v23, %v4435_v24  ;;  %v1326_v30 = vpack.c.bf16 %v4441_v26, %v4440_v27 }
 0x4a3   : > { %v4444_v29 = vpop.permute.xlu1 %4443  ;;  %v4449_v33 = vpop.permute.xlu0 %4448 }
 0x4a4   : > { %1359 = vmatpush1.bf16.msra.mxu1 %v1324_v22  ;;  %v4446_v31 = vunpack.i.h.bf16 %v4444_v29  ;;  %v4445_v32 = vunpack.i.l.bf16 %v4444_v29  ;;  %v4451_v34 = vunpack.i.h.bf16 %v4449_v33  ;;  %v4450_v35 = vunpack.i.l.bf16 %v4449_v33 }
 0x4a5   : > { %1360 = vmatprep.subr.bf16.mxu1 %v4752_v3 }
 0x4a6   : > { %v1327_v36 = vpack.c.bf16 %v4446_v31, %v4445_v32  ;;  %v1328_v39 = vpack.c.bf16 %v4451_v34, %v4450_v35 }
 0x4a7   : > { %v4454_v37 = vpop.permute.xlu1 %4453  ;;  %v4459_v42 = vpop.permute.xlu0 %4458 }
 0x4a8   : > { %1361 = vmatpush1.bf16.msra.mxu1 %v1325_v28  ;;  %v4456_v40 = vunpack.i.h.bf16 %v4454_v37  ;;  %v4455_v41 = vunpack.i.l.bf16 %v4454_v37  ;;  %v4461_v43 = vunpack.i.h.bf16 %v4459_v42  ;;  %v4460_v44 = vunpack.i.l.bf16 %v4459_v42 }
 0x4a9   : > { %1362 = vmatprep.subr.bf16.mxu1 %v4752_v3 }
 0x4aa   : > { %v1329_v45 = vpack.c.bf16 %v4456_v40, %v4455_v41  ;;  %v1330_v46 = vpack.c.bf16 %v4461_v43, %v4460_v44 }
 0x4ac   : > { %1363 = vmatpush1.bf16.msra.mxu1 %v1326_v30 }
 0x4ad   : > { %1364 = vmatprep.subr.bf16.mxu1 %v4752_v3 }
 0x4b0   : > { %1365 = vmatpush1.bf16.msra.mxu1 %v1327_v36 }
 0x4b1   : > { %1366 = vmatprep.subr.bf16.mxu1 %v4752_v3 }
 0x4b4   : > { %1367 = vmatpush1.bf16.msra.mxu1 %v1328_v39 }
 0x4b5   : > { %1368 = vmatprep.subr.bf16.mxu1 %v4752_v3 }
 0x4b8   : > { %1369 = vmatpush1.bf16.msra.mxu1 %v1329_v45 }
 0x4b9   : > { %1370 = vmatprep.subr.bf16.mxu1 %v4752_v3 }
 0x4bc   : > { %1371 = vmatpush1.bf16.msra.mxu1 %v1330_v46 }
 0x4bf   : > { %1387 = vmatmul.mubr.bf16.vlgmr.msra.gmra.mrb[8].mxu1 %v4613_v47 }
 0x4c0   : > { %1877 = vmatprep.mubr.bf16.mxu1 %v4616_v60 }
 0x50e   : > { %v5221_v48 = vpop.f32.mrb[20].mxu0 }
 0x50f   : > { %v1651_v49 = vpop.f32.mrb[21].mxu0 }
 0x510   : > { %v5223_v50 = vpop.f32.mrb[22].mxu0 }
 0x511   : > { %v1654_v52 = vpop.f32.mrb[23].mxu0  ;;  %v4467_v53 = vpack.i.bf16 %v5223_v50, %v5221_v48  ;;  %v1767_v59 = vpack.c.bf16 %v5223_v50, %v5221_v48 }
 0x512   : > { %v4462_v54 = vpack.i.bf16 %v1654_v52, %v1651_v49  ;;  %v1766_v8 = vpack.c.bf16 %v1654_v52, %v1651_v49 }
 0x513   : > { %4468 = vrot.lane.b32.xlu0 %v4467_v53, %s4764_s28 }
 0x514   : > { %4463 = vrot.lane.b32.xlu1 %v4462_v54, %s4764_s28  ;;  %s4775_s28 = smov 86  }
 0x517   : > { %4483 = vrot.lane.b32.xlu0 %v4462_v54, %s4772_s30 }
 0x518   : > { %4473 = vrot.lane.b32.xlu1 %v4462_v54, %s4773_s18 }
 0x51b   : > { %4488 = vrot.lane.b32.xlu0 %v4467_v53, %s4772_s30 }
 0x51c   : > { %4478 = vrot.lane.b32.xlu1 %v4467_v53, %s4773_s18  ;;  %s4691_s18 = sshll.u32 %s4782_s25, 4  ;;  %s4692_s18 = int_to_ptr.vmem [resolvable:$false] %s4691_s18 }
 0x51f   : > { %4503 = vrot.lane.b32.xlu0 %v4462_v54, %s4761_s29 }
 0x520   : > { %4493 = vrot.lane.b32.xlu1 %v4462_v54, %s4766_s17 }
 0x523   : > { %4508 = vrot.lane.b32.xlu0 %v4467_v53, %s4761_s29  ;;  %s4778_s29 = smov 59  }
 0x524   : > { %4498 = vrot.lane.b32.xlu1 %v4467_v53, %s4766_s17  ;;  %s4779_s17 = smov 65  }
 0x527   : > { %4523 = vrot.lane.b32.xlu0 %v4462_v54, %s4774_s20 }
 0x528   : > { %4513 = vrot.lane.b32.xlu1 %v4462_v54, %s4775_s28 }
 0x52b   : > { %4528 = vrot.lane.b32.xlu0 %v4467_v53, %s4774_s20  ;;  %s4693_s20 = scalar_lea.vmem %s4692_s18, 32 }
 0x52c   : > { %4518 = vrot.lane.b32.xlu1 %v4467_v53, %s4775_s28 }
 0x52f   : > { %4538 = vrot.lane.b32.xlu0 %v4467_v53, %s4765_s24 }
 0x530   : > { %4533 = vrot.lane.b32.xlu1 %v4462_v54, %s4765_s24  ;;  %s4780_s24 = smov 71  }
 0x533   : > { %1793 = vperm.xlu0 %4543, %v5153_v56  }
 0x534   : > { %1334 = vperm.xlu1 %4542, %v5082_v20  }
 0x537   : > { %1801 = vperm.xlu0 %4543, %v5160_v57  }
 0x538   : > { %1338 = vperm.xlu1 %4542, %v5077_v19  }
 0x53b   : > { %1015 = vperm.xlu0 %4543, %v4686_v62  }
 0x53c   : > { %1797 = vperm.xlu1 %4542, %v5148_v55  }
 0x53f   : > { %4545 = vset.pattern.permute.xlu0 %v4752_v3 }
 0x540   : > { %1805 = vperm.xlu1 %4542, %v5165_v5  }
 0x544   : > { %4544 = vset.pattern.permute.xlu1 %v4752_v3 }
 0x585   : > { %v4469_v56 = vpop.permute.xlu0 %4468 }
 0x586   : > { %v4464_v63 = vpop.permute.xlu1 %4463  ;;  %v4471_v20 = vunpack.i.h.bf16 %v4469_v56  ;;  %v4470_v0 = vunpack.i.l.bf16 %v4469_v56 }
 0x587   : > { %v4466_v57 = vunpack.i.h.bf16 %v4464_v63  ;;  %v4465_v1 = vunpack.i.l.bf16 %v4464_v63 }
 0x588   : > { %v1775_v7 = vpack.c.bf16 %v4471_v20, %v4470_v0 }
 0x589   : > { %v1774_v19 = vpack.c.bf16 %v4466_v57, %v4465_v1  ;;  %v4484_v2 = vpop.permute.xlu0 %4483 }
 0x58a   : > { %v4474_v6 = vpop.permute.xlu1 %4473  ;;  %v4486_v4 = vunpack.i.h.bf16 %v4484_v2  ;;  %v4485_v5 = vunpack.i.l.bf16 %v4484_v2  ;;  %v4619_v2 = vld [vmem:[%s6385_s8 + $0x1c] ss:$12 sps:$4 sm:$0xff]  }
 0x58b   : > { %v4476_v9 = vunpack.i.h.bf16 %v4474_v6  ;;  %v4475_v10 = vunpack.i.l.bf16 %v4474_v6  ;;  %4233 = vmatprep.subr.bf16.mxu1 %v1774_v19  ;;  %v4614_v19 = vld [vmem:[%s6385_s8] ss:$12 sps:$4 sm:$0xff]  }
 0x58c   : > { %4234 = vmatpush3.bf16.msra.mxu1 %v1766_v8  ;;  %v1768_v15 = vpack.c.bf16 %v4486_v4, %v4485_v5  ;;  %v4618_v6 = vld [vmem:[%s6385_s8 + $0x20] ss:$12 sps:$4 sm:$0xff]  }
 0x58d   : > { %v4489_v55 = vpop.permute.xlu0 %4488  ;;  %4235 = vmatprep.subr.bf16.mxu1 %v1775_v7  ;;  %v1776_v3 = vpack.c.bf16 %v4476_v9, %v4475_v10  ;;  %v4621_v7 = vld [vmem:[%s6385_s8 + $0x18] ss:$12 sps:$4 sm:$0xff]  }
 0x58e   : > { %v4479_v11 = vpop.permute.xlu1 %4478  ;;  %v4491_v16 = vunpack.i.h.bf16 %v4489_v55  ;;  %v4490_v17 = vunpack.i.l.bf16 %v4489_v55 }
 0x58f   : > { %v4481_v12 = vunpack.i.h.bf16 %v4479_v11  ;;  %v4480_v13 = vunpack.i.l.bf16 %v4479_v11 }
 0x590   : > { %4236 = vmatpush3.bf16.msra.mxu1 %v1767_v59  ;;  %v1769_v29 = vpack.c.bf16 %v4491_v16, %v4490_v17 }
 0x591   : > { %v4504_v14 = vpop.permute.xlu0 %4503  ;;  %4237 = vmatprep.subr.bf16.mxu1 %v1776_v3  ;;  %v1777_v22 = vpack.c.bf16 %v4481_v12, %v4480_v13 }
 0x592   : > { %v4494_v18 = vpop.permute.xlu1 %4493  ;;  %v5255_v21 = vpop.f32.mrb[8].mxu1  ;;  %v4506_v30 = vunpack.i.h.bf16 %v4504_v14  ;;  %v4505_v31 = vunpack.i.l.bf16 %v4504_v14 }
 0x593   : > { %v4496_v23 = vunpack.i.h.bf16 %v4494_v18  ;;  %v4495_v24 = vunpack.i.l.bf16 %v4494_v18  ;;  %v1390_v25 = vpop.f32.mrb[9].mxu1 }
 0x594   : > { %4238 = vmatpush3.bf16.msra.mxu1 %v1768_v15  ;;  %v5257_v26 = vpop.f32.mrb[10].mxu1  ;;  %v1770_v37 = vpack.c.bf16 %v4506_v30, %v4505_v31 }
 0x595   : > { %v4509_v27 = vpop.permute.xlu0 %4508  ;;  %4239 = vmatprep.subr.bf16.mxu1 %v1777_v22  ;;  %v1393_v28 = vpop.f32.mrb[11].mxu1  ;;  %v1778_v33 = vpack.c.bf16 %v4496_v23, %v4495_v24 }
 0x596   : > { %v4499_v32 = vpop.permute.xlu1 %4498  ;;  %v4511_v38 = vunpack.i.h.bf16 %v4509_v27  ;;  %v4510_v39 = vunpack.i.l.bf16 %v4509_v27 }
 0x597   : > { %v4501_v34 = vunpack.i.h.bf16 %v4499_v32  ;;  %v4500_v35 = vunpack.i.l.bf16 %v4499_v32 }
 0x598   : > { %4240 = vmatpush3.bf16.msra.mxu1 %v1769_v29  ;;  %v1771_v45 = vpack.c.bf16 %v4511_v38, %v4510_v39 }
 0x599   : > { %v4524_v36 = vpop.permute.xlu0 %4523  ;;  %4241 = vmatprep.subr.bf16.mxu1 %v1778_v33  ;;  %v1779_v41 = vpack.c.bf16 %v4501_v34, %v4500_v35 }
 0x59a   : > { %v4514_v40 = vpop.permute.xlu1 %4513  ;;  %v4526_v46 = vunpack.i.h.bf16 %v4524_v36  ;;  %v4525_v47 = vunpack.i.l.bf16 %v4524_v36 }
 0x59b   : > { %v4516_v42 = vunpack.i.h.bf16 %v4514_v40  ;;  %v4515_v43 = vunpack.i.l.bf16 %v4514_v40 }
 0x59c   : > { %4242 = vmatpush3.bf16.msra.mxu1 %v1770_v37  ;;  %v1772_v54 = vpack.c.bf16 %v4526_v46, %v4525_v47 }
 0x59d   : > { %v4529_v44 = vpop.permute.xlu0 %4528  ;;  %4243 = vmatprep.subr.bf16.mxu1 %v1779_v41  ;;  %v1780_v49 = vpack.c.bf16 %v4516_v42, %v4515_v43 }
 0x59e   : > { %v4519_v48 = vpop.permute.xlu1 %4518  ;;  %v4531_v8 = vunpack.i.h.bf16 %v4529_v44  ;;  %v4530_v59 = vunpack.i.l.bf16 %v4529_v44 }
 0x59f   : > { %v4521_v50 = vunpack.i.h.bf16 %v4519_v48  ;;  %v4520_v52 = vunpack.i.l.bf16 %v4519_v48 }
 0x5a0   : > { %4244 = vmatpush3.bf16.msra.mxu1 %v1771_v45  ;;  %v1773_v57 = vpack.c.bf16 %v4531_v8, %v4530_v59 }
 0x5a1   : > { %v4539_v53 = vpop.permute.xlu0 %4538  ;;  %4245 = vmatprep.subr.bf16.mxu1 %v1780_v49  ;;  %v1781_v60 = vpack.c.bf16 %v4521_v50, %v4520_v52 }
 0x5a2   : > { %v4534_v61 = vpop.permute.xlu1 %4533  ;;  %v4541_v62 = vunpack.i.h.bf16 %v4539_v53  ;;  %v4540_v56 = vunpack.i.l.bf16 %v4539_v53 }
 0x5a3   : > { %v4536_v63 = vunpack.i.h.bf16 %v4534_v61  ;;  %v4535_v20 = vunpack.i.l.bf16 %v4534_v61 }
 0x5a4   : > { %4246 = vmatpush3.bf16.msra.mxu1 %v1772_v54  ;;  %v1783_v1 = vpack.c.bf16 %v4541_v62, %v4540_v56 }
 0x5a5   : > { %v1782_v0 = vpack.c.bf16 %v4536_v63, %v4535_v20  ;;  %4247 = vmatprep.subr.bf16.mxu1 %v1781_v60 }
 0x5a7   : > { %4319 = vmatprep.subr.bf16.mxu0 %v1782_v0 }
 0x5a8   : > { %4248 = vmatpush3.bf16.msra.mxu1 %v1773_v57  ;;  %4320 = vmatpush3.bf16.msra.mxu0 %v1782_v0 }
 0x5a9   : > { %4321 = vmatprep.subr.bf16.mxu0 %v1783_v1 }
 0x5ab   : > { %1878 = vmatmul.mubr.bf16.vlgmr.msra.gmra.mrb[12].mxu1 %v4614_v19 }
 0x5ac   : > { %4322 = vmatpush3.bf16.msra.mxu0 %v1783_v1  ;;  %1885 = vmatprep.mubr.bf16.mxu1 %v4619_v2 }
 0x5af   : > { %4324 = vmatmul.mubr.msk.bf16.vlgmr.msra.gmra.mrb[24].mxu0 %vm1838_vm13, %v4618_v6  ;;  %vm2773_vm13 = vcmask 1046534  }
 0x5b2   : > { %v1794_v45 = vpop.permute.xlu0 %1793 }
 0x5b3   : > { %v1335_v9 = vpop.permute.xlu1 %1334  ;;  %1886 = vmatmul.mubr.bf16.gmra.mrb[16].mxu1 %v4621_v7 }
 0x5b4   : > { %v1389_v10 = vadd.f32 %v5255_v21, %v1335_v9 }
 0x5b6   : > { %v1395_v55 = vmul.f32 %v1389_v10, %v1389_v10  ;;  %v1802_v1 = vpop.permute.xlu0 %1801 }
 0x5b7   : > { %v1339_v4 = vpop.permute.xlu1 %1338 }
 0x5b8   : > { %v1397_v5 = vsel %vm1396_vm14, %v1395_v55, 0.0  ;;  %v1392_v11 = vadd.f32 %v5257_v26, %v1339_v4 }
 0x5b9   : > { %v1398_v3 = vrot.slane %v1397_v5, 4 }
 0x5ba   : > { %v1411_v12 = vmul.f32 %v1392_v11, %v1392_v11 }
 0x5bb   : > { %v1399_v13 = vadd.f32 %v1398_v3, %v1397_v5  ;;  %v1798_v50 = vpop.permute.xlu1 %1797 }
 0x5bc   : > { %v1412_v14 = vsel %vm1396_vm14, %v1411_v12, 0.0  ;;  %vm2776_vm14 = vcmask 1047559  }
 0x5bd   : > { %v1400_v15 = vrot.slane %v1399_v13, 2  ;;  %v1413_v16 = vrot.slane %v1412_v14, 4 }
 0x5bf   : > { %v1401_v17 = vadd.f32 %v1400_v15, %v1399_v13  ;;  %v1414_v18 = vadd.f32 %v1413_v16, %v1412_v14 }
 0x5c1   : > { %v1402_v22 = vrot.slane %v1401_v17, 1  ;;  %v1415_v23 = vrot.slane %v1414_v18, 2 }
 0x5c3   : > { %v1403_v24 = vadd.f32 %v1402_v22, %v1401_v17  ;;  %v1416_v25 = vadd.f32 %v1415_v23, %v1414_v18 }
 0x5c5   : > { %v1404_v27 = vadd.f32 1e-16, %v1403_v24  ;;  %v1407_v21 = vadd.f32 1.0, %v1403_v24  ;;  %v1417_v28 = vrot.slane %v1416_v25, 1 }
 0x5c7   : > { %4622 = vrsqrt.f32 %v1404_v27  ;;  %v1418_v29 = vadd.f32 %v1417_v28, %v1416_v25 }
 0x5c8   : > { %4624 = vrcp.f32 %v1407_v21 }
 0x5c9   : > { %v1419_v30 = vadd.f32 1e-16, %v1418_v29  ;;  %v1422_v26 = vadd.f32 1.0, %v1418_v29 }
 0x5cb   : > { %4626 = vrsqrt.f32 %v1419_v30 }
 0x5cc   : > { %4628 = vrcp.f32 %v1422_v26 }
 0x5d1   : > { %v4623_v31 = vpop.eup %4622 }
 0x5d2   : > { %v4625_v32 = vpop.eup %4624  ;;  %v1406_v33 = vmul.f32 %v4623_v31, %v1403_v24 }
 0x5d4   : > { %v1409_v34 = vmul.f32 %v4625_v32, %v1406_v33 }
 0x5d5   : > { %v4627_v35 = vpop.eup %4626 }
 0x5d6   : > { %v4629_v36 = vpop.eup %4628  ;;  %v1410_v37 = vmul.f32 %v1409_v34, %v1389_v10  ;;  %v1421_v38 = vmul.f32 %v4627_v35, %v1418_v29  ;;  %v1806_v10 = vpop.permute.xlu1 %1805 }
 0x5d8   : > { %v1424_v39 = vmul.f32 %v4629_v36, %v1421_v38  ;;  %2005 = vrot.lane.b32.xlu1 %v1410_v37, %s4776_s23  ;;  %s543_s23 = scalar_lea.vmem [#allocation2], %s542_s19 }
 0x5da   : > { %v1425_v40 = vmul.f32 %v1424_v39, %v1392_v11 }
 0x5dc   : > { %2009 = vrot.lane.b32.xlu0 %v1425_v40, %s4777_s21  ;;  %s3832_s21 = sshll.u32 %s543_s23, 4  ;;  %s6337_s21 = int_to_ptr.vmem [resolvable:$true] %s3832_s21 }
 0x5dd   : > { %s4687_s30 = scalar_lea.vmem %s6337_s21, 16  ;;  %p4694_p0 = scmp.lt.s32.totalorder %s6337_s21, %s4692_s18 }
 0x5de   : > { %p4688_p11 = scmp.ne.s32.totalorder %s6337_s21, %s4687_s30  ;;  %p4695_p1 = scmp.lt.s32.totalorder %s4693_s20, %s4687_s30 }
 0x5e0   : > { %p4689_p12 = pnand %p4688_p11, %p4906_p5  ;;  %p4696_p2 = por %p4695_p1, %p4694_p0 }
 0x5e2   : > { %p4690_p13 = pneg %p4689_p12 }
 0x5e4   : > { %p4697_p3 = pnand %p4696_p2, %p4690_p13 }
 0x67e   : > { %v4249_v41 = vpop.f32.mrb[12].mxu1 }
 0x67f   : > { %v4250_v42 = vpop.f32.mrb[13].mxu1 }
 0x680   : > { %v4251_v43 = vadd.f32 %v4250_v42, %v4249_v41  ;;  %v4252_v44 = vpop.f32.mrb[14].mxu1 }
 0x681   : > { %v4253_v46 = vpop.f32.mrb[15].mxu1 }
 0x682   : > { %v4254_v47 = vadd.f32 %v4253_v46, %v4252_v44  ;;  %v4325_v48 = vpop.f32.mrb[24].mxu0  ;;  %v1880_v49 = vadd.f32 %v4251_v43, %v1794_v45 }
 0x683   : > { %v1928_v52 = vpop.f32.mrb[25].mxu0 }
 0x684   : > { %v5274_v53 = vadd.f32 %v1928_v52, %v1880_v49  ;;  %v4326_v54 = vpop.f32.mrb[26].mxu0  ;;  %v1883_v8 = vadd.f32 %v4254_v47, %v1798_v50 }
 0x685   : > { %v1931_v59 = vpop.f32.mrb[27].mxu0 }
 0x686   : > { %v1943_v60 = vmul.f32 %v5274_v53, %v5274_v53  ;;  %v5278_v61 = vadd.f32 %v1931_v59, %v1883_v8  ;;  %v4255_v62 = vpop.f32.mrb[16].mxu1 }
 0x687   : > { %v4256_v56 = vpop.f32.mrb[17].mxu1 }
 0x688   : > { %v1945_v63 = vsel %vm1944_vm15, %v1943_v60, 0.0  ;;  %v1959_v20 = vmul.f32 %v5278_v61, %v5278_v61  ;;  %v4257_v0 = vadd.f32 %v4256_v56, %v4255_v62  ;;  %v4258_v57 = vpop.f32.mrb[18].mxu1 }
 0x689   : > { %v1946_v19 = vrot.slane %v1945_v63, 4  ;;  %v4259_v2 = vpop.f32.mrb[19].mxu1 }
 0x68a   : > { %v1960_v6 = vsel %vm1944_vm15, %v1959_v20, 0.0  ;;  %v1888_v7 = vadd.f32 %v4257_v0, %v1802_v1  ;;  %v4260_v9 = vadd.f32 %v4259_v2, %v4258_v57 }
 0x68b   : > { %v1947_v55 = vadd.f32 %v1946_v19, %v1945_v63  ;;  %v1961_v4 = vrot.slane %v1960_v6, 4 }
 0x68c   : > { %v5284_v5 = vadd.f32 %v4325_v48, %v1888_v7  ;;  %v1891_v11 = vadd.f32 %v4260_v9, %v1806_v10 }
 0x68d   : > { %v1948_v3 = vrot.slane %v1947_v55, 2  ;;  %v1962_v12 = vadd.f32 %v1961_v4, %v1960_v6 }
 0x68e   : > { %v1974_v13 = vmul.f32 %v5284_v5, %v5284_v5  ;;  %v5288_v14 = vadd.f32 %v4326_v54, %v1891_v11 }
 0x68f   : > { %v1949_v15 = vadd.f32 %v1948_v3, %v1947_v55  ;;  %v1963_v16 = vrot.slane %v1962_v12, 2 }
 0x690   : > { %v1975_v17 = vsel %vm1944_vm15, %v1974_v13, 0.0  ;;  %v1989_v18 = vmul.f32 %v5288_v14, %v5288_v14 }
 0x691   : > { %v1950_v22 = vrot.slane %v1949_v15, 1  ;;  %v1964_v23 = vadd.f32 %v1963_v16, %v1962_v12  ;;  %v1976_v24 = vrot.slane %v1975_v17, 4 }
 0x692   : > { %v1990_v25 = vsel %vm1944_vm15, %v1989_v18, 0.0  ;;  %vm2927_vm15 = vcmask 130112  }
 0x693   : > { %v1951_v27 = vadd.f32 %v1950_v22, %v1949_v15  ;;  %v1965_v21 = vrot.slane %v1964_v23, 1  ;;  %v1977_v28 = vadd.f32 %v1976_v24, %v1975_v17  ;;  %v1991_v29 = vrot.slane %v1990_v25, 4 }
 0x694   : > { %v2620_v15 = vsel %vm581_vm0, 1.0, %v4755_v51  ;;  %v5305_v51 = vld [vmem:[%s6392_s15 + $0x20] sm:$0xff]  }
 0x695   : > { %v1952_v30 = vadd.f32 1e-16, %v1951_v27  ;;  %v1955_v26 = vadd.f32 1.0, %v1951_v27  ;;  %v1966_v31 = vadd.f32 %v1965_v21, %v1964_v23  ;;  %v1978_v32 = vrot.slane %v1977_v28, 2 }
 0x696   : > { %v1992_v33 = vadd.f32 %v1991_v29, %v1990_v25 }
 0x697   : > { %4630 = vrsqrt.f32 %v1952_v30  ;;  %v1967_v34 = vadd.f32 1e-16, %v1966_v31  ;;  %v1970_v35 = vadd.f32 1.0, %v1966_v31  ;;  %v1979_v36 = vadd.f32 %v1978_v32, %v1977_v28  ;;  %v2006_v28 = vpop.permute.xlu1 %2005 }
 0x698   : > { %4632 = vrcp.f32 %v1955_v26  ;;  %v1993_v37 = vrot.slane %v1992_v33, 2  ;;  %v5310_v26 = vld [vmem:[%s6392_s15 + $0x28] sm:$0xff]  }
 0x699   : > { %4634 = vrsqrt.f32 %v1967_v34  ;;  %v1980_v38 = vrot.slane %v1979_v36, 1  ;;  %v5326_v34 = vld [vmem:[%s6392_s15] sm:$0xff]  }
 0x69a   : > { %v1994_v39 = vadd.f32 %v1993_v37, %v1992_v33  ;;  %4636 = vrcp.f32 %v1970_v35  ;;  %v5321_v33 = vld [vmem:[%s6392_s15 + $0x38] sm:$0xff]   ;;  %v5332_v37 = vld [vmem:[%s6392_s15 + $0x8] sm:$0xff]  }
 0x69b   : > { %v1981_v40 = vadd.f32 %v1980_v38, %v1979_v36  ;;  %v4068_v36 = vunpack.c.l.bf16 %v5305_v51  ;;  %v5337_v38 = vld [vmem:[%s6392_s15 + $0x10] sm:$0xff]  }
 0x69c   : > { %v1995_v41 = vrot.slane %v1994_v39, 1 }
 0x69d   : > { %v1982_v42 = vadd.f32 1e-16, %v1981_v40  ;;  %v1985_v43 = vadd.f32 1.0, %v1981_v40 }
 0x69e   : > { %v1996_v44 = vadd.f32 %v1995_v41, %v1994_v39  ;;  %v4069_v39 = vunpack.c.h.bf16 %v5305_v51  ;;  %v4073_v41 = vunpack.c.h.bf16 %v5310_v26 }
 0x69f   : > { %4638 = vrsqrt.f32 %v1982_v42 }
 0x6a0   : > { %v1997_v45 = vadd.f32 1e-16, %v1996_v44  ;;  %v2000_v46 = vadd.f32 1.0, %v1996_v44  ;;  %4640 = vrcp.f32 %v1985_v43  ;;  %v5346_v43 = vld [vmem:[%s6392_s15 + $0x18] sm:$0xff]  }
 0x6a1   : > { %v4631_v47 = vpop.eup %4630 }
 0x6a2   : > { %v4633_v48 = vpop.eup %4632  ;;  %v1954_v49 = vmul.f32 %v4631_v47, %v1951_v27  ;;  %4642 = vrsqrt.f32 %v1997_v45  ;;  %v4081_v47 = vunpack.c.h.bf16 %v5321_v33 }
 0x6a3   : > { %v4635_v50 = vpop.eup %4634  ;;  %4644 = vrcp.f32 %v2000_v46  ;;  %v4080_v46 = vunpack.c.l.bf16 %v5321_v33 }
 0x6a4   : > { %v1957_v52 = vmul.f32 %v4633_v48, %v1954_v49  ;;  %v1969_v54 = vmul.f32 %v4635_v50, %v1966_v31  ;;  %v4637_v8 = vpop.eup %4636  ;;  %v5315_v31 = vld [vmem:[%s6392_s15 + $0x30] sm:$0xff]   ;;  %v5360_v49 = vld [vmem:[%s6392_s15 + $0x48] sm:$0xff]  }
 0x6a5   : > { %v4076_v42 = vunpack.c.l.bf16 %v5315_v31  ;;  %v4077_v45 = vunpack.c.h.bf16 %v5315_v31  ;;  %v5365_v50 = vld [vmem:[%s6392_s15 + $0x50] sm:$0xff]  }
 0x6a6   : > { %v1958_v59 = vmul.f32 %v1957_v52, %v5274_v53  ;;  %v1972_v60 = vmul.f32 %v4637_v8, %v1969_v54 }
 0x6a8   : > { %v1973_v62 = vmul.f32 %v1972_v60, %v5278_v61  ;;  %2013 = vrot.lane.b32.xlu1 %v1958_v59, %s4778_s29  ;;  %v1016_v61 = vpop.permute.xlu0 %1015  ;;  %v5374_v60 = vld [vmem:[%s6392_s15 + $0x58] sm:$0xff]  }
 0x6a9   : > { %v4639_v56 = vpop.eup %4638  ;;  %v1060_v7 = vadd.f32 %v5181_v58, %v1016_v61  ;;  %v5402_v61 = vld [vmem:[%s6392_s15 + $0x78] sm:$0xff]  }
 0x6aa   : > { %2017 = vrot.lane.b32.xlu0 %v1973_v62, %s4779_s17  ;;  %v1984_v63 = vmul.f32 %v4639_v56, %v1981_v40  ;;  %v4641_v20 = vpop.eup %4640  ;;  %v4072_v40 = vunpack.c.l.bf16 %v5310_v26  ;;  %v5379_v62 = vld [vmem:[%s6392_s15 + $0x60] sm:$0xff]  }
 0x6ab   : > { %v1065_v9 = vmul.f32 %v1060_v7, %v1060_v7 }
 0x6ac   : > { %v4643_v0 = vpop.eup %4642  ;;  %v1987_v57 = vmul.f32 %v4641_v20, %v1984_v63  ;;  %v2010_v30 = vpop.permute.xlu0 %2009 }
 0x6ad   : > { %v1999_v1 = vmul.f32 %v4643_v0, %v1996_v44  ;;  %v4645_v19 = vpop.eup %4644  ;;  %v1067_v10 = vsel %vm1066_vm1, %v1065_v9, 0.0  ;;  %v5351_v44 = vld [vmem:[%s6392_s15 + $0x40] sm:$0xff]  }
 0x6ae   : > { %v1988_v2 = vmul.f32 %v1987_v57, %v5284_v5  ;;  %v1068_v55 = vrot.slane %v1067_v10, 4  ;;  %v5388_v57 = vld [vmem:[%s6392_s15 + $0x68] sm:$0xff]  }
 0x6af   : > { %v2002_v6 = vmul.f32 %v4645_v19, %v1999_v1  ;;  %v5393_v1 = vld [vmem:[%s6392_s15 + $0x70] sm:$0xff]  }
 0x6b0   : > { %2021 = vrot.lane.b32.xlu1 %v1988_v2, %s4780_s24  ;;  %v1069_v4 = vadd.f32 %v1068_v55, %v1067_v10  ;;  %s6335_s24 = scalar_lea.hbm %s6393_s16, %s4044_s26 }
 0x6b1   : > { %v2003_v53 = vmul.f32 %v2002_v6, %v5288_v14  ;;  %v2621_v14 = vrot.slane %v2620_v15, 4 }
 0x6b2   : > { %v1070_v11 = vrot.slane %v1069_v4, 2 }
 0x6b3   : > { %2025 = vrot.lane.b32.xlu0 %v2003_v53, %s4781_s27  ;;  %v2622_v17 = vadd.f32 %v2621_v14, %v2620_v15  ;;  %v5425_v14 = vld [vmem:[%s6392_s15 + $0x90] sm:$0xff]   ;;  %v5492_v15 = vld [vmem:[%s6392_s15 + $0xd8] sm:$0xff]   ;;  %s3820_s27 = scalar_lea.sflag [#allocation3], %s542_s19 }
 0x6b4   : > { %v1071_v3 = vadd.f32 %v1070_v11, %v1069_v4 }
 0x6b5   : > { %v2623_v58 = vrot.slane %v2622_v17, 2 }
 0x6b6   : > { %v1072_v12 = vrot.slane %v1071_v3, 1 }
 0x6b7   : > { %v2624_v22 = vadd.f32 %v2623_v58, %v2622_v17  ;;  %v5506_v17 = vld [vmem:[%s6392_s15 + $0xe8] sm:$0xff]   ;;  %v5520_v58 = vld [vmem:[%s6392_s15 + $0xf8] sm:$0xff]  }
 0x6b8   : > { %v1073_v5 = vadd.f32 %v1072_v12, %v1071_v3  ;;  %v5416_v3 = vld [vmem:[%s6392_s15 + $0x88] sm:$0xff]   ;;  %6444 = vst [vmem:[#allocation12_spill] sm:$0xff] %v5520_v58 }
 0x6b9   : > { %v2625_v25 = vrot.slane %v2624_v22, 1 }
 0x6ba   : > { %v1074_v13 = vadd.f32 1e-16, %v1073_v5  ;;  %v1077_v16 = vadd.f32 1.0, %v1073_v5 }
 0x6bb   : > { %v2626_v21 = vadd.f32 %v2625_v25, %v2624_v22 }
 0x6bc   : > { %4646 = vrsqrt.f32 %v1074_v13  ;;  %v5497_v13 = vld [vmem:[%s6392_s15 + $0xe0] sm:$0xff]  }
 0x6bd   : > { %4648 = vrcp.f32 %v1077_v16  ;;  %v5430_v16 = vld [vmem:[%s6392_s15 + $0x98] sm:$0xff]  }
 0x6be   : > { %4650 = vrcp.f32 %v2626_v21  ;;  %v5469_v21 = vld [vmem:[%s6392_s15 + $0xc0] sm:$0xff]  }
 0x6c6   : > { %v4647_v18 = vpop.eup %4646 }
 0x6c7   : > { %v1076_v23 = vmul.f32 %v4647_v18, %v1073_v5  ;;  %v4649_v24 = vpop.eup %4648  ;;  %v5511_v18 = vld [vmem:[%s6392_s15 + $0xf0] sm:$0xff]  }
 0x6c8   : > { %v5460_v22 = vpop.eup %4650  ;;  %6443 = vst [vmem:[#allocation11_spill] sm:$0xff] %v5511_v18 }
 0x6c9   : > { %v1079_v27 = vmul.f32 %v4649_v24, %v1076_v23  ;;  %v5439_v23 = vld [vmem:[%s6392_s15 + $0xa0] sm:$0xff]   ;;  %v5444_v24 = vld [vmem:[%s6392_s15 + $0xa8] sm:$0xff]  }
 0x6cb   : > { %v1080_v29 = vmul.f32 %v1079_v27, %v1060_v7  ;;  %v5407_v7 = vld [vmem:[%s6392_s15 + $0x80] sm:$0xff]  }
 0x6cd   : > { %v2028_v32 = vsel %vm1066_vm1, %v1080_v29, %v2006_v28  ;;  %v5483_v29 = vld [vmem:[%s6392_s15 + $0xd0] sm:$0xff]   ;;  %vm2960_vm1 = vcmask 125952  }
 0x6ce   : > { %v2030_v35 = vsel %vm2029_vm2, %v2028_v32, %v2010_v30  ;;  %v5453_v30 = vld [vmem:[%s6392_s15 + $0xb0] sm:$0xff]   ;;  %v5458_v32 = vld [vmem:[%s6392_s15 + $0xb8] sm:$0xff]  }
 0x71a   : > { %v2014_v9 = vpop.permute.xlu1 %2013 }
 0x71b   : > { %v2032_v25 = vsel %vm2031_vm3, %v2030_v35, %v2014_v9  ;;  %v5478_v9 = vld [vmem:[%s6392_s15 + $0xc8] sm:$0xff]   ;;  %vm3817_vm3 = vcmask 24576  }
 0x71c   : > { %v2018_v27 = vpop.permute.xlu0 %2017 }
 0x71d   : > { %v2034_v28 = vsel %vm2033_vm4, %v2032_v25, %v2018_v27 }
 0x722   : > { %v2022_v35 = vpop.permute.xlu1 %2021 }
 0x723   : > { %v2036_v5 = vsel %vm2035_vm5, %v2034_v28, %v2022_v35 }
 0x725   : > { %v2026_v25 = vpop.permute.xlu0 %2025 }
 0x726   : > { %v2038_v28 = vsel %vm2037_vm6, %v2036_v5, %v2026_v25 }
 0x727   : > { %v5531_v53 = vsel %vm2039_vm7, %v2038_v28, 0.0 }
 0x728   : > { %v2081_v12 = vmul.f32 %v4068_v36, %v5531_v53  ;;  %v2082_v5 = vmul.f32 %v4069_v39, %v5531_v53  ;;  %v2083_v25 = vmul.f32 %v4072_v40, %v5531_v53  ;;  %v2084_v28 = vmul.f32 %v4073_v41, %v5531_v53 }
 0x729   : > { %v2085_v4 = vmul.f32 %v4076_v42, %v5531_v53  ;;  %v2086_v36 = vmul.f32 %v4077_v45, %v5531_v53  ;;  %v2087_v51 = vmul.f32 %v4080_v46, %v5531_v53  ;;  %v2088_v39 = vmul.f32 %v4081_v47, %v5531_v53 }
 0x72a   : > { %v2137_v40 = vrot.slane %v2081_v12, 4  ;;  %v2143_v11 = vrot.slane %v2082_v5, 4  ;;  %v2149_v26 = vrot.slane %v2083_v25, 4  ;;  %v2155_v41 = vrot.slane %v2084_v28, 4 }
 0x72b   : > { %v2161_v6 = vrot.slane %v2085_v4, 4  ;;  %v2167_v10 = vrot.slane %v2086_v36, 4  ;;  %v2173_v27 = vrot.slane %v2087_v51, 4  ;;  %v2179_v42 = vrot.slane %v2088_v39, 4 }
 0x72c   : > { %v2138_v35 = vadd.f32 %v2137_v40, %v2081_v12  ;;  %v2144_v55 = vadd.f32 %v2143_v11, %v2082_v5  ;;  %v2150_v31 = vadd.f32 %v2149_v26, %v2083_v25  ;;  %v2156_v45 = vadd.f32 %v2155_v41, %v2084_v28 }
 0x72d   : > { %v2162_v2 = vadd.f32 %v2161_v6, %v2085_v4  ;;  %v2168_v19 = vadd.f32 %v2167_v10, %v2086_v36  ;;  %v2174_v0 = vadd.f32 %v2173_v27, %v2087_v51  ;;  %v2180_v46 = vadd.f32 %v2179_v42, %v2088_v39 }
 0x72e   : > { %v2139_v20 = vrot.slane %v2138_v35, 2  ;;  %v2145_v63 = vrot.slane %v2144_v55, 2  ;;  %v2151_v33 = vrot.slane %v2150_v31, 2  ;;  %v2157_v47 = vrot.slane %v2156_v45, 2 }
 0x72f   : > { %v2163_v56 = vrot.slane %v2162_v2, 2  ;;  %v2169_v59 = vrot.slane %v2168_v19, 2  ;;  %v2175_v8 = vrot.slane %v2174_v0, 2  ;;  %v2181_v54 = vrot.slane %v2180_v46, 2 }
 0x730   : > { %v2140_v52 = vadd.f32 %v2139_v20, %v2138_v35  ;;  %v2146_v48 = vadd.f32 %v2145_v63, %v2144_v55  ;;  %v2152_v58 = vadd.f32 %v2151_v33, %v2150_v31  ;;  %v2158_v18 = vadd.f32 %v2157_v47, %v2156_v45 }
 0x731   : > { %v2164_v12 = vadd.f32 %v2163_v56, %v2162_v2  ;;  %v2170_v11 = vadd.f32 %v2169_v59, %v2168_v19  ;;  %v2176_v5 = vadd.f32 %v2175_v8, %v2174_v0  ;;  %v2182_v25 = vadd.f32 %v2181_v54, %v2180_v46 }
 0x732   : > { %v2141_v6 = vrot.slane %v2140_v52, 1  ;;  %v2147_v10 = vrot.slane %v2146_v48, 1  ;;  %v2153_v4 = vrot.slane %v2152_v58, 1  ;;  %v2159_v27 = vrot.slane %v2158_v18, 1 }
 0x733   : > { %v2165_v28 = vrot.slane %v2164_v12, 1  ;;  %v2171_v36 = vrot.slane %v2170_v11, 1  ;;  %v2177_v51 = vrot.slane %v2176_v5, 1  ;;  %v2183_v39 = vrot.slane %v2182_v25, 1 }
 0x734   : > { %v5560_v40 = vadd.f32 %v2141_v6, %v2140_v52  ;;  %v5562_v63 = vadd.f32 %v2147_v10, %v2146_v48  ;;  %v5564_v20 = vadd.f32 %v2153_v4, %v2152_v58  ;;  %v5566_v59 = vadd.f32 %v2159_v27, %v2158_v18 }
 0x735   : > { %v5568_v54 = vadd.f32 %v2165_v28, %v2164_v12  ;;  %v5570_v8 = vadd.f32 %v2171_v36, %v2170_v11  ;;  %v5572_v56 = vadd.f32 %v2177_v51, %v2176_v5  ;;  %v5574_v0 = vadd.f32 %v2183_v39, %v2182_v25 }
 0x736   : > { %6445 = vst [vmem:[#allocation13_spill] sm:$0xff] %v5566_v59  ;;  %v2637_v52 = vmul.f32 %v5460_v22, %v5560_v40  ;;  %v2638_v48 = vmul.f32 %v5460_v22, %v5562_v63  ;;  %v2639_v19 = vmul.f32 %v5460_v22, %v5564_v20  ;;  %v2640_v2 = vmul.f32 %v5460_v22, %v5566_v59 }
 0x737   : > { %6446 = vst [vmem:[#allocation14_spill] sm:$0xff] %v5568_v54  ;;  %6447 = vst [vmem:[#allocation15_spill] sm:$0xff] %v5570_v8  ;;  %v2641_v55 = vmul.f32 %v5460_v22, %v5568_v54  ;;  %v2642_v58 = vmul.f32 %v5460_v22, %v5570_v8  ;;  %v2643_v18 = vmul.f32 %v5460_v22, %v5572_v56  ;;  %v6450_v31 = vunpack.c.l.bf16 %v5326_v34 }
 0x738   : > { %6448 = vst [vmem:[#allocation16_spill] sm:$0xff] %v5572_v56  ;;  %6449 = vst [vmem:[#allocation17_spill] sm:$0xff] %v5574_v0  ;;  %v2644_v35 = vmul.f32 %v5460_v22, %v5574_v0  ;;  %v2778_v26 = vrot.slane %v2638_v48, 7  ;;  %v2780_v41 = vrot.slane %v2639_v19, 6  ;;  %v2782_v42 = vrot.slane %v2640_v2, 5 }
 0x739   : > { %v2073_v45 = vmul.f32 %v6450_v31, %v5531_v53  ;;  %v2784_v46 = vrot.slane %v2641_v55, 4  ;;  %v2786_v33 = vrot.slane %v2642_v58, 3  ;;  %v2788_v47 = vrot.slane %v2643_v18, 2 }
 0x73a   : > { %v2790_v12 = vrot.slane %v2644_v35, 1  ;;  %v2779_v11 = vsel %vm2758_vm8, %v2778_v26, %v2637_v52  ;;  %v6451_v5 = vunpack.c.h.bf16 %v5326_v34  ;;  %v6452_v6 = vunpack.c.l.bf16 %v5332_v37 }
 0x73b   : > { %v6453_v4 = vunpack.c.h.bf16 %v5332_v37  ;;  %v2781_v28 = vsel %vm2761_vm9, %v2780_v41, %v2779_v11  ;;  %v6454_v36 = vunpack.c.l.bf16 %v5337_v38  ;;  %v6455_v39 = vunpack.c.h.bf16 %v5337_v38 }
 0x73c   : > { %v2074_v25 = vmul.f32 %v6451_v5, %v5531_v53  ;;  %v2075_v10 = vmul.f32 %v6452_v6, %v5531_v53  ;;  %v6456_v34 = vunpack.c.l.bf16 %v5346_v43  ;;  %v2783_v19 = vsel %vm2764_vm10, %v2782_v42, %v2781_v28 }
 0x73d   : > { %v2076_v27 = vmul.f32 %v6453_v4, %v5531_v53  ;;  %v2077_v51 = vmul.f32 %v6454_v36, %v5531_v53  ;;  %v2078_v52 = vmul.f32 %v6455_v39, %v5531_v53  ;;  %v6457_v37 = vunpack.c.h.bf16 %v5346_v43 }
 0x73e   : > { %v2079_v48 = vmul.f32 %v6456_v34, %v5531_v53  ;;  %v2089_v55 = vrot.slane %v2073_v45, 4  ;;  %v2095_v58 = vrot.slane %v2074_v25, 4  ;;  %v2785_v18 = vsel %vm2767_vm11, %v2784_v46, %v2783_v19 }
 0x73f   : > { %v2080_v2 = vmul.f32 %v6457_v37, %v5531_v53  ;;  %v2101_v35 = vrot.slane %v2075_v10, 4  ;;  %v2107_v26 = vrot.slane %v2076_v27, 4  ;;  %v2113_v41 = vrot.slane %v2077_v51, 4 }
 0x740   : > { %v2787_v38 = vsel %vm2770_vm12, %v2786_v33, %v2785_v18  ;;  %v2090_v31 = vadd.f32 %v2089_v55, %v2073_v45  ;;  %v2096_v11 = vadd.f32 %v2095_v58, %v2074_v25  ;;  %v2119_v5 = vrot.slane %v2078_v52, 4 }
 0x741   : > { %v2789_v6 = vsel %vm2773_vm13, %v2788_v47, %v2787_v38  ;;  %v2102_v4 = vadd.f32 %v2101_v35, %v2075_v10  ;;  %v2108_v42 = vadd.f32 %v2107_v26, %v2076_v27  ;;  %v2114_v28 = vadd.f32 %v2113_v41, %v2077_v51 }
 0x742   : > { %v2791_v43 = vsel %vm2776_vm14, %v2790_v12, %v2789_v6  ;;  %v2091_v36 = vrot.slane %v2090_v31, 2  ;;  %v2097_v39 = vrot.slane %v2096_v11, 2  ;;  %v2120_v34 = vadd.f32 %v2119_v5, %v2078_v52 }
 0x743   : > { %2886 = vadd.xlane.f32.xlu0 %v2791_v43  ;;  %v2103_v46 = vrot.slane %v2102_v4, 2  ;;  %v2109_v19 = vrot.slane %v2108_v42, 2  ;;  %v2115_v37 = vrot.slane %v2114_v28, 2  ;;  %v2125_v0 = vrot.slane %v2079_v48, 4 }
 0x744   : > { %v2092_v56 = vadd.f32 %v2091_v36, %v2090_v31  ;;  %v2098_v33 = vadd.f32 %v2097_v39, %v2096_v11  ;;  %v2121_v45 = vrot.slane %v2120_v34, 2  ;;  %v2131_v25 = vrot.slane %v2080_v2, 4 }
 0x745   : > { %v2104_v55 = vadd.f32 %v2103_v46, %v2102_v4  ;;  %v2110_v58 = vadd.f32 %v2109_v19, %v2108_v42  ;;  %v2116_v47 = vadd.f32 %v2115_v37, %v2114_v28  ;;  %v2126_v10 = vadd.f32 %v2125_v0, %v2079_v48 }
 0x746   : > { %v2093_v27 = vrot.slane %v2092_v56, 1  ;;  %v2099_v51 = vrot.slane %v2098_v33, 1  ;;  %v2122_v18 = vadd.f32 %v2121_v45, %v2120_v34  ;;  %v2132_v12 = vadd.f32 %v2131_v25, %v2080_v2 }
 0x747   : > { %v2105_v35 = vrot.slane %v2104_v55, 1  ;;  %v2111_v26 = vrot.slane %v2110_v58, 1  ;;  %v2117_v52 = vrot.slane %v2116_v47, 1  ;;  %v2127_v41 = vrot.slane %v2126_v10, 2 }
 0x748   : > { %v5623_v38 = vadd.f32 %v2093_v27, %v2092_v56  ;;  %v5625_v5 = vadd.f32 %v2099_v51, %v2098_v33  ;;  %v2123_v31 = vrot.slane %v2122_v18, 1  ;;  %v2133_v11 = vrot.slane %v2132_v12, 2 }
 0x749   : > { %v5627_v6 = vadd.f32 %v2105_v35, %v2104_v55  ;;  %v5629_v4 = vadd.f32 %v2111_v26, %v2110_v58  ;;  %v5631_v42 = vadd.f32 %v2117_v52, %v2116_v47  ;;  %v2128_v0 = vadd.f32 %v2127_v41, %v2126_v10 }
 0x74a   : > { %v5633_v48 = vadd.f32 %v2123_v31, %v2122_v18  ;;  %v2134_v2 = vadd.f32 %v2133_v11, %v2132_v12  ;;  %v2629_v28 = vmul.f32 %v5460_v22, %v5623_v38  ;;  %v2630_v56 = vmul.f32 %v5460_v22, %v5625_v5 }
 0x74b   : > { %6458 = vst [vmem:[#allocation18_spill] sm:$0xff] %v5629_v4  ;;  %6459 = vst [vmem:[#allocation19_spill] sm:$0xff] %v5631_v42  ;;  %v2129_v43 = vrot.slane %v2128_v0, 1  ;;  %v2631_v36 = vmul.f32 %v5460_v22, %v5627_v6  ;;  %v2632_v39 = vmul.f32 %v5460_v22, %v5629_v4  ;;  %v2633_v34 = vmul.f32 %v5460_v22, %v5631_v42 }
 0x74c   : > { %6460 = vst [vmem:[#allocation20_spill] sm:$0xff] %v5633_v48  ;;  %v2135_v46 = vrot.slane %v2134_v2, 1  ;;  %v2634_v19 = vmul.f32 %v5460_v22, %v5633_v48  ;;  %v2757_v37 = vrot.slane %v2630_v56, 7  ;;  %v6461_v33 = vunpack.c.l.bf16 %v5351_v44 }
 0x74d   : > { %v5650_v25 = vadd.f32 %v2129_v43, %v2128_v0  ;;  %v2760_v55 = vrot.slane %v2631_v36, 6  ;;  %v2763_v58 = vrot.slane %v2632_v39, 5  ;;  %v2766_v47 = vrot.slane %v2633_v34, 4 }
 0x74e   : > { %v2218_v45 = vmul.f32 %v6461_v33, %v5531_v53  ;;  %v5652_v10 = vadd.f32 %v2135_v46, %v2134_v2  ;;  %v2759_v27 = vsel %vm2758_vm8, %v2757_v37, %v2629_v28  ;;  %v2769_v51 = vrot.slane %v2634_v19, 3 }
 0x74f   : > { %6462 = vst [vmem:[#allocation21_spill] sm:$0xff] %v5650_v25  ;;  %v6464_v18 = vunpack.c.h.bf16 %v5351_v44  ;;  %v2635_v35 = vmul.f32 %v5460_v22, %v5650_v25  ;;  %v2762_v26 = vsel %vm2761_vm9, %v2760_v55, %v2759_v27  ;;  %v6465_v52 = vunpack.c.l.bf16 %v5360_v49 }
 0x750   : > { %6463 = vst [vmem:[#allocation22_spill] sm:$0xff] %v5652_v10  ;;  %v6466_v31 = vunpack.c.h.bf16 %v5360_v49  ;;  %v2636_v0 = vmul.f32 %v5460_v22, %v5652_v10  ;;  %v2765_v2 = vsel %vm2764_vm10, %v2763_v58, %v2762_v26  ;;  %v6467_v44 = vunpack.c.l.bf16 %v5365_v50 }
 0x751   : > { %v2219_v12 = vmul.f32 %v6464_v18, %v5531_v53  ;;  %v2220_v41 = vmul.f32 %v6465_v52, %v5531_v53  ;;  %v6468_v56 = vunpack.c.h.bf16 %v5365_v50  ;;  %v2768_v36 = vsel %vm2767_vm11, %v2766_v47, %v2765_v2 }
 0x752   : > { %v2221_v11 = vmul.f32 %v6466_v31, %v5531_v53  ;;  %v2222_v28 = vmul.f32 %v6467_v44, %v5531_v53  ;;  %v2772_v39 = vrot.slane %v2635_v35, 2  ;;  %v6469_v49 = vunpack.c.l.bf16 %v5374_v60 }
 0x753   : > { %v2223_v43 = vmul.f32 %v6468_v56, %v5531_v53  ;;  %v6470_v46 = vunpack.c.h.bf16 %v5374_v60  ;;  %v2771_v37 = vsel %vm2770_vm12, %v2769_v51, %v2768_v36  ;;  %v2775_v33 = vrot.slane %v2636_v0, 1 }
 0x754   : > { %v2224_v34 = vmul.f32 %v6469_v49, %v5531_v53  ;;  %v2234_v55 = vrot.slane %v2218_v45, 4  ;;  %v2240_v58 = vrot.slane %v2219_v12, 4  ;;  %v2774_v27 = vsel %vm2773_vm13, %v2772_v39, %v2771_v37 }
 0x755   : > { %v2225_v19 = vmul.f32 %v6470_v46, %v5531_v53  ;;  %v2246_v50 = vrot.slane %v2220_v41, 4  ;;  %v2252_v18 = vrot.slane %v2221_v11, 4  ;;  %v2258_v26 = vrot.slane %v2222_v28, 4 }
 0x756   : > { %v2777_v47 = vsel %vm2776_vm14, %v2775_v33, %v2774_v27  ;;  %v2235_v35 = vadd.f32 %v2234_v55, %v2218_v45  ;;  %v2241_v52 = vadd.f32 %v2240_v58, %v2219_v12  ;;  %v2264_v31 = vrot.slane %v2223_v43, 4 }
 0x757   : > { %2884 = vadd.xlane.f32.xlu1 %v2777_v47  ;;  %v2247_v2 = vadd.f32 %v2246_v50, %v2220_v41  ;;  %v2253_v44 = vadd.f32 %v2252_v18, %v2221_v11  ;;  %v2259_v60 = vadd.f32 %v2258_v26, %v2222_v28  ;;  %v2270_v56 = vrot.slane %v2224_v34, 4 }
 0x758   : > { %v2236_v49 = vrot.slane %v2235_v35, 2  ;;  %v2242_v51 = vrot.slane %v2241_v52, 2  ;;  %v2265_v0 = vadd.f32 %v2264_v31, %v2223_v43  ;;  %v2276_v36 = vrot.slane %v2225_v19, 4 }
 0x759   : > { %v2248_v46 = vrot.slane %v2247_v2, 2  ;;  %v2254_v10 = vrot.slane %v2253_v44, 2  ;;  %v2260_v39 = vrot.slane %v2259_v60, 2  ;;  %v2271_v37 = vadd.f32 %v2270_v56, %v2224_v34 }
 0x75a   : > { %v2237_v25 = vadd.f32 %v2236_v49, %v2235_v35  ;;  %v2243_v48 = vadd.f32 %v2242_v51, %v2241_v52  ;;  %v2266_v8 = vrot.slane %v2265_v0, 2  ;;  %v2277_v33 = vadd.f32 %v2276_v36, %v2225_v19 }
 0x75b   : > { %v2249_v45 = vadd.f32 %v2248_v46, %v2247_v2  ;;  %v2255_v12 = vadd.f32 %v2254_v10, %v2253_v44  ;;  %v2261_v55 = vadd.f32 %v2260_v39, %v2259_v60  ;;  %v2272_v58 = vrot.slane %v2271_v37, 2 }
 0x75c   : > { %v2238_v41 = vrot.slane %v2237_v25, 1  ;;  %v2244_v11 = vrot.slane %v2243_v48, 1  ;;  %v2267_v28 = vadd.f32 %v2266_v8, %v2265_v0  ;;  %v2278_v27 = vrot.slane %v2277_v33, 2 }
 0x75d   : > { %v2250_v50 = vrot.slane %v2249_v45, 1  ;;  %v2256_v18 = vrot.slane %v2255_v12, 1  ;;  %v2262_v43 = vrot.slane %v2261_v55, 1  ;;  %v2273_v26 = vadd.f32 %v2272_v58, %v2271_v37 }
 0x75e   : > { %v5686_v47 = vadd.f32 %v2238_v41, %v2237_v25  ;;  %v5688_v31 = vadd.f32 %v2244_v11, %v2243_v48  ;;  %v2268_v34 = vrot.slane %v2267_v28, 1  ;;  %v2279_v35 = vadd.f32 %v2278_v27, %v2277_v33 }
 0x75f   : > { %v5690_v52 = vadd.f32 %v2250_v50, %v2249_v45  ;;  %v5692_v19 = vadd.f32 %v2256_v18, %v2255_v12  ;;  %v5694_v10 = vadd.f32 %v2262_v43, %v2261_v55  ;;  %v2274_v2 = vrot.slane %v2273_v26, 1 }
 0x760   : > { %v5696_v44 = vadd.f32 %v2268_v34, %v2267_v28  ;;  %v2280_v8 = vrot.slane %v2279_v35, 1  ;;  %v2645_v60 = vmul.f32 %v5460_v22, %v5686_v47  ;;  %v2646_v25 = vmul.f32 %v5460_v22, %v5688_v31 }
 0x761   : > { %6471 = vst [vmem:[#allocation23_spill] sm:$0xff] %v5692_v19  ;;  %6472 = vst [vmem:[#allocation24_spill] sm:$0xff] %v5694_v10  ;;  %v5702_v48 = vadd.f32 %v2274_v2, %v2273_v26  ;;  %v2647_v56 = vmul.f32 %v5460_v22, %v5690_v52  ;;  %v2648_v49 = vmul.f32 %v5460_v22, %v5692_v19  ;;  %v6476_v39 = vunpack.c.l.bf16 %v5379_v62 }
 0x762   : > { %6473 = vst [vmem:[#allocation25_spill] sm:$0xff] %v5696_v44  ;;  %v2649_v51 = vmul.f32 %v5460_v22, %v5694_v10  ;;  %v5710_v0 = vadd.f32 %v2280_v8, %v2279_v35  ;;  %v2650_v36 = vmul.f32 %v5460_v22, %v5696_v44  ;;  %v2792_v46 = vrot.slane %v2646_v25, 7 }
 0x763   : > { %6474 = vst [vmem:[#allocation26_spill] sm:$0xff] %v5702_v48  ;;  %v2226_v37 = vmul.f32 %v6476_v39, %v5531_v53  ;;  %v2651_v33 = vmul.f32 %v5460_v22, %v5702_v48  ;;  %v2794_v45 = vrot.slane %v2647_v56, 6  ;;  %v2796_v12 = vrot.slane %v2648_v49, 5 }
 0x764   : > { %6475 = vst [vmem:[#allocation27_spill] sm:$0xff] %v5710_v0  ;;  %v2798_v55 = vrot.slane %v2649_v51, 4  ;;  %v2652_v58 = vmul.f32 %v5460_v22, %v5710_v0  ;;  %v2793_v41 = vsel %vm2758_vm8, %v2792_v46, %v2645_v60  ;;  %v2800_v11 = vrot.slane %v2650_v36, 3 }
 0x765   : > { %v6477_v28 = vunpack.c.h.bf16 %v5379_v62  ;;  %v2795_v50 = vsel %vm2761_vm9, %v2794_v45, %v2793_v41  ;;  %v2802_v18 = vrot.slane %v2651_v33, 2  ;;  %v6478_v43 = vunpack.c.l.bf16 %v5388_v57 }
 0x766   : > { %v6479_v34 = vunpack.c.h.bf16 %v5388_v57  ;;  %v2797_v2 = vsel %vm2764_vm10, %v2796_v12, %v2795_v50  ;;  %v2804_v8 = vrot.slane %v2652_v58, 1  ;;  %v6480_v60 = vunpack.c.l.bf16 %v5393_v1 }
 0x767   : > { %v2227_v27 = vmul.f32 %v6477_v28, %v5531_v53  ;;  %v2228_v26 = vmul.f32 %v6478_v43, %v5531_v53  ;;  %v6481_v62 = vunpack.c.h.bf16 %v5393_v1  ;;  %v2799_v49 = vsel %vm2767_vm11, %v2798_v55, %v2797_v2 }
 0x768   : > { %v2229_v35 = vmul.f32 %v6479_v34, %v5531_v53  ;;  %v2230_v25 = vmul.f32 %v6480_v60, %v5531_v53  ;;  %v6482_v51 = vunpack.c.l.bf16 %v5402_v61  ;;  %v6483_v57 = vunpack.c.h.bf16 %v5402_v61 }
 0x769   : > { %v2231_v56 = vmul.f32 %v6481_v62, %v5531_v53  ;;  %v2282_v39 = vrot.slane %v2226_v37, 4  ;;  %v2801_v33 = vsel %vm2770_vm12, %v2800_v11, %v2799_v49  ;;  %v2288_v45 = vrot.slane %v2227_v27, 4 }
 0x76a   : > { %v2232_v36 = vmul.f32 %v6482_v51, %v5531_v53  ;;  %v2233_v46 = vmul.f32 %v6483_v57, %v5531_v53  ;;  %v2294_v12 = vrot.slane %v2228_v26, 4  ;;  %v2300_v58 = vrot.slane %v2229_v35, 4 }
 0x76b   : > { %v2803_v41 = vsel %vm2773_vm13, %v2802_v18, %v2801_v33  ;;  %v2283_v1 = vadd.f32 %v2282_v39, %v2226_v37  ;;  %v2306_v28 = vrot.slane %v2230_v25, 4  ;;  %v2312_v50 = vrot.slane %v2231_v56, 4 }
 0x76c   : > { %v2805_v55 = vsel %vm2776_vm14, %v2804_v8, %v2803_v41  ;;  %v2289_v43 = vadd.f32 %v2288_v45, %v2227_v27  ;;  %v2295_v34 = vadd.f32 %v2294_v12, %v2228_v26  ;;  %v2301_v2 = vadd.f32 %v2300_v58, %v2229_v35 }
 0x76d   : > { %2888 = vadd.xlane.f32.xlu0 %v2805_v55  ;;  %v2284_v60 = vrot.slane %v2283_v1, 2  ;;  %v2307_v61 = vadd.f32 %v2306_v28, %v2230_v25  ;;  %v2313_v62 = vadd.f32 %v2312_v50, %v2231_v56  ;;  %v2318_v51 = vrot.slane %v2232_v36, 4 }
 0x76e   : > { %v2290_v57 = vrot.slane %v2289_v43, 2  ;;  %v2296_v11 = vrot.slane %v2295_v34, 2  ;;  %v2302_v49 = vrot.slane %v2301_v2, 2  ;;  %v2324_v0 = vrot.slane %v2233_v46, 4 }
 0x76f   : > { %v2285_v48 = vadd.f32 %v2284_v60, %v2283_v1  ;;  %v2308_v44 = vrot.slane %v2307_v61, 2  ;;  %v2314_v18 = vrot.slane %v2313_v62, 2  ;;  %v2319_v37 = vadd.f32 %v2318_v51, %v2232_v36 }
 0x770   : > { %v2291_v39 = vadd.f32 %v2290_v57, %v2289_v43  ;;  %v2297_v33 = vadd.f32 %v2296_v11, %v2295_v34  ;;  %v2303_v10 = vadd.f32 %v2302_v49, %v2301_v2  ;;  %v2325_v8 = vadd.f32 %v2324_v0, %v2233_v46 }
 0x771   : > { %v2286_v27 = vrot.slane %v2285_v48, 1  ;;  %v2309_v26 = vadd.f32 %v2308_v44, %v2307_v61  ;;  %v2315_v35 = vadd.f32 %v2314_v18, %v2313_v62  ;;  %v2320_v45 = vrot.slane %v2319_v37, 2 }
 0x772   : > { %v2292_v12 = vrot.slane %v2291_v39, 1  ;;  %v2298_v25 = vrot.slane %v2297_v33, 1  ;;  %v2304_v56 = vrot.slane %v2303_v10, 1  ;;  %v2326_v58 = vrot.slane %v2325_v8, 2 }
 0x773   : > { %v5749_v41 = vadd.f32 %v2286_v27, %v2285_v48  ;;  %v2310_v28 = vrot.slane %v2309_v26, 1  ;;  %v2316_v50 = vrot.slane %v2315_v35, 1  ;;  %v2321_v1 = vadd.f32 %v2320_v45, %v2319_v37 }
 0x774   : > { %v5751_v55 = vadd.f32 %v2292_v12, %v2291_v39  ;;  %v5753_v36 = vadd.f32 %v2298_v25, %v2297_v33  ;;  %v5755_v43 = vadd.f32 %v2304_v56, %v2303_v10  ;;  %v2327_v0 = vadd.f32 %v2326_v58, %v2325_v8 }
 0x775   : > { %v5757_v46 = vadd.f32 %v2310_v28, %v2309_v26  ;;  %v5759_v44 = vadd.f32 %v2316_v50, %v2315_v35  ;;  %v2322_v34 = vrot.slane %v2321_v1, 1  ;;  %v2653_v2 = vmul.f32 %v5460_v22, %v5749_v41 }
 0x776   : > { %v2328_v48 = vrot.slane %v2327_v0, 1  ;;  %v2654_v60 = vmul.f32 %v5460_v22, %v5751_v55  ;;  %v2655_v61 = vmul.f32 %v5460_v22, %v5753_v36  ;;  %v2656_v10 = vmul.f32 %v5460_v22, %v5755_v43 }
 0x777   : > { %6484 = vst [vmem:[#allocation28_spill] sm:$0xff] %v5757_v46  ;;  %6485 = vst [vmem:[#allocation29_spill] sm:$0xff] %v5759_v44  ;;  %v5769_v62 = vadd.f32 %v2322_v34, %v2321_v1  ;;  %v2657_v51 = vmul.f32 %v5460_v22, %v5757_v46  ;;  %v2658_v57 = vmul.f32 %v5460_v22, %v5759_v44  ;;  %v6487_v11 = vunpack.c.l.bf16 %v5407_v7 }
 0x778   : > { %v5778_v18 = vadd.f32 %v2328_v48, %v2327_v0  ;;  %v2806_v37 = vrot.slane %v2654_v60, 7  ;;  %v2808_v39 = vrot.slane %v2655_v61, 6  ;;  %v2810_v33 = vrot.slane %v2656_v10, 5 }
 0x779   : > { %6486 = vst [vmem:[#allocation30_spill] sm:$0xff] %v5769_v62  ;;  %v2363_v49 = vmul.f32 %v6487_v11, %v5531_v53  ;;  %v2659_v8 = vmul.f32 %v5460_v22, %v5769_v62  ;;  %v2812_v27 = vrot.slane %v2657_v51, 4  ;;  %v2814_v26 = vrot.slane %v2658_v57, 3 }
 0x77a   : > { %6488 = vst [vmem:[#allocation31_spill] sm:$0xff] %v5778_v18  ;;  %v6489_v35 = vunpack.c.h.bf16 %v5407_v7  ;;  %v2660_v12 = vmul.f32 %v5460_v22, %v5778_v18  ;;  %v2807_v25 = vsel %vm2758_vm8, %v2806_v37, %v2653_v2  ;;  %v6490_v56 = vunpack.c.l.bf16 %v5416_v3 }
 0x77b   : > { %v6491_v28 = vunpack.c.h.bf16 %v5416_v3  ;;  %v2809_v1 = vsel %vm2761_vm9, %v2808_v39, %v2807_v25  ;;  %v2816_v0 = vrot.slane %v2659_v8, 2  ;;  %v6492_v7 = vunpack.c.l.bf16 %v5425_v14 }
 0x77c   : > { %v2364_v45 = vmul.f32 %v6489_v35, %v5531_v53  ;;  %v2365_v58 = vmul.f32 %v6490_v56, %v5531_v53  ;;  %v6493_v48 = vunpack.c.h.bf16 %v5425_v14  ;;  %v2811_v2 = vsel %vm2764_vm10, %v2810_v33, %v2809_v1 }
 0x77d   : > { %v2366_v50 = vmul.f32 %v6491_v28, %v5531_v53  ;;  %v2367_v34 = vmul.f32 %v6492_v7, %v5531_v53  ;;  %v2818_v61 = vrot.slane %v2660_v12, 1  ;;  %v6494_v10 = vunpack.c.l.bf16 %v5430_v16 }
 0x77e   : > { %v2368_v60 = vmul.f32 %v6493_v48, %v5531_v53  ;;  %v6495_v3 = vunpack.c.h.bf16 %v5430_v16  ;;  %v2813_v11 = vsel %vm2767_vm11, %v2812_v27, %v2811_v2  ;;  %v2379_v37 = vrot.slane %v2363_v49, 4 }
 0x77f   : > { %v2369_v51 = vmul.f32 %v6494_v10, %v5531_v53  ;;  %v2385_v39 = vrot.slane %v2364_v45, 4  ;;  %v2391_v8 = vrot.slane %v2365_v58, 4  ;;  %v2815_v35 = vsel %vm2770_vm12, %v2814_v26, %v2813_v11 }
 0x780   : > { %v2370_v57 = vmul.f32 %v6495_v3, %v5531_v53  ;;  %v2397_v14 = vrot.slane %v2366_v50, 4  ;;  %v2403_v25 = vrot.slane %v2367_v34, 4  ;;  %v2409_v56 = vrot.slane %v2368_v60, 4 }
 0x781   : > { %v2817_v33 = vsel %vm2773_vm13, %v2816_v0, %v2815_v35  ;;  %v2380_v12 = vadd.f32 %v2379_v37, %v2363_v49  ;;  %v2386_v28 = vadd.f32 %v2385_v39, %v2364_v45  ;;  %v2392_v1 = vadd.f32 %v2391_v8, %v2365_v58 }
 0x782   : > { %v2819_v7 = vsel %vm2776_vm14, %v2818_v61, %v2817_v33  ;;  %v2398_v48 = vadd.f32 %v2397_v14, %v2366_v50  ;;  %v2404_v16 = vadd.f32 %v2403_v25, %v2367_v34  ;;  %v2410_v10 = vadd.f32 %v2409_v56, %v2368_v60 }
 0x783   : > { %2890 = vadd.xlane.f32.xlu1 %v2819_v7  ;;  %v2381_v27 = vrot.slane %v2380_v12, 2  ;;  %v2387_v2 = vrot.slane %v2386_v28, 2  ;;  %v2393_v3 = vrot.slane %v2392_v1, 2  ;;  %v2415_v18 = vrot.slane %v2369_v51, 4 }
 0x784   : > { %v2399_v62 = vrot.slane %v2398_v48, 2  ;;  %v2405_v26 = vrot.slane %v2404_v16, 2  ;;  %v2411_v11 = vrot.slane %v2410_v10, 2  ;;  %v2421_v44 = vrot.slane %v2370_v57, 4 }
 0x785   : > { %v2382_v42 = vadd.f32 %v2381_v27, %v2380_v12  ;;  %v2388_v54 = vadd.f32 %v2387_v2, %v2386_v28  ;;  %v2394_v0 = vadd.f32 %v2393_v3, %v2392_v1  ;;  %v2416_v49 = vadd.f32 %v2415_v18, %v2369_v51 }
 0x786   : > { %v2400_v45 = vadd.f32 %v2399_v62, %v2398_v48  ;;  %v2406_v58 = vadd.f32 %v2405_v26, %v2404_v16  ;;  %v2412_v37 = vadd.f32 %v2411_v11, %v2410_v10  ;;  %v2422_v61 = vadd.f32 %v2421_v44, %v2370_v57 }
 0x787   : > { %v2383_v50 = vrot.slane %v2382_v42, 1  ;;  %v2389_v34 = vrot.slane %v2388_v54, 1  ;;  %v2395_v60 = vrot.slane %v2394_v0, 1  ;;  %v2417_v39 = vrot.slane %v2416_v49, 2 }
 0x788   : > { %v2401_v8 = vrot.slane %v2400_v45, 1  ;;  %v2407_v35 = vrot.slane %v2406_v58, 1  ;;  %v2413_v14 = vrot.slane %v2412_v37, 1  ;;  %v2423_v25 = vrot.slane %v2422_v61, 2 }
 0x789   : > { %v5812_v56 = vadd.f32 %v2383_v50, %v2382_v42  ;;  %v5814_v33 = vadd.f32 %v2389_v34, %v2388_v54  ;;  %v5816_v12 = vadd.f32 %v2395_v60, %v2394_v0  ;;  %v2418_v28 = vadd.f32 %v2417_v39, %v2416_v49 }
 0x78a   : > { %v5818_v18 = vadd.f32 %v2401_v8, %v2400_v45  ;;  %v5820_v62 = vadd.f32 %v2407_v35, %v2406_v58  ;;  %v5822_v44 = vadd.f32 %v2413_v14, %v2412_v37  ;;  %v2424_v51 = vadd.f32 %v2423_v25, %v2422_v61 }
 0x78b   : > { %6496 = vst [vmem:[#allocation32_spill] sm:$0xff] %v5812_v56  ;;  %6497 = vst [vmem:[#allocation33_spill] sm:$0xff] %v5814_v33  ;;  %v2419_v57 = vrot.slane %v2418_v28, 1  ;;  %v2661_v1 = vmul.f32 %v5460_v22, %v5812_v56  ;;  %v2662_v42 = vmul.f32 %v5460_v22, %v5814_v33  ;;  %v2663_v54 = vmul.f32 %v5460_v22, %v5816_v12 }
 0x78c   : > { %6498 = vst [vmem:[#allocation34_spill] sm:$0xff] %v5816_v12  ;;  %6499 = vst [vmem:[#allocation35_spill] sm:$0xff] %v5818_v18  ;;  %v2425_v7 = vrot.slane %v2424_v51, 1  ;;  %v2664_v48 = vmul.f32 %v5460_v22, %v5818_v18  ;;  %v2665_v16 = vmul.f32 %v5460_v22, %v5820_v62  ;;  %v2666_v10 = vmul.f32 %v5460_v22, %v5822_v44 }
 0x78d   : > { %6500 = vst [vmem:[#allocation36_spill] sm:$0xff] %v5820_v62  ;;  %6501 = vst [vmem:[#allocation37_spill] sm:$0xff] %v5822_v44  ;;  %v5836_v27 = vadd.f32 %v2419_v57, %v2418_v28  ;;  %v2820_v2 = vrot.slane %v2662_v42, 7  ;;  %v2822_v3 = vrot.slane %v2663_v54, 6  ;;  %v6503_v26 = vunpack.c.l.bf16 %v5439_v23 }
 0x78e   : > { %v5841_v0 = vadd.f32 %v2425_v7, %v2424_v51  ;;  %v2824_v49 = vrot.slane %v2664_v48, 5  ;;  %v2826_v45 = vrot.slane %v2665_v16, 4  ;;  %v2828_v58 = vrot.slane %v2666_v10, 3 }
 0x78f   : > { %6502 = vst [vmem:[#allocation38_spill] sm:$0xff] %v5836_v27  ;;  %v2371_v11 = vmul.f32 %v6503_v26, %v5531_v53  ;;  %v2667_v37 = vmul.f32 %v5460_v22, %v5836_v27  ;;  %v2821_v61 = vsel %vm2758_vm8, %v2820_v2, %v2661_v1  ;;  %v6505_v50 = vunpack.c.h.bf16 %v5439_v23 }
 0x790   : > { %6504 = vst [vmem:[#allocation39_spill] sm:$0xff] %v5841_v0  ;;  %v6506_v60 = vunpack.c.l.bf16 %v5444_v24  ;;  %v2668_v8 = vmul.f32 %v5460_v22, %v5841_v0  ;;  %v2823_v35 = vsel %vm2761_vm9, %v2822_v3, %v2821_v61  ;;  %v6507_v14 = vunpack.c.h.bf16 %v5444_v24 }
 0x791   : > { %v2372_v34 = vmul.f32 %v6505_v50, %v5531_v53  ;;  %v6508_v28 = vunpack.c.l.bf16 %v5453_v30  ;;  %v2825_v23 = vsel %vm2764_vm10, %v2824_v49, %v2823_v35  ;;  %v2830_v57 = vrot.slane %v2667_v37, 2 }
 0x792   : > { %v2373_v39 = vmul.f32 %v6506_v60, %v5531_v53  ;;  %v2374_v25 = vmul.f32 %v6507_v14, %v5531_v53  ;;  %v6509_v1 = vunpack.c.h.bf16 %v5453_v30  ;;  %v6510_v54 = vunpack.c.l.bf16 %v5458_v32 }
 0x793   : > { %v2375_v51 = vmul.f32 %v6508_v28, %v5531_v53  ;;  %v2827_v48 = vsel %vm2767_vm11, %v2826_v45, %v2825_v23  ;;  %v2832_v16 = vrot.slane %v2668_v8, 1  ;;  %v6511_v24 = vunpack.c.h.bf16 %v5458_v32 }
 0x794   : > { %v2376_v42 = vmul.f32 %v6509_v1, %v5531_v53  ;;  %v2377_v7 = vmul.f32 %v6510_v54, %v5531_v53  ;;  %v2427_v2 = vrot.slane %v2371_v11, 4  ;;  %v2829_v3 = vsel %vm2770_vm12, %v2828_v58, %v2827_v48 }
 0x795   : > { %v2378_v10 = vmul.f32 %v6511_v24, %v5531_v53  ;;  %v2433_v26 = vrot.slane %v2372_v34, 4  ;;  %v2439_v49 = vrot.slane %v2373_v39, 4  ;;  %v2445_v37 = vrot.slane %v2374_v25, 4 }
 0x796   : > { %v2831_v30 = vsel %vm2773_vm13, %v2830_v57, %v2829_v3  ;;  %v2428_v61 = vadd.f32 %v2427_v2, %v2371_v11  ;;  %v2451_v50 = vrot.slane %v2375_v51, 4  ;;  %v2457_v60 = vrot.slane %v2376_v42, 4 }
 0x797   : > { %v2833_v35 = vsel %vm2776_vm14, %v2832_v16, %v2831_v30  ;;  %v2434_v14 = vadd.f32 %v2433_v26, %v2372_v34  ;;  %v2440_v45 = vadd.f32 %v2439_v49, %v2373_v39  ;;  %v2446_v8 = vadd.f32 %v2445_v37, %v2374_v25 }
 0x798   : > { %2892 = vadd.xlane.f32.xlu0 %v2833_v35  ;;  %v2429_v28 = vrot.slane %v2428_v61, 2  ;;  %v2452_v32 = vadd.f32 %v2451_v50, %v2375_v51  ;;  %v2458_v23 = vadd.f32 %v2457_v60, %v2376_v42  ;;  %v2463_v1 = vrot.slane %v2377_v7, 4 }
 0x799   : > { %v2435_v54 = vrot.slane %v2434_v14, 2  ;;  %v2441_v58 = vrot.slane %v2440_v45, 2  ;;  %v2447_v48 = vrot.slane %v2446_v8, 2  ;;  %v2469_v24 = vrot.slane %v2378_v10, 4 }
 0x79a   : > { %v2430_v0 = vadd.f32 %v2429_v28, %v2428_v61  ;;  %v2453_v27 = vrot.slane %v2452_v32, 2  ;;  %v2459_v57 = vrot.slane %v2458_v23, 2  ;;  %v2464_v11 = vadd.f32 %v2463_v1, %v2377_v7 }
 0x79b   : > { %v2436_v2 = vadd.f32 %v2435_v54, %v2434_v14  ;;  %v2442_v3 = vadd.f32 %v2441_v58, %v2440_v45  ;;  %v2448_v44 = vadd.f32 %v2447_v48, %v2446_v8  ;;  %v2470_v16 = vadd.f32 %v2469_v24, %v2378_v10 }
 0x79c   : > { %v2431_v34 = vrot.slane %v2430_v0, 1  ;;  %v2454_v39 = vadd.f32 %v2453_v27, %v2452_v32  ;;  %v2460_v25 = vadd.f32 %v2459_v57, %v2458_v23  ;;  %v2465_v26 = vrot.slane %v2464_v11, 2 }
 0x79d   : > { %v2437_v49 = vrot.slane %v2436_v2, 1  ;;  %v2443_v51 = vrot.slane %v2442_v3, 1  ;;  %v2449_v42 = vrot.slane %v2448_v44, 1  ;;  %v2471_v37 = vrot.slane %v2470_v16, 2 }
 0x79e   : > { %v5875_v30 = vadd.f32 %v2431_v34, %v2430_v0  ;;  %v2455_v50 = vrot.slane %v2454_v39, 1  ;;  %v2461_v60 = vrot.slane %v2460_v25, 1  ;;  %v2466_v61 = vadd.f32 %v2465_v26, %v2464_v11 }
 0x79f   : > { %v5877_v35 = vadd.f32 %v2437_v49, %v2436_v2  ;;  %v5879_v7 = vadd.f32 %v2443_v51, %v2442_v3  ;;  %v5881_v14 = vadd.f32 %v2449_v42, %v2448_v44  ;;  %v2472_v10 = vadd.f32 %v2471_v37, %v2470_v16 }
 0x7a0   : > { %v5883_v45 = vadd.f32 %v2455_v50, %v2454_v39  ;;  %v5885_v27 = vadd.f32 %v2461_v60, %v2460_v25  ;;  %v2467_v8 = vrot.slane %v2466_v61, 1  ;;  %v2669_v28 = vmul.f32 %v5460_v22, %v5875_v30 }
 0x7a1   : > { %v2473_v0 = vrot.slane %v2472_v10, 1  ;;  %v2670_v32 = vmul.f32 %v5460_v22, %v5877_v35  ;;  %v2671_v23 = vmul.f32 %v5460_v22, %v5879_v7  ;;  %v2672_v44 = vmul.f32 %v5460_v22, %v5881_v14 }
 0x7a2   : > { %v5895_v1 = vadd.f32 %v2467_v8, %v2466_v61  ;;  %v2673_v54 = vmul.f32 %v5460_v22, %v5883_v45  ;;  %v2674_v58 = vmul.f32 %v5460_v22, %v5885_v27  ;;  %v6512_v48 = vunpack.c.l.bf16 %v5469_v21 }
 0x7a3   : > { %v5904_v57 = vadd.f32 %v2473_v0, %v2472_v10  ;;  %v2834_v11 = vrot.slane %v2670_v32, 7  ;;  %v2836_v2 = vrot.slane %v2671_v23, 6  ;;  %v2838_v3 = vrot.slane %v2672_v44, 5 }
 0x7a4   : > { %v2508_v24 = vmul.f32 %v6512_v48, %v5531_v53  ;;  %v2675_v16 = vmul.f32 %v5460_v22, %v5895_v1  ;;  %v2840_v34 = vrot.slane %v2673_v54, 4  ;;  %v2842_v39 = vrot.slane %v2674_v58, 3 }
 0x7a5   : > { %v6513_v25 = vunpack.c.h.bf16 %v5469_v21  ;;  %v2676_v49 = vmul.f32 %v5460_v22, %v5904_v57  ;;  %v2835_v51 = vsel %vm2758_vm8, %v2834_v11, %v2669_v28  ;;  %v6514_v42 = vunpack.c.l.bf16 %v5478_v9 }
 0x7a6   : > { %v6515_v50 = vunpack.c.h.bf16 %v5478_v9  ;;  %v2837_v61 = vsel %vm2761_vm9, %v2836_v2, %v2835_v51  ;;  %v2844_v10 = vrot.slane %v2675_v16, 2  ;;  %v6516_v21 = vunpack.c.l.bf16 %v5483_v29 }
 0x7a7   : > { %v2509_v26 = vmul.f32 %v6513_v25, %v5531_v53  ;;  %v2510_v37 = vmul.f32 %v6514_v42, %v5531_v53  ;;  %v6517_v0 = vunpack.c.h.bf16 %v5483_v29  ;;  %v2839_v28 = vsel %vm2764_vm10, %v2838_v3, %v2837_v61 }
 0x7a8   : > { %v2511_v60 = vmul.f32 %v6515_v50, %v5531_v53  ;;  %v2512_v8 = vmul.f32 %v6516_v21, %v5531_v53  ;;  %v2846_v23 = vrot.slane %v2676_v49, 1  ;;  %v6518_v44 = vunpack.c.l.bf16 %v5492_v15 }
 0x7a9   : > { %v2513_v32 = vmul.f32 %v6517_v0, %v5531_v53  ;;  %v6519_v9 = vunpack.c.h.bf16 %v5492_v15  ;;  %v2841_v48 = vsel %vm2767_vm11, %v2840_v34, %v2839_v28  ;;  %v2524_v11 = vrot.slane %v2508_v24, 4 }
 0x7aa   : > { %v2514_v54 = vmul.f32 %v6518_v44, %v5531_v53  ;;  %v2530_v2 = vrot.slane %v2509_v26, 4  ;;  %v2536_v16 = vrot.slane %v2510_v37, 4  ;;  %v2843_v25 = vsel %vm2770_vm12, %v2842_v39, %v2841_v48 }
 0x7ab   : > { %v2515_v58 = vmul.f32 %v6519_v9, %v5531_v53  ;;  %v2542_v29 = vrot.slane %v2511_v60, 4  ;;  %v2548_v51 = vrot.slane %v2512_v8, 4  ;;  %v2554_v42 = vrot.slane %v2513_v32, 4 }
 0x7ac   : > { %v2845_v3 = vsel %vm2773_vm13, %v2844_v10, %v2843_v25  ;;  %v2525_v49 = vadd.f32 %v2524_v11, %v2508_v24  ;;  %v2531_v50 = vadd.f32 %v2530_v2, %v2509_v26  ;;  %v2537_v61 = vadd.f32 %v2536_v16, %v2510_v37 }
 0x7ad   : > { %v2847_v21 = vsel %vm2776_vm14, %v2846_v23, %v2845_v3  ;;  %v2543_v0 = vadd.f32 %v2542_v29, %v2511_v60  ;;  %v2549_v15 = vadd.f32 %v2548_v51, %v2512_v8  ;;  %v2555_v44 = vadd.f32 %v2554_v42, %v2513_v32 }
 0x7ae   : > { %2894 = vadd.xlane.f32.xlu1 %v2847_v21  ;;  %v2526_v34 = vrot.slane %v2525_v49, 2  ;;  %v2532_v28 = vrot.slane %v2531_v50, 2  ;;  %v2538_v9 = vrot.slane %v2537_v61, 2  ;;  %v2560_v62 = vrot.slane %v2514_v54, 4 }
 0x7af   : > { %v2544_v18 = vrot.slane %v2543_v0, 2  ;;  %v2550_v39 = vrot.slane %v2549_v15, 2  ;;  %v2556_v48 = vrot.slane %v2555_v44, 2  ;;  %v2566_v56 = vrot.slane %v2515_v58, 4 }
 0x7b0   : > { %v2527_v12 = vadd.f32 %v2526_v34, %v2525_v49  ;;  %v2533_v46 = vadd.f32 %v2532_v28, %v2531_v50  ;;  %v2539_v10 = vadd.f32 %v2538_v9, %v2537_v61  ;;  %v2561_v24 = vadd.f32 %v2560_v62, %v2514_v54 }
 0x7b1   : > { %v2545_v26 = vadd.f32 %v2544_v18, %v2543_v0  ;;  %v2551_v37 = vadd.f32 %v2550_v39, %v2549_v15  ;;  %v2557_v11 = vadd.f32 %v2556_v48, %v2555_v44  ;;  %v2567_v23 = vadd.f32 %v2566_v56, %v2515_v58 }
 0x7b2   : > { %v2528_v60 = vrot.slane %v2527_v12, 1  ;;  %v2534_v8 = vrot.slane %v2533_v46, 1  ;;  %v2540_v32 = vrot.slane %v2539_v10, 1  ;;  %v2562_v2 = vrot.slane %v2561_v24, 2 }
 0x7b3   : > { %v2546_v16 = vrot.slane %v2545_v26, 1  ;;  %v2552_v25 = vrot.slane %v2551_v37, 1  ;;  %v2558_v29 = vrot.slane %v2557_v11, 1  ;;  %v2568_v51 = vrot.slane %v2567_v23, 2 }
 0x7b4   : > { %v5938_v42 = vadd.f32 %v2528_v60, %v2527_v12  ;;  %v5940_v3 = vadd.f32 %v2534_v8, %v2533_v46  ;;  %v5942_v49 = vadd.f32 %v2540_v32, %v2539_v10  ;;  %v2563_v50 = vadd.f32 %v2562_v2, %v2561_v24 }
 0x7b5   : > { %v5944_v62 = vadd.f32 %v2546_v16, %v2545_v26  ;;  %v5946_v18 = vadd.f32 %v2552_v25, %v2551_v37  ;;  %v5948_v56 = vadd.f32 %v2558_v29, %v2557_v11  ;;  %v2569_v54 = vadd.f32 %v2568_v51, %v2567_v23 }
 0x7b6   : > { %v2564_v58 = vrot.slane %v2563_v50, 1  ;;  %v2677_v61 = vmul.f32 %v5460_v22, %v5938_v42  ;;  %v2678_v12 = vmul.f32 %v5460_v22, %v5940_v3  ;;  %v2679_v46 = vmul.f32 %v5460_v22, %v5942_v49 }
 0x7b7   : > { %v2570_v21 = vrot.slane %v2569_v54, 1  ;;  %v2680_v0 = vmul.f32 %v5460_v22, %v5944_v62  ;;  %v2681_v15 = vmul.f32 %v5460_v22, %v5946_v18  ;;  %v2682_v44 = vmul.f32 %v5460_v22, %v5948_v56 }
 0x7b8   : > { %v5962_v34 = vadd.f32 %v2564_v58, %v2563_v50  ;;  %v2848_v28 = vrot.slane %v2678_v12, 7  ;;  %v2850_v9 = vrot.slane %v2679_v46, 6  ;;  %v6520_v39 = vunpack.c.l.bf16 %v5497_v13  ;;  %v6524_v50 = vld [vmem:[#allocation11_spill] sm:$0xff] }
 0x7b9   : > { %v5967_v10 = vadd.f32 %v2570_v21, %v2569_v54  ;;  %v2852_v24 = vrot.slane %v2680_v0, 5  ;;  %v2854_v26 = vrot.slane %v2681_v15, 4  ;;  %v2856_v37 = vrot.slane %v2682_v44, 3  ;;  %v6527_v21 = vld [vmem:[#allocation12_spill] sm:$0xff] }
 0x7ba   : > { %v2516_v48 = vmul.f32 %v6520_v39, %v5531_v53  ;;  %v2683_v11 = vmul.f32 %v5460_v22, %v5962_v34  ;;  %v2849_v23 = vsel %vm2758_vm8, %v2848_v28, %v2677_v61  ;;  %v6521_v60 = vunpack.c.h.bf16 %v5497_v13 }
 0x7bb   : > { %v6522_v32 = vunpack.c.l.bf16 %v5506_v17  ;;  %v2684_v16 = vmul.f32 %v5460_v22, %v5967_v10  ;;  %v2851_v25 = vsel %vm2761_vm9, %v2850_v9, %v2849_v23  ;;  %v6523_v29 = vunpack.c.h.bf16 %v5506_v17 }
 0x7bc   : > { %v2517_v8 = vmul.f32 %v6521_v60, %v5531_v53  ;;  %v6525_v54 = vunpack.c.l.bf16 %v6524_v50  ;;  %v2853_v13 = vsel %vm2764_vm10, %v2852_v24, %v2851_v25  ;;  %v2858_v61 = vrot.slane %v2683_v11, 2 }
 0x7bd   : > { %v2518_v2 = vmul.f32 %v6522_v32, %v5531_v53  ;;  %v2519_v51 = vmul.f32 %v6523_v29, %v5531_v53  ;;  %v6526_v12 = vunpack.c.h.bf16 %v6524_v50  ;;  %v6528_v0 = vunpack.c.l.bf16 %v6527_v21 }
 0x7be   : > { %v2520_v58 = vmul.f32 %v6525_v54, %v5531_v53  ;;  %v2855_v44 = vsel %vm2767_vm11, %v2854_v26, %v2853_v13  ;;  %v2860_v28 = vrot.slane %v2684_v16, 1  ;;  %v6529_v17 = vunpack.c.h.bf16 %v6527_v21 }
 0x7bf   : > { %v2521_v46 = vmul.f32 %v6526_v12, %v5531_v53  ;;  %v2522_v15 = vmul.f32 %v6528_v0, %v5531_v53  ;;  %v2572_v39 = vrot.slane %v2516_v48, 4  ;;  %v2857_v23 = vsel %vm2770_vm12, %v2856_v37, %v2855_v44 }
 0x7c0   : > { %v2523_v9 = vmul.f32 %v6529_v17, %v5531_v53  ;;  %v2578_v24 = vrot.slane %v2517_v8, 4  ;;  %v2584_v11 = vrot.slane %v2518_v2, 4  ;;  %v2590_v60 = vrot.slane %v2519_v51, 4 }
 0x7c1   : > { %v2859_v32 = vsel %vm2773_vm13, %v2858_v61, %v2857_v23  ;;  %v2573_v25 = vadd.f32 %v2572_v39, %v2516_v48  ;;  %v2596_v29 = vrot.slane %v2520_v58, 4  ;;  %v2602_v50 = vrot.slane %v2521_v46, 4 }
 0x7c2   : > { %v2861_v54 = vsel %vm2776_vm14, %v2860_v28, %v2859_v32  ;;  %v2579_v12 = vadd.f32 %v2578_v24, %v2517_v8  ;;  %v2585_v26 = vadd.f32 %v2584_v11, %v2518_v2  ;;  %v2591_v16 = vadd.f32 %v2590_v60, %v2519_v51 }
 0x7c3   : > { %2896 = vadd.xlane.f32.xlu0 %v2861_v54  ;;  %v2574_v13 = vrot.slane %v2573_v25, 2  ;;  %v2597_v21 = vadd.f32 %v2596_v29, %v2520_v58  ;;  %v2603_v53 = vadd.f32 %v2602_v50, %v2521_v46  ;;  %v2608_v0 = vrot.slane %v2522_v15, 4 }
 0x7c4   : > { %v2580_v17 = vrot.slane %v2579_v12, 2  ;;  %v2586_v37 = vrot.slane %v2585_v26, 2  ;;  %v2592_v44 = vrot.slane %v2591_v16, 2  ;;  %v2614_v19 = vrot.slane %v2523_v9, 4 }
 0x7c5   : > { %v2575_v4 = vadd.f32 %v2574_v13, %v2573_v25  ;;  %v2598_v59 = vrot.slane %v2597_v21, 2  ;;  %v2604_v61 = vrot.slane %v2603_v53, 2  ;;  %v2609_v48 = vadd.f32 %v2608_v0, %v2522_v15 }
 0x7c6   : > { %v2581_v39 = vadd.f32 %v2580_v17, %v2579_v12  ;;  %v2587_v23 = vadd.f32 %v2586_v37, %v2585_v26  ;;  %v2593_v33 = vadd.f32 %v2592_v44, %v2591_v16  ;;  %v2615_v28 = vadd.f32 %v2614_v19, %v2523_v9 }
 0x7c7   : > { %v2576_v8 = vrot.slane %v2575_v4, 1  ;;  %v2599_v2 = vadd.f32 %v2598_v59, %v2597_v21  ;;  %v2605_v51 = vadd.f32 %v2604_v61, %v2603_v53  ;;  %v2610_v24 = vrot.slane %v2609_v48, 2 }
 0x7c8   : > { %v2582_v11 = vrot.slane %v2581_v39, 1  ;;  %v2588_v58 = vrot.slane %v2587_v23, 1  ;;  %v2594_v46 = vrot.slane %v2593_v33, 1  ;;  %v2616_v60 = vrot.slane %v2615_v28, 2 }
 0x7c9   : > { %v6001_v32 = vadd.f32 %v2576_v8, %v2575_v4  ;;  %v2600_v29 = vrot.slane %v2599_v2, 1  ;;  %v2606_v50 = vrot.slane %v2605_v51, 1  ;;  %v2611_v25 = vadd.f32 %v2610_v24, %v2609_v48 }
 0x7ca   : > { %v6003_v54 = vadd.f32 %v2582_v11, %v2581_v39  ;;  %v6005_v15 = vadd.f32 %v2588_v58, %v2587_v23  ;;  %v6007_v12 = vadd.f32 %v2594_v46, %v2593_v33  ;;  %v2617_v19 = vadd.f32 %v2616_v60, %v2615_v28 }
 0x7cb   : > { %v6009_v9 = vadd.f32 %v2600_v29, %v2599_v2  ;;  %v6011_v59 = vadd.f32 %v2606_v50, %v2605_v51  ;;  %v2612_v26 = vrot.slane %v2611_v25, 1  ;;  %v2685_v33 = vmul.f32 %v5460_v22, %v6001_v32 }
 0x7cc   : > { %v2618_v16 = vrot.slane %v2617_v19, 1  ;;  %v2686_v4 = vmul.f32 %v5460_v22, %v6003_v54  ;;  %v2687_v13 = vmul.f32 %v5460_v22, %v6005_v15  ;;  %v2688_v21 = vmul.f32 %v5460_v22, %v6007_v12 }
 0x7cd   : > { %v6019_v53 = vadd.f32 %v2612_v26, %v2611_v25  ;;  %v2689_v0 = vmul.f32 %v5460_v22, %v6009_v9  ;;  %v2690_v37 = vmul.f32 %v5460_v22, %v6011_v59  ;;  %v3175_v25 = vrot.slane %v5879_v7, 6 }
 0x7ce   : > { %v2619_v17 = vadd.f32 %v2618_v16, %v2617_v19  ;;  %v2862_v44 = vrot.slane %v2686_v4, 7  ;;  %v2864_v61 = vrot.slane %v2687_v13, 6  ;;  %v2866_v28 = vrot.slane %v2688_v21, 5 }
 0x7cf   : > { %v2691_v48 = vmul.f32 %v5460_v22, %v6019_v53  ;;  %v2868_v2 = vrot.slane %v2689_v0, 4  ;;  %v2870_v24 = vrot.slane %v2690_v37, 3  ;;  %v3177_v26 = vrot.slane %v5881_v14, 5 }
 0x7d0   : > { %v2692_v39 = vmul.f32 %v5460_v22, %v2619_v17  ;;  %v2863_v23 = vsel %vm2758_vm8, %v2862_v44, %v2685_v33  ;;  %v3173_v22 = vrot.slane %v5877_v35, 7  ;;  %v3179_v4 = vrot.slane %v5883_v45, 4 }
 0x7d1   : > { %v2865_v8 = vsel %vm2761_vm9, %v2864_v61, %v2863_v23  ;;  %v2872_v58 = vrot.slane %v2691_v48, 2  ;;  %v3187_v13 = vrot.slane %v5940_v3, 7  ;;  %v3181_v33 = vrot.slane %v5885_v27, 3 }
 0x7d2   : > { %v2867_v51 = vsel %vm2764_vm10, %v2866_v28, %v2865_v8  ;;  %v2874_v60 = vrot.slane %v2692_v39, 1  ;;  %v3174_v19 = vsel %vm2758_vm8, %v3173_v22, %v5875_v30  ;;  %v3189_v0 = vrot.slane %v5942_v49, 6 }
 0x7d3   : > { %v2869_v11 = vsel %vm2767_vm11, %v2868_v2, %v2867_v51  ;;  %v3176_v16 = vsel %vm2761_vm9, %v3175_v25, %v3174_v19  ;;  %v3183_v7 = vrot.slane %v5895_v1, 2  ;;  %v3188_v30 = vsel %vm2758_vm8, %v3187_v13, %v5938_v42 }
 0x7d4   : > { %v2871_v46 = vsel %vm2770_vm12, %v2870_v24, %v2869_v11  ;;  %v3178_v21 = vsel %vm2764_vm10, %v3177_v26, %v3176_v16  ;;  %v3191_v14 = vrot.slane %v5944_v62, 5  ;;  %v3185_v45 = vrot.slane %v5904_v57, 1 }
 0x7d5   : > { %v2873_v29 = vsel %vm2773_vm13, %v2872_v58, %v2871_v46  ;;  %v3180_v35 = vsel %vm2767_vm11, %v3179_v4, %v3178_v21  ;;  %v3190_v3 = vsel %vm2761_vm9, %v3189_v0, %v3188_v30  ;;  %v3193_v44 = vrot.slane %v5946_v18, 4 }
 0x7d6   : > { %v2875_v50 = vsel %vm2776_vm14, %v2874_v60, %v2873_v29  ;;  %v3182_v37 = vsel %vm2770_vm12, %v3181_v33, %v3180_v35  ;;  %v3192_v49 = vsel %vm2764_vm10, %v3191_v14, %v3190_v3  ;;  %v3195_v61 = vrot.slane %v5948_v56, 3 }
 0x7d7   : > { %2898 = vadd.xlane.f32.xlu1 %v2875_v50  ;;  %v3184_v27 = vsel %vm2773_vm13, %v3183_v7, %v3182_v37  ;;  %v3201_v1 = vrot.slane %v6003_v54, 7  ;;  %v3194_v62 = vsel %vm2767_vm11, %v3193_v44, %v3192_v49  ;;  %v3197_v48 = vrot.slane %v5962_v34, 2 }
 0x7d8   : > { %v6062_v42 = vsel %vm2776_vm14, %v3185_v45, %v3184_v27  ;;  %v3203_v57 = vrot.slane %v6005_v15, 6  ;;  %v3196_v39 = vsel %vm2770_vm12, %v3195_v61, %v3194_v62  ;;  %v3199_v18 = vrot.slane %v5967_v10, 1 }
 0x7d9   : > { %v3202_v23 = vsel %vm2758_vm8, %v3201_v1, %v6001_v32  ;;  %v3205_v56 = vrot.slane %v6007_v12, 5  ;;  %v3198_v54 = vsel %vm2773_vm13, %v3197_v48, %v3196_v39  ;;  %v3207_v8 = vrot.slane %v6009_v9, 4  ;;  %v2887_v9 = vpop.xlane.xlu0 %2886 }
 0x7da   : > { %v3204_v28 = vsel %vm2761_vm9, %v3203_v57, %v3202_v23  ;;  %v6076_v2 = vsel %vm2776_vm14, %v3199_v18, %v3198_v54  ;;  %v3209_v15 = vrot.slane %v6011_v59, 3  ;;  %v3211_v51 = vrot.slane %v6019_v53, 2 }
 0x7db   : > { %v3206_v34 = vsel %vm2764_vm10, %v3205_v56, %v3204_v28  ;;  %v3213_v12 = vrot.slane %v2619_v17, 1  ;;  %v2916_v60 = vlaneseq  ;;  %v2901_v21 = vmul.f32 %v2887_v9, %v2887_v9 }
 0x7dc   : > { %v3208_v10 = vsel %vm2767_vm11, %v3207_v8, %v3206_v34 }
 0x7dd   : > { %v3210_v32 = vsel %vm2770_vm12, %v3209_v15, %v3208_v10  ;;  %v2917_v50 = vand.u32 127, %v2916_v60  ;;  %v2919_v59 = vshrl.u32 %v2916_v60, 7 }
 0x7de   : > { %v3212_v24 = vsel %vm2773_vm13, %v3211_v51, %v3210_v32 }
 0x7df   : > { %v6085_v11 = vsel %vm2776_vm14, %v3213_v12, %v3212_v24  ;;  %v2922_v25 = vadd.s32 4294967288, %v2917_v50  ;;  %v6089_v33 = vsub.s32 %v2917_v50, %v2919_v59  ;;  %v6107_v10 = vsub.s32 0, %v2919_v59 }
 0x7e0   : > { %v6109_v12 = vsub.s32 1, %v2919_v59 }
 0x7e1   : > { %v6087_v13 = vsub.s32 %v2922_v25, %v2919_v59 }
 0x7e3   : > { %v2926_v45 = vrot.slane %v2901_v21, %v6087_v13 }
 0x7e4   : > { %v2885_v58 = vpop.xlane.xlu1 %2884 }
 0x7e5   : > { %v2900_v0 = vmul.f32 %v2885_v58, %v2885_v58 }
 0x7e7   : > { %v2921_v3 = vrot.slane %v2900_v0, %v6089_v33  ;;  %v6116_v0 = vsub.s32 3, %v2919_v59 }
 0x7e9   : > { %v2928_v48 = vsel %vm2927_vm15, %v2926_v45, %v2921_v3  ;;  %v6531_v3 = vld [vmem:[#allocation13_spill] sm:$0xff] }
 0x7fa   : > { %v2889_v46 = vpop.xlane.xlu0 %2888 }
 0x7fb   : > { %v2902_v26 = vmul.f32 %v2889_v46, %v2889_v46 }
 0x7fd   : > { %v2932_v35 = vrot.slane %v2902_v26, %v6089_v33 }
 0x810   : > { %v2891_v29 = vpop.xlane.xlu1 %2890 }
 0x811   : > { %v2903_v53 = vmul.f32 %v2891_v29, %v2891_v29 }
 0x813   : > { %v2936_v7 = vrot.slane %v2903_v53, %v6087_v13  ;;  %v6113_v53 = vsub.s32 2, %v2919_v59 }
 0x815   : > { %v2937_v61 = vsel %vm2927_vm15, %v2936_v7, %v2932_v35 }
 0x816   : > { %v2956_v57 = vsel %vm2758_vm8, %v2937_v61, %v2928_v48  ;;  %v6534_v61 = vld [vmem:[#allocation28_spill] sm:$0xff] }
 0x825   : > { %v2893_v22 = vpop.xlane.xlu0 %2892 }
 0x826   : > { %v2904_v16 = vmul.f32 %v2893_v22, %v2893_v22 }
 0x828   : > { %v2941_v14 = vrot.slane %v2904_v16, %v6089_v33 }
 0x83b   : > { %v2895_v19 = vpop.xlane.xlu1 %2894 }
 0x83c   : > { %v2905_v4 = vmul.f32 %v2895_v19, %v2895_v19 }
 0x83e   : > { %v2945_v37 = vrot.slane %v2905_v4, %v6087_v13 }
 0x840   : > { %v2946_v1 = vsel %vm2927_vm15, %v2945_v37, %v2941_v14  ;;  %v3131_v14 = vrot.slane %v5688_v31, 7  ;;  %v3133_v37 = vrot.slane %v5690_v52, 6 }
 0x841   : > { %v2957_v18 = vsel %vm2761_vm9, %v2946_v1, %v2956_v57  ;;  %v3151_v1 = vrot.slane %v6534_v61, 4 }
 0x850   : > { %v2897_v17 = vpop.xlane.xlu0 %2896 }
 0x851   : > { %v2906_v30 = vmul.f32 %v2897_v17, %v2897_v17 }
 0x853   : > { %v2950_v27 = vrot.slane %v2906_v30, %v6089_v33  ;;  %v3117_v30 = vrot.slane %v5562_v63, 7 }
 0x864   : > { %v2899_v44 = vpop.xlane.xlu1 %2898 }
 0x865   : > { %v2907_v49 = vmul.f32 %v2899_v44, %v2899_v44 }
 0x867   : > { %v2954_v62 = vrot.slane %v2907_v49, %v6087_v13 }
 0x869   : > { %v2955_v39 = vsel %vm2927_vm15, %v2954_v62, %v2950_v27  ;;  %v6535_v62 = vld [vmem:[#allocation34_spill] sm:$0xff] }
 0x86a   : > { %v2958_v23 = vsel %vm2764_vm10, %v2955_v39, %v2957_v18  ;;  %v6536_v18 = vld [vmem:[#allocation32_spill] sm:$0xff] }
 0x86b   : > { %v2961_v56 = vsel %vm2960_vm1, %v2958_v23, 0.0 }
 0x86c   : > { %2962 = vadd.xlane.f32.xlu0 %v2961_v56  ;;  %v6537_v56 = vld [vmem:[#allocation14_spill] sm:$0xff] }
 0x8f9   : > { %v2963_v54 = vpop.xlane.xlu0 %2962 }
 0x8fa   : > { %v2964_v28 = vadd.f32 1e-16, %v2963_v54  ;;  %v2967_v8 = vadd.f32 1.0, %v2963_v54 }
 0x8fc   : > { %4652 = vrsqrt.f32 %v2964_v28  ;;  %v6538_v28 = vld [vmem:[#allocation19_spill] sm:$0xff] }
 0x8fd   : > { %4654 = vrcp.f32 %v2967_v8  ;;  %v3109_v8 = vrot.slane %v6538_v28, 4 }
 0x906   : > { %v4653_v34 = vpop.eup %4652 }
 0x907   : > { %v2966_v15 = vmul.f32 %v4653_v34, %v2963_v54  ;;  %v4655_v51 = vpop.eup %4654  ;;  %v3123_v54 = vrot.slane %v6537_v56, 4  ;;  %v6539_v34 = vld [vmem:[#allocation24_spill] sm:$0xff] }
 0x909   : > { %v2969_v32 = vmul.f32 %v4655_v51, %v2966_v15  ;;  %v3137_v15 = vrot.slane %v6539_v34, 4 }
 0x90b   : > { %v2974_v24 = vrot.slane %v2969_v32, %v6107_v10  ;;  %v2978_v25 = vrot.slane %v2969_v32, %v6109_v12  ;;  %v2982_v4 = vrot.slane %v2969_v32, %v6113_v53 }
 0x90d   : > { %v2992_v60 = vmul.f32 %v2974_v24, %v2887_v9  ;;  %v2991_v50 = vmul.f32 %v2974_v24, %v2885_v58  ;;  %v2993_v26 = vmul.f32 %v2978_v25, %v2889_v46  ;;  %v2994_v16 = vmul.f32 %v2978_v25, %v2891_v29 }
 0x90e   : > { %v2995_v21 = vmul.f32 %v2982_v4, %v2893_v22  ;;  %v2996_v35 = vmul.f32 %v2982_v4, %v2895_v19  ;;  %v2986_v9 = vrot.slane %v2969_v32, %v6116_v0  ;;  %v3145_v46 = vrot.slane %v5751_v55, 7  ;;  %v6540_v32 = vld [vmem:[#allocation15_spill] sm:$0xff] }
 0x90f   : > { %3006 = vperm.xlu0 %4545, %v2992_v60   ;;  %3001 = vperm.xlu1 %4544, %v2991_v50   ;;  %v3103_v29 = vrot.slane %v5625_v5, 7  ;;  %v3147_v22 = vrot.slane %v5753_v36, 6  ;;  %v3119_v19 = vrot.slane %v5564_v20, 6  ;;  %v3118_v55 = vsel %vm2758_vm8, %v3117_v30, %v5560_v40  ;;  %v6541_v50 = vld [vmem:[#allocation29_spill] sm:$0xff]  ;;  %v6544_v30 = vld [vmem:[#allocation35_spill] sm:$0xff] }
 0x910   : > { %v2997_v58 = vmul.f32 %v2986_v9, %v2897_v17  ;;  %v2998_v7 = vmul.f32 %v2986_v9, %v2899_v44  ;;  %v3146_v59 = vsel %vm2758_vm8, %v3145_v46, %v5749_v41  ;;  %v3105_v17 = vrot.slane %v5627_v6, 6  ;;  %v6530_v41 = vld [vmem:[#allocation33_spill] sm:$0xff]  ;;  %v6532_v44 = vld [vmem:[#allocation18_spill] sm:$0xff] }
 0x911   : > { %v3104_v63 = vsel %vm2758_vm8, %v3103_v29, %v5623_v38  ;;  %v3132_v5 = vsel %vm2758_vm8, %v3131_v14, %v5686_v47  ;;  %v3148_v31 = vsel %vm2761_vm9, %v3147_v22, %v3146_v59  ;;  %v3149_v36 = vrot.slane %v5755_v43, 5  ;;  %v6533_v38 = vld [vmem:[#allocation23_spill] sm:$0xff]  ;;  %v6545_v14 = vld [vmem:[#allocation16_spill] sm:$0xff]  ;;  %v6546_v59 = vld [vmem:[#allocation30_spill] sm:$0xff] }
 0x912   : > { %v3159_v45 = vrot.slane %v6530_v41, 7  ;;  %v3120_v20 = vsel %vm2761_vm9, %v3119_v19, %v3118_v55  ;;  %v3106_v6 = vsel %vm2761_vm9, %v3105_v17, %v3104_v63  ;;  %v3134_v52 = vsel %vm2761_vm9, %v3133_v37, %v3132_v5  ;;  %v6548_v41 = vld [vmem:[#allocation26_spill] sm:$0xff] }
 0x913   : > { %3011 = vperm.xlu1 %4544, %v2993_v26   ;;  %v3121_v40 = vrot.slane %v6531_v3, 5  ;;  %v3107_v27 = vrot.slane %v6532_v44, 5  ;;  %v3135_v49 = vrot.slane %v6533_v38, 5  ;;  %v3150_v47 = vsel %vm2764_vm10, %v3149_v36, %v3148_v31  ;;  %v6547_v31 = vld [vmem:[#allocation21_spill] sm:$0xff]  ;;  %v6551_v44 = vld [vmem:[#allocation31_spill] sm:$0xff] }
 0x914   : > { %v3161_v43 = vrot.slane %v6535_v62, 6  ;;  %v3160_v23 = vsel %vm2758_vm8, %v3159_v45, %v6536_v18  ;;  %v3152_v51 = vsel %vm2767_vm11, %v3151_v1, %v3150_v47  ;;  %v3125_v24 = vrot.slane %v6540_v32, 3  ;;  %v6550_v3 = vld [vmem:[#allocation17_spill] sm:$0xff]  ;;  %v6552_v62 = vld [vmem:[#allocation22_spill] sm:$0xff] }
 0x915   : > { %v3122_v48 = vsel %vm2764_vm10, %v3121_v40, %v3120_v20  ;;  %v3108_v57 = vsel %vm2764_vm10, %v3107_v27, %v3106_v6  ;;  %v3136_v39 = vsel %vm2764_vm10, %v3135_v49, %v3134_v52  ;;  %v3153_v25 = vrot.slane %v6541_v50, 3  ;;  %v6549_v6 = vld [vmem:[#allocation36_spill] sm:$0xff]  ;;  %v6555_v50 = vld [vmem:[#allocation38_spill] sm:$0xff] }
 0x916   : > { %v3124_v26 = vsel %vm2767_vm11, %v3123_v54, %v3122_v48  ;;  %v3138_v4 = vsel %vm2767_vm11, %v3137_v15, %v3136_v39  ;;  %v3163_v29 = vrot.slane %v6544_v30, 5  ;;  %v3127_v22 = vrot.slane %v6545_v14, 2  ;;  %v6553_v48 = vld [vmem:[#allocation27_spill] sm:$0xff] }
 0x917   : > { %3016 = vperm.xlu1 %4544, %v2994_v16   ;;  %v3110_v16 = vsel %vm2767_vm11, %v3109_v8, %v3108_v57  ;;  %v3154_v46 = vsel %vm2770_vm12, %v3153_v25, %v3152_v51  ;;  %v3155_v19 = vrot.slane %v6546_v59, 2  ;;  %v3126_v17 = vsel %vm2770_vm12, %v3125_v24, %v3124_v26 }
 0x918   : > { %v3113_v36 = vrot.slane %v6547_v31, 2  ;;  %v3141_v45 = vrot.slane %v6548_v41, 2  ;;  %v3165_v52 = vrot.slane %v6549_v6, 4  ;;  %v3129_v40 = vrot.slane %v6550_v3, 1 }
 0x919   : > { %v3156_v20 = vsel %vm2773_vm13, %v3155_v19, %v3154_v46  ;;  %v3157_v27 = vrot.slane %v6551_v44, 1  ;;  %v3128_v38 = vsel %vm2773_vm13, %v3127_v22, %v3126_v17  ;;  %v3143_v57 = vrot.slane %v6553_v48, 1 }
 0x91a   : > { %v6190_v28 = vsel %vm2776_vm14, %v3129_v40, %v3128_v38  ;;  %v3169_v25 = vrot.slane %v6555_v50, 2 }
 0x91b   : > { %3021 = vperm.xlu1 %4544, %v2995_v21   ;;  %v3162_v21 = vsel %vm2761_vm9, %v3161_v43, %v3160_v23  ;;  %v3115_v43 = vrot.slane %v6552_v62, 1  ;;  %v6185_v39 = vsel %vm2776_vm14, %v3157_v27, %v3156_v20  ;;  %v6554_v23 = vld [vmem:[#allocation37_spill] sm:$0xff] }
 0x91c   : > { %v3164_v5 = vsel %vm2764_vm10, %v3163_v29, %v3162_v21  ;;  %v3167_v56 = vrot.slane %v6554_v23, 3  ;;  %v6556_v21 = vld [vmem:[#allocation39_spill] sm:$0xff] }
 0x91d   : > { %v3166_v61 = vsel %vm2767_vm11, %v3165_v52, %v3164_v5 }
 0x91e   : > { %v3168_v15 = vsel %vm2770_vm12, %v3167_v56, %v3166_v61 }
 0x91f   : > { %3026 = vperm.xlu1 %4544, %v2996_v35   ;;  %v6542_v35 = vld [vmem:[#allocation20_spill] sm:$0xff] }
 0x920   : > { %v3111_v9 = vrot.slane %v6542_v35, 3  ;;  %v3171_v35 = vrot.slane %v6556_v21, 1 }
 0x922   : > { %v3112_v37 = vsel %vm2770_vm12, %v3111_v9, %v3110_v16 }
 0x923   : > { %3031 = vperm.xlu1 %4544, %v2997_v58   ;;  %v6543_v58 = vld [vmem:[#allocation25_spill] sm:$0xff]  ;;  %v3114_v49 = vsel %vm2773_vm13, %v3113_v36, %v3112_v37 }
 0x924   : > { %v6193_v8 = vsel %vm2776_vm14, %v3115_v43, %v3114_v49 }
 0x927   : > { %3036 = vperm.xlu1 %4544, %v2998_v7   ;;  %v3139_v7 = vrot.slane %v6543_v58, 3 }
 0x929   : > { %v3140_v55 = vsel %vm2770_vm12, %v3139_v7, %v3138_v4  ;;  %v3170_v4 = vsel %vm2773_vm13, %v3169_v25, %v3168_v15 }
 0x92a   : > { %v3142_v47 = vsel %vm2773_vm13, %v3141_v45, %v3140_v55  ;;  %v6206_v58 = vsel %vm2776_vm14, %v3171_v35, %v3170_v4 }
 0x92b   : > { %v6196_v34 = vsel %vm2776_vm14, %v3143_v57, %v3142_v47 }
 0x98e   : > { %v3002_v60 = vpop.permute.xlu1 %3001  ;;  %v3007_v1 = vpop.permute.xlu0 %3006 }
 0x98f   : > { %v3224_v51 = vmul.f32 %v6190_v28, %v3007_v1  ;;  %v3223_v32 = vmul.f32 %v6193_v8, %v3002_v60 }
 0x991   : > { %v3231_v9 = vadd.f32 %v3224_v51, %v3223_v32 }
 0x992   : > { %v3012_v63 = vpop.permute.xlu1 %3011 }
 0x993   : > { %v3225_v24 = vmul.f32 %v6196_v34, %v3012_v63  ;;  %v3232_v29 = vrot.slane %v3231_v9, 4 }
 0x995   : > { %v3233_v17 = vadd.f32 %v3232_v29, %v3231_v9 }
 0x996   : > { %v3017_v18 = vpop.permute.xlu1 %3016 }
 0x997   : > { %v3226_v54 = vmul.f32 %v6185_v39, %v3017_v18  ;;  %v3234_v36 = vrot.slane %v3233_v17, 2 }
 0x999   : > { %v3238_v16 = vadd.f32 %v3226_v54, %v3225_v24  ;;  %v3235_v52 = vadd.f32 %v3234_v36, %v3233_v17 }
 0x99a   : > { %v3022_v26 = vpop.permute.xlu1 %3021 }
 0x99b   : > { %v3239_v46 = vrot.slane %v3238_v16, 4  ;;  %v3227_v30 = vmul.f32 %v6206_v58, %v3022_v26  ;;  %v3236_v38 = vrot.slane %v3235_v52, 1 }
 0x99d   : > { %v3240_v59 = vadd.f32 %v3239_v46, %v3238_v16  ;;  %v6214_v62 = vadd.f32 %v3236_v38, %v3235_v52 }
 0x99e   : > { %v3027_v7 = vpop.permute.xlu1 %3026 }
 0x99f   : > { %v3228_v60 = vmul.f32 %v6062_v42, %v3027_v7  ;;  %v3241_v63 = vrot.slane %v3240_v59, 2 }
 0x9a1   : > { %v3245_v14 = vadd.f32 %v3228_v60, %v3227_v30  ;;  %v3242_v20 = vadd.f32 %v3241_v63, %v3240_v59 }
 0x9a2   : > { %v3032_v22 = vpop.permute.xlu1 %3031 }
 0x9a3   : > { %v3246_v19 = vrot.slane %v3245_v14, 4  ;;  %v3229_v5 = vmul.f32 %v6076_v2, %v3032_v22  ;;  %v3243_v44 = vrot.slane %v3242_v20, 1 }
 0x9a5   : > { %v3247_v37 = vadd.f32 %v3246_v19, %v3245_v14  ;;  %v6212_v61 = vadd.f32 %v3243_v44, %v3242_v20 }
 0x9a6   : > { %v3037_v55 = vpop.permute.xlu1 %3036 }
 0x9a7   : > { %v3230_v31 = vmul.f32 %v6085_v11, %v3037_v55  ;;  %v3248_v41 = vrot.slane %v3247_v37, 2  ;;  %v3263_v57 = vmax.f32 %v6214_v62, %v6212_v61 }
 0x9a9   : > { %v3252_v45 = vadd.f32 %v3230_v31, %v3229_v5  ;;  %v3249_v3 = vadd.f32 %v3248_v41, %v3247_v37 }
 0x9ab   : > { %v3253_v6 = vrot.slane %v3252_v45, 4  ;;  %v3250_v49 = vrot.slane %v3249_v3, 1 }
 0x9ad   : > { %v3254_v40 = vadd.f32 %v3253_v6, %v3252_v45  ;;  %v6216_v43 = vadd.f32 %v3250_v49, %v3249_v3 }
 0x9af   : > { %v3255_v27 = vrot.slane %v3254_v40, 2 }
 0x9b1   : > { %v3256_v47 = vadd.f32 %v3255_v27, %v3254_v40 }
 0x9b3   : > { %v3257_v1 = vrot.slane %v3256_v47, 1 }
 0x9b5   : > { %v6218_v48 = vadd.f32 %v3257_v1, %v3256_v47 }
 0x9b7   : > { %v3264_v18 = vmax.f32 %v6216_v43, %v6218_v48 }
 0x9b9   : > { %v3265_v23 = vmax.f32 %v3263_v57, %v3264_v18 }
 0x9bb   : > { %v3267_v56 = vsub.f32 %v6212_v61, %v3265_v23  ;;  %v3268_v54 = vsub.f32 %v6216_v43, %v3265_v23  ;;  %v3269_v15 = vsub.f32 %v6218_v48, %v3265_v23  ;;  %v3266_v51 = vsub.f32 %v6214_v62, %v3265_v23 }
 0x9bd   : > { %v3272_v32 = vmul.f32 1.442695, %v3267_v56  ;;  %v3274_v24 = vmul.f32 1.442695, %v3268_v54  ;;  %v3276_v50 = vmul.f32 1.442695, %v3269_v15 }
 0x9be   : > { %v3270_v25 = vmul.f32 1.442695, %v3266_v51 }
 0x9bf   : > { %4656 = vpow2.f32 %v3272_v32 }
 0x9c0   : > { %4658 = vpow2.f32 %v3274_v24 }
 0x9c1   : > { %4660 = vpow2.f32 %v3276_v50 }
 0x9c2   : > { %4662 = vpow2.f32 %v3270_v25 }
 0x9c9   : > { %v4657_v26 = vpop.eup %4656 }
 0x9ca   : > { %v4659_v16 = vpop.eup %4658  ;;  %v3282_v4 = vrot.slane %v4657_v26, 7 }
 0x9cb   : > { %v4661_v21 = vpop.eup %4660  ;;  %v3284_v35 = vrot.slane %v4659_v16, 6 }
 0x9cc   : > { %v4663_v9 = vpop.eup %4662  ;;  %v3286_v7 = vrot.slane %v4661_v21, 5 }
 0x9cd   : > { %v3283_v46 = vsel %vm2758_vm8, %v3282_v4, %v4663_v9 }
 0x9ce   : > { %v3285_v30 = vsel %vm2761_vm9, %v3284_v35, %v3283_v46 }
 0x9cf   : > { %v3287_v60 = vsel %vm2764_vm10, %v3286_v7, %v3285_v30 }
 0x9d0   : > { %v3289_v29 = vsel %vm581_vm0, %v3287_v60, 0.0 }
 0x9d1   : > { %v3290_v14 = vrot.slane %v3289_v29, 4 }
 0x9d3   : > { %v3291_v22 = vadd.f32 %v3290_v14, %v3289_v29 }
 0x9d5   : > { %v3292_v59 = vrot.slane %v3291_v22, 2 }
 0x9d7   : > { %v3293_v19 = vadd.f32 %v3292_v59, %v3291_v22 }
 0x9d9   : > { %v3294_v17 = vrot.slane %v3293_v19, 1 }
 0x9db   : > { %v3295_v37 = vadd.f32 %v3294_v17, %v3293_v19 }
 0x9dd   : > { %v3299_v55 = vrot.slane %v3295_v37, %v6107_v10 }
 0x9df   : > { %4664 = vrcp.f32 %v3299_v55 }
 0x9e9   : > { %v4665_v63 = vpop.eup %4664 }
 0x9ea   : > { %v3301_v5 = vmul.f32 %v4665_v63, %v4663_v9  ;;  %v3302_v31 = vmul.f32 %v4665_v63, %v4657_v26  ;;  %v3303_v6 = vmul.f32 %v4665_v63, %v4659_v16  ;;  %v3304_v44 = vmul.f32 %v4665_v63, %v4661_v21 }
 0x9ec   : > { %v3308_v36 = vrot.slane %v3301_v5, %v6107_v10  ;;  %v3312_v20 = vrot.slane %v3302_v31, %v6107_v10  ;;  %v3316_v40 = vrot.slane %v3303_v6, %v6107_v10  ;;  %v3320_v49 = vrot.slane %v3304_v44, %v6107_v10 }
 0x9ee   : > { %v3322_v41 = vmul.f32 %v3308_v36, %v6190_v28  ;;  %v3321_v45 = vmul.f32 %v3308_v36, %v6193_v8  ;;  %v3324_v52 = vmul.f32 %v3312_v20, %v6185_v39  ;;  %v3323_v3 = vmul.f32 %v3312_v20, %v6196_v34 }
 0x9ef   : > { %v3326_v27 = vmul.f32 %v3316_v40, %v6062_v42  ;;  %v3325_v38 = vmul.f32 %v3316_v40, %v6206_v58  ;;  %v3328_v47 = vmul.f32 %v3320_v49, %v6085_v11  ;;  %v3327_v1 = vmul.f32 %v3320_v49, %v6076_v2 }
 0x9f0   : > { %3331 = vadd.xlane.f32.xlu0 %v3322_v41  ;;  %3329 = vadd.xlane.f32.xlu1 %v3321_v45 }
 0x9f4   : > { %3335 = vadd.xlane.f32.xlu0 %v3324_v52  ;;  %3333 = vadd.xlane.f32.xlu1 %v3323_v3 }
 0x9f8   : > { %3339 = vadd.xlane.f32.xlu0 %v3326_v27  ;;  %3337 = vadd.xlane.f32.xlu1 %v3325_v38 }
 0x9fc   : > { %3343 = vadd.xlane.f32.xlu0 %v3328_v47  ;;  %3341 = vadd.xlane.f32.xlu1 %v3327_v1 }
 0xa7d   : > { %v3332_v57 = vpop.xlane.xlu0 %3331  ;;  %v3330_v18 = vpop.xlane.xlu1 %3329 }
 0xa7e   : > { %v3346_v51 = vmul.f32 %v3332_v57, %v3332_v57  ;;  %v3345_v32 = vmul.f32 %v3330_v18, %v3330_v18 }
 0xa80   : > { %v3368_v21 = vrot.slane %v3346_v51, %v6087_v13  ;;  %v3364_v35 = vrot.slane %v3345_v32, %v6089_v33 }
 0xa81   : > { %v3336_v23 = vpop.xlane.xlu0 %3335  ;;  %v3334_v56 = vpop.xlane.xlu1 %3333 }
 0xa82   : > { %v3348_v54 = vmul.f32 %v3336_v23, %v3336_v23  ;;  %v3347_v15 = vmul.f32 %v3334_v56, %v3334_v56  ;;  %v3369_v59 = vsel %vm2927_vm15, %v3368_v21, %v3364_v35 }
 0xa84   : > { %v3377_v25 = vrot.slane %v3348_v54, %v6087_v13  ;;  %v3373_v26 = vrot.slane %v3347_v15, %v6089_v33 }
 0xa85   : > { %v3340_v24 = vpop.xlane.xlu0 %3339  ;;  %v3338_v50 = vpop.xlane.xlu1 %3337 }
 0xa86   : > { %v3350_v16 = vmul.f32 %v3340_v24, %v3340_v24  ;;  %v3349_v4 = vmul.f32 %v3338_v50, %v3338_v50  ;;  %v3378_v60 = vsel %vm2927_vm15, %v3377_v25, %v3373_v26 }
 0xa87   : > { %v3397_v37 = vsel %vm2758_vm8, %v3378_v60, %v3369_v59 }
 0xa88   : > { %v3386_v9 = vrot.slane %v3350_v16, %v6087_v13  ;;  %v3382_v7 = vrot.slane %v3349_v4, %v6089_v33 }
 0xa89   : > { %v3344_v46 = vpop.xlane.xlu0 %3343  ;;  %v3342_v30 = vpop.xlane.xlu1 %3341 }
 0xa8a   : > { %v3352_v29 = vmul.f32 %v3344_v46, %v3344_v46  ;;  %v3351_v14 = vmul.f32 %v3342_v30, %v3342_v30  ;;  %v3387_v22 = vsel %vm2927_vm15, %v3386_v9, %v3382_v7 }
 0xa8b   : > { %v3398_v63 = vsel %vm2761_vm9, %v3387_v22, %v3397_v37 }
 0xa8c   : > { %v3395_v19 = vrot.slane %v3352_v29, %v6087_v13  ;;  %v3391_v17 = vrot.slane %v3351_v14, %v6089_v33 }
 0xa8e   : > { %v3396_v55 = vsel %vm2927_vm15, %v3395_v19, %v3391_v17 }
 0xa8f   : > { %v3399_v5 = vsel %vm2764_vm10, %v3396_v55, %v3398_v63 }
 0xa90   : > { %v3401_v31 = vsel %vm2960_vm1, %v3399_v5, 0.0 }
 0xa91   : > { %3402 = vadd.xlane.f32.xlu1 %v3401_v31 }
 0xb1e   : > { %v3403_v36 = vpop.xlane.xlu1 %3402 }
 0xb1f   : > { %v3404_v41 = vadd.f32 1e-16, %v3403_v36  ;;  %v3407_v45 = vadd.f32 1.0, %v3403_v36 }
 0xb21   : > { %4666 = vrsqrt.f32 %v3404_v41 }
 0xb22   : > { %4668 = vrcp.f32 %v3407_v45 }
 0xb2b   : > { %v4667_v20 = vpop.eup %4666 }
 0xb2c   : > { %v3406_v6 = vmul.f32 %v4667_v20, %v3403_v36  ;;  %v4669_v52 = vpop.eup %4668 }
 0xb2e   : > { %v3409_v3 = vmul.f32 %v4669_v52, %v3406_v6 }
 0xb30   : > { %v3414_v40 = vrot.slane %v3409_v3, %v6107_v10  ;;  %v3418_v38 = vrot.slane %v3409_v3, %v6109_v12  ;;  %v3422_v1 = vrot.slane %v3409_v3, %v6113_v53  ;;  %v3426_v51 = vrot.slane %v3409_v3, %v6116_v0 }
 0xb32   : > { %v3432_v44 = vmul.f32 %v3414_v40, %v3332_v57  ;;  %v3431_v27 = vmul.f32 %v3414_v40, %v3330_v18  ;;  %v3433_v49 = vmul.f32 %v3418_v38, %v3334_v56  ;;  %v3434_v47 = vmul.f32 %v3418_v38, %v3336_v23 }
 0xb33   : > { %v3435_v54 = vmul.f32 %v3422_v1, %v3338_v50  ;;  %v3436_v15 = vmul.f32 %v3422_v1, %v3340_v24  ;;  %v3437_v32 = vmul.f32 %v3426_v51, %v3342_v30  ;;  %v3438_v25 = vmul.f32 %v3426_v51, %v3344_v46 }
 0xb34   : > { %3446 = vperm.xlu1 %4544, %v3432_v44   ;;  %3441 = vperm.xlu0 %4545, %v3431_v27  }
 0xb38   : > { %3451 = vperm.xlu1 %4544, %v3433_v49   ;;  %3456 = vperm.xlu0 %4545, %v3434_v47  }
 0xb3c   : > { %3461 = vperm.xlu1 %4544, %v3435_v54   ;;  %3466 = vperm.xlu0 %4545, %v3436_v15  }
 0xb40   : > { %3471 = vperm.xlu1 %4544, %v3437_v32   ;;  %3476 = vperm.xlu0 %4545, %v3438_v25  }
 0xbb3   : > { %v3447_v57 = vpop.permute.xlu1 %3446  ;;  %v3442_v18 = vpop.permute.xlu0 %3441 }
 0xbb4   : > { %v3480_v26 = vmul.f32 %v3447_v57, %v6190_v28  ;;  %v3479_v23 = vmul.f32 %v3442_v18, %v6193_v8 }
 0xbb6   : > { %v3487_v56 = vadd.f32 %v3480_v26, %v3479_v23 }
 0xbb7   : > { %v3452_v16 = vpop.permute.xlu1 %3451  ;;  %v3457_v4 = vpop.permute.xlu0 %3456 }
 0xbb8   : > { %v3481_v50 = vmul.f32 %v3452_v16, %v6196_v34  ;;  %v3482_v24 = vmul.f32 %v3457_v4, %v6185_v39  ;;  %v3488_v21 = vrot.slane %v3487_v56, 4 }
 0xbba   : > { %v3494_v35 = vadd.f32 %v3482_v24, %v3481_v50  ;;  %v3489_v29 = vadd.f32 %v3488_v21, %v3487_v56 }
 0xbbb   : > { %v3462_v9 = vpop.permute.xlu1 %3461  ;;  %v3467_v7 = vpop.permute.xlu0 %3466 }
 0xbbc   : > { %v3495_v46 = vrot.slane %v3494_v35, 4  ;;  %v3483_v30 = vmul.f32 %v3462_v9, %v6206_v58  ;;  %v3484_v60 = vmul.f32 %v3467_v7, %v6062_v42  ;;  %v3490_v63 = vrot.slane %v3489_v29, 2 }
 0xbbe   : > { %v3496_v14 = vadd.f32 %v3495_v46, %v3494_v35  ;;  %v3501_v22 = vadd.f32 %v3484_v60, %v3483_v30  ;;  %v3491_v20 = vadd.f32 %v3490_v63, %v3489_v29 }
 0xbbf   : > { %v3472_v59 = vpop.permute.xlu1 %3471  ;;  %v3477_v19 = vpop.permute.xlu0 %3476 }
 0xbc0   : > { %v3497_v17 = vrot.slane %v3496_v14, 2  ;;  %v3502_v37 = vrot.slane %v3501_v22, 4  ;;  %v3485_v55 = vmul.f32 %v3472_v59, %v6076_v2  ;;  %v3486_v5 = vmul.f32 %v3477_v19, %v6085_v11 }
 0xbc1   : > { %v3492_v44 = vrot.slane %v3491_v20, 1 }
 0xbc2   : > { %v3503_v31 = vadd.f32 %v3502_v37, %v3501_v22  ;;  %v3498_v36 = vadd.f32 %v3497_v17, %v3496_v14  ;;  %v3508_v41 = vadd.f32 %v3486_v5, %v3485_v55 }
 0xbc3   : > { %v3493_v1 = vadd.f32 %v3492_v44, %v3491_v20 }
 0xbc4   : > { %v3504_v45 = vrot.slane %v3503_v31, 2  ;;  %v3509_v6 = vrot.slane %v3508_v41, 4  ;;  %v3499_v3 = vrot.slane %v3498_v36, 1 }
 0xbc5   : > { %v3515_v25 = vadd.f32 %v3493_v1, %v6214_v62 }
 0xbc6   : > { %v3505_v52 = vadd.f32 %v3504_v45, %v3503_v31  ;;  %v3510_v40 = vadd.f32 %v3509_v6, %v3508_v41  ;;  %v3500_v49 = vadd.f32 %v3499_v3, %v3498_v36 }
 0xbc8   : > { %v3506_v27 = vrot.slane %v3505_v52, 1  ;;  %v3511_v38 = vrot.slane %v3510_v40, 2  ;;  %v3516_v51 = vadd.f32 %v3500_v49, %v6212_v61 }
 0xbca   : > { %v3512_v47 = vadd.f32 %v3511_v38, %v3510_v40  ;;  %v3507_v54 = vadd.f32 %v3506_v27, %v3505_v52  ;;  %v3519_v26 = vmax.f32 %v3515_v25, %v3516_v51 }
 0xbcc   : > { %v3513_v15 = vrot.slane %v3512_v47, 1  ;;  %v3517_v57 = vadd.f32 %v3507_v54, %v6216_v43 }
 0xbce   : > { %v3514_v32 = vadd.f32 %v3513_v15, %v3512_v47 }
 0xbd0   : > { %v3518_v18 = vadd.f32 %v3514_v32, %v6218_v48 }
 0xbd2   : > { %v3520_v23 = vmax.f32 %v3517_v57, %v3518_v18 }
 0xbd4   : > { %v3521_v56 = vmax.f32 %v3519_v26, %v3520_v23 }
 0xbd6   : > { %v3523_v16 = vsub.f32 %v3516_v51, %v3521_v56  ;;  %v3524_v4 = vsub.f32 %v3517_v57, %v3521_v56  ;;  %v3525_v50 = vsub.f32 %v3518_v18, %v3521_v56  ;;  %v3522_v24 = vsub.f32 %v3515_v25, %v3521_v56 }
 0xbd8   : > { %v3528_v21 = vmul.f32 1.442695, %v3523_v16  ;;  %v3530_v35 = vmul.f32 1.442695, %v3524_v4  ;;  %v3532_v9 = vmul.f32 1.442695, %v3525_v50 }
 0xbd9   : > { %v3526_v7 = vmul.f32 1.442695, %v3522_v24 }
 0xbda   : > { %4670 = vpow2.f32 %v3528_v21 }
 0xbdb   : > { %4672 = vpow2.f32 %v3530_v35 }
 0xbdc   : > { %4674 = vpow2.f32 %v3532_v9 }
 0xbdd   : > { %4676 = vpow2.f32 %v3526_v7 }
 0xbe4   : > { %v4671_v61 = vpop.eup %4670 }
 0xbe5   : > { %v4673_v62 = vpop.eup %4672  ;;  %v3538_v43 = vrot.slane %v4671_v61, 7 }
 0xbe6   : > { %v4675_v46 = vpop.eup %4674  ;;  %v3540_v48 = vrot.slane %v4673_v62, 6 }
 0xbe7   : > { %v4677_v30 = vpop.eup %4676  ;;  %v3542_v60 = vrot.slane %v4675_v46, 5 }
 0xbe8   : > { %v3539_v29 = vsel %vm2758_vm8, %v3538_v43, %v4677_v30 }
 0xbe9   : > { %v3541_v14 = vsel %vm2761_vm9, %v3540_v48, %v3539_v29 }
 0xbea   : > { %v3543_v22 = vsel %vm2764_vm10, %v3542_v60, %v3541_v14 }
 0xbeb   : > { %v3545_v59 = vsel %vm581_vm0, %v3543_v22, 0.0 }
 0xbec   : > { %v3546_v19 = vrot.slane %v3545_v59, 4 }
 0xbee   : > { %v3547_v17 = vadd.f32 %v3546_v19, %v3545_v59 }
 0xbf0   : > { %v3548_v37 = vrot.slane %v3547_v17, 2 }
 0xbf2   : > { %v3549_v55 = vadd.f32 %v3548_v37, %v3547_v17 }
 0xbf4   : > { %v3550_v63 = vrot.slane %v3549_v55, 1 }
 0xbf6   : > { %v3551_v5 = vadd.f32 %v3550_v63, %v3549_v55 }
 0xbf8   : > { %v3555_v31 = vrot.slane %v3551_v5, %v6107_v10 }
 0xbfa   : > { %4678 = vrcp.f32 %v3555_v31 }
 0xc04   : > { %v4679_v36 = vpop.eup %4678 }
 0xc05   : > { %v3557_v41 = vmul.f32 %v4679_v36, %v4677_v30  ;;  %v3558_v45 = vmul.f32 %v4679_v36, %v4671_v61  ;;  %v3559_v40 = vmul.f32 %v4679_v36, %v4673_v62  ;;  %v3560_v49 = vmul.f32 %v4679_v36, %v4675_v46 }
 0xc07   : > { %v3564_v20 = vrot.slane %v3557_v41, %v6107_v10  ;;  %v3568_v3 = vrot.slane %v3558_v45, %v6107_v10  ;;  %v3572_v38 = vrot.slane %v3559_v40, %v6107_v10 }
 0xc09   : > { %v3578_v6 = vmul.f32 %v3564_v20, %v6190_v28  ;;  %v3577_v52 = vmul.f32 %v3564_v20, %v6193_v8  ;;  %v3579_v44 = vmul.f32 %v3568_v3, %v6196_v34  ;;  %v3580_v27 = vmul.f32 %v3568_v3, %v6185_v39 }
 0xc0a   : > { %v3581_v47 = vmul.f32 %v3572_v38, %v6206_v58  ;;  %v3582_v28 = vmul.f32 %v3572_v38, %v6062_v42  ;;  %v3576_v8 = vrot.slane %v3560_v49, %v6107_v10 }
 0xc0b   : > { %3587 = vadd.xlane.f32.xlu0 %v3578_v6  ;;  %3585 = vadd.xlane.f32.xlu1 %v3577_v52 }
 0xc0c   : > { %v3583_v1 = vmul.f32 %v3576_v8, %v6076_v2  ;;  %v3584_v54 = vmul.f32 %v3576_v8, %v6085_v11 }
 0xc0f   : > { %3589 = vadd.xlane.f32.xlu0 %v3579_v44  ;;  %3591 = vadd.xlane.f32.xlu1 %v3580_v27 }
 0xc13   : > { %3593 = vadd.xlane.f32.xlu0 %v3581_v47  ;;  %3595 = vadd.xlane.f32.xlu1 %v3582_v28 }
 0xc17   : > { %3597 = vadd.xlane.f32.xlu0 %v3583_v1  ;;  %3599 = vadd.xlane.f32.xlu1 %v3584_v54 }
 0xc98   : > { %v3588_v39 = vpop.xlane.xlu0 %3587  ;;  %v3586_v34 = vpop.xlane.xlu1 %3585 }
 0xc99   : > { %v3602_v57 = vmul.f32 %v3588_v39, %v3588_v39  ;;  %v3601_v58 = vmul.f32 %v3586_v34, %v3586_v34 }
 0xc9b   : > { %v3624_v11 = vrot.slane %v3602_v57, %v6087_v13  ;;  %v3620_v16 = vrot.slane %v3601_v58, %v6089_v33 }
 0xc9c   : > { %v3590_v15 = vpop.xlane.xlu0 %3589  ;;  %v3592_v51 = vpop.xlane.xlu1 %3591 }
 0xc9d   : > { %v3603_v32 = vmul.f32 %v3590_v15, %v3590_v15  ;;  %v3604_v25 = vmul.f32 %v3592_v51, %v3592_v51  ;;  %v3625_v46 = vsel %vm2927_vm15, %v3624_v11, %v3620_v16 }
 0xc9f   : > { %v3629_v26 = vrot.slane %v3603_v32, %v6089_v33  ;;  %v3633_v23 = vrot.slane %v3604_v25, %v6087_v13 }
 0xca0   : > { %v3594_v18 = vpop.xlane.xlu0 %3593  ;;  %v3596_v42 = vpop.xlane.xlu1 %3595 }
 0xca1   : > { %v3605_v56 = vmul.f32 %v3594_v18, %v3594_v18  ;;  %v3606_v2 = vmul.f32 %v3596_v42, %v3596_v42  ;;  %v3634_v7 = vsel %vm2927_vm15, %v3633_v23, %v3629_v26 }
 0xca2   : > { %v3653_v48 = vsel %vm2758_vm8, %v3634_v7, %v3625_v46 }
 0xca3   : > { %v3638_v4 = vrot.slane %v3605_v56, %v6089_v33  ;;  %v3642_v50 = vrot.slane %v3606_v2, %v6087_v13 }
 0xca4   : > { %v3598_v24 = vpop.xlane.xlu0 %3597  ;;  %v3600_v21 = vpop.xlane.xlu1 %3599 }
 0xca5   : > { %v3607_v35 = vmul.f32 %v3598_v24, %v3598_v24  ;;  %v3608_v9 = vmul.f32 %v3600_v21, %v3600_v21  ;;  %v3643_v61 = vsel %vm2927_vm15, %v3642_v50, %v3638_v4 }
 0xca6   : > { %v3654_v60 = vsel %vm2761_vm9, %v3643_v61, %v3653_v48 }
 0xca7   : > { %v3647_v62 = vrot.slane %v3607_v35, %v6089_v33  ;;  %v3651_v43 = vrot.slane %v3608_v9, %v6087_v13 }
 0xca9   : > { %v3652_v30 = vsel %vm2927_vm15, %v3651_v43, %v3647_v62 }
 0xcaa   : > { %v3655_v29 = vsel %vm2764_vm10, %v3652_v30, %v3654_v60 }
 0xcab   : > { %v3657_v14 = vsel %vm2960_vm1, %v3655_v29, 0.0 }
 0xcac   : > { %3658 = vadd.xlane.f32.xlu0 %v3657_v14 }
 0xd39   : > { %v3659_v22 = vpop.xlane.xlu0 %3658 }
 0xd3a   : > { %v3660_v59 = vadd.f32 1e-16, %v3659_v22  ;;  %v3663_v19 = vadd.f32 1.0, %v3659_v22 }
 0xd3c   : > { %4680 = vrsqrt.f32 %v3660_v59 }
 0xd3d   : > { %4682 = vrcp.f32 %v3663_v19 }
 0xd46   : > { %v4681_v17 = vpop.eup %4680 }
 0xd47   : > { %v3662_v37 = vmul.f32 %v4681_v17, %v3659_v22  ;;  %v4683_v55 = vpop.eup %4682 }
 0xd49   : > { %v3665_v63 = vmul.f32 %v4683_v55, %v3662_v37 }
 0xd4b   : > { %v3670_v5 = vrot.slane %v3665_v63, %v6107_v10  ;;  %v3678_v31 = vrot.slane %v3665_v63, %v6113_v53  ;;  %v3674_v36 = vrot.slane %v3665_v63, %v6109_v12  ;;  %v3682_v20 = vrot.slane %v3665_v63, %v6116_v0 }
 0xd4d   : > { %v3688_v41 = vmul.f32 %v3670_v5, %v3588_v39  ;;  %v3687_v45 = vmul.f32 %v3670_v5, %v3586_v34  ;;  %v3691_v3 = vmul.f32 %v3678_v31, %v3594_v18  ;;  %v3689_v40 = vmul.f32 %v3674_v36, %v3590_v15 }
 0xd4e   : > { %v3693_v38 = vmul.f32 %v3682_v20, %v3598_v24  ;;  %v3690_v49 = vmul.f32 %v3674_v36, %v3592_v51  ;;  %v3692_v47 = vmul.f32 %v3678_v31, %v3596_v42  ;;  %v3694_v28 = vmul.f32 %v3682_v20, %v3600_v21 }
 0xd4f   : > { %v3696_v6 = vmul.f32 %v3688_v41, %v3688_v41  ;;  %v3695_v52 = vmul.f32 %v3687_v45, %v3687_v45  ;;  %v3699_v44 = vmul.f32 %v3691_v3, %v3691_v3  ;;  %v3697_v27 = vmul.f32 %v3689_v40, %v3689_v40 }
 0xd50   : > { %v3701_v10 = vmul.f32 %v3693_v38, %v3693_v38  ;;  %v3698_v53 = vmul.f32 %v3690_v49, %v3690_v49  ;;  %v3700_v12 = vmul.f32 %v3692_v47, %v3692_v47  ;;  %v3702_v0 = vmul.f32 %v3694_v28, %v3694_v28 }
 0xd51   : > { %3715 = vperm.xlu0 %4545, %v3696_v6   ;;  %3712 = vperm.xlu1 %4544, %v3695_v52  }
 0xd55   : > { %3724 = vperm.xlu0 %4545, %v3699_v44   ;;  %3718 = vperm.xlu1 %4544, %v3697_v27  }
 0xd59   : > { %3730 = vperm.xlu0 %4545, %v3701_v10   ;;  %3721 = vperm.xlu1 %4544, %v3698_v53  }
 0xd5d   : > { %3727 = vperm.xlu1 %4544, %v3700_v12  }
 0xd61   : > { %3733 = vperm.xlu1 %4544, %v3702_v0  }
 0xdd0   : > { %v3713_v8 = vpop.permute.xlu1 %3712  ;;  %v3716_v1 = vpop.permute.xlu0 %3715 }
 0xdd1   : > { %v3742_v32 = vrot.slane %v3716_v1, %v6087_v13  ;;  %v3738_v25 = vrot.slane %v3713_v8, %v6089_v33 }
 0xdd3   : > { %v3743_v2 = vsel %vm2927_vm15, %v3742_v32, %v3738_v25 }
 0xdd4   : > { %v3719_v54 = vpop.permute.xlu1 %3718  ;;  %v3725_v39 = vpop.permute.xlu0 %3724 }
 0xdd5   : > { %v3747_v57 = vrot.slane %v3719_v54, %v6089_v33  ;;  %v3756_v18 = vrot.slane %v3725_v39, %v6089_v33 }
 0xdd8   : > { %v3722_v34 = vpop.permute.xlu1 %3721  ;;  %v3731_v42 = vpop.permute.xlu0 %3730 }
 0xdd9   : > { %v3751_v15 = vrot.slane %v3722_v34, %v6087_v13  ;;  %v3765_v11 = vrot.slane %v3731_v42, %v6089_v33 }
 0xddb   : > { %v3752_v26 = vsel %vm2927_vm15, %v3751_v15, %v3747_v57 }
 0xddc   : > { %v3728_v51 = vpop.permute.xlu1 %3727  ;;  %v3771_v4 = vsel %vm2758_vm8, %v3752_v26, %v3743_v2 }
 0xddd   : > { %v3760_v58 = vrot.slane %v3728_v51, %v6087_v13 }
 0xddf   : > { %v3761_v23 = vsel %vm2927_vm15, %v3760_v58, %v3756_v18 }
 0xde0   : > { %v3734_v56 = vpop.permute.xlu1 %3733  ;;  %v3772_v24 = vsel %vm2761_vm9, %v3761_v23, %v3771_v4 }
 0xde1   : > { %v3769_v16 = vrot.slane %v3734_v56, %v6087_v13 }
 0xde3   : > { %v3770_v50 = vsel %vm2927_vm15, %v3769_v16, %v3765_v11 }
 0xde4   : > { %v3773_v21 = vsel %vm2764_vm10, %v3770_v50, %v3772_v24 }
 0xde5   : > { %v3775_v35 = vsel %vm2960_vm1, %v3773_v21, 0.0 }
 0xde6   : > { %3776 = vadd.xlane.f32.xlu0 %v3775_v35 }
 0xe73   : > { %v3777_v9 = vpop.xlane.xlu0 %3776 }
 0xe74   : > { %4684 = vrsqrt.f32 %v3777_v9  ;;  %vm3780_vm0 = vcmp.eq.f32.partialorder %v3777_v9, inf  ;;  %v3783_v33 = vand.u32 2147483648, %v3777_v9  ;;  %vm3782_vm2 = vcmp.eq.f32.partialorder %v3777_v9, 0.0 }
 0xe7e   : > { %v4685_v7 = vpop.eup %4684 }
 0xe7f   : > { %v3779_v61 = vmul.f32 %v4685_v7, %v3777_v9 }
 0xe81   : > { %v3781_v13 = vsel %vm3780_vm0, %v3777_v9, %v3779_v61 }
 0xe82   : > { %v3784_v62 = vsel %vm3782_vm2, %v3783_v33, %v3781_v13 }
 0xe83   : > { %3785 = vxpose.xlu1.b32.start.end [1/1] (short) (narrow) %v3784_v62, 8 }
 0xf03   : > { %v3801_v43 = vpop.trf.xlu1 }
 0xf04   : > { %3818 = vst.msk [vmem:[%s543_s23] sm:$0x1] %vm3817_vm3, %v3801_v43 }
 0xf05   : > { %4700 = shalt.err (!%p4697_p3)
}
 0xf06   : > { %s4701_s28 = scalar_lea.hbm %s6335_s24, 16  ;;  %s4705_s23 = scalar_lea.hbm %s6393_s16, 32 }
 0xf07   : > { %p4702_p4 = scmp.ne.s32.totalorder %s6335_s24, %s4701_s28  ;;  %p4706_p9 = scmp.lt.u32.totalorder %s6335_s24, %s6393_s16 }
 0xf08   : > { %p4707_p10 = scmp.lt.u32.totalorder %s4705_s23, %s4701_s28  ;;  %p4709_p12 = scmp.lt.u32.totalorder %s4701_s28, %s6335_s24 }
 0xf09   : > { %p4703_p7 = pnand %p4702_p4, %p4906_p5 }
 0xf0a   : > { %p4708_p11 = por %p4707_p10, %p4706_p9 }
 0xf0b   : > { %p4704_p8 = pneg %p4703_p7 }
 0xf0c   : > { %p4710_p13 = por %p4709_p12, %p4708_p11 }
 0xf0e   : > { %p4711_p0 = pnand %p4710_p13, %p4704_p8 }
 0xf10   : > { %4714 = shalt.err (!%p4711_p0)
}
 0xf11   : > { %4328 = dma.vmem_to_hbm [thread:$0]  (%p4906_p5), %s6337_s21, 16, %s6335_s24, %s3820_s27  }
 0xf12 PF: > { %s6557_s30 = sld [smem:[#allocation7_spill]]  ;;  %s6558_s25 = sld [smem:[#allocation5_spill]] }
 0xf18   : > { %p4334_p1 = scmp.ge.s32.totalorder %s6557_s30, 2  ;;  %s3844_s20 = sand.u32 1, %s6558_s25  }
 0xf19   : > { %s3845_s19 = scalar_lea.sflag [#allocation3], %s3844_s20 }
 0xf1a   : > { %p4331_p2 = pnand %p4334_p1, %p4910_p6 }
 0xf1c   : > { %4732 = dma.done.wait (!%p4331_p2), %s3845_s19, 16  }
 0xf1d   : > { %4734 = vsyncadd (!%p4331_p2), %s3845_s19, 4294967280  ;;  %s6560_s24 = sld [smem:[#allocation8_spill]]  ;;  %s6561_s28 = sld [smem:[#allocation6_spill]] }
 0xf1e   : > { %s6562_s23 = sld [smem:[#allocation9_spill]]  ;;  %s6563_s21 = smov %s4741_s22 }
 0xf23   : > { %p26_p3 = scmp.ge.s32.totalorder %s6560_s24, 4   ;;  %s6564_s22 = smov %s6561_s28 }
 0xf25   :  { %28 = sbr.rel (!%p26_p3) target bundleno = 5 (0x5), region = 128 }
 0xf2c   :  { %3849 = vsyncpa [#allocation3], 1 }
 0xf2d   :  { %3851 = vsyncpa [#allocation3 + $0x1], 1 }

</bundles_post_ra>
